<compile_context>
chip_gen: v6e
topology: v6e:2x2x1
jax: 0.10.0
libtpu: 0.0.40
codegen_flags: <defaults>
</compile_context>

<pallas_src>
import functools

import jax
import jax.numpy as jnp
from jax.experimental import pallas as pl
from jax.experimental.pallas import tpu as pltpu


# ----------------------------------------------------------------------------
# Fused Pallas kernel: all LSTM layers (both directions) + linear head.
# ----------------------------------------------------------------------------
def make_fused_lstm_kernel(T, Bblk, H, n_layers):
    """Builds the fused kernel for static (T, Bblk, H, n_layers).

    Inputs (in order):
      x_ref:                (T*Bblk, E) bf16  time-major rows ordered [t, b]
      per layer, per direction (fwd then bwd):
        wih_t:              (D_in, 4H)  bf16  pre-transposed input->gate weights
        whh_t:              (H, 4H)     bf16  pre-transposed packed recurrent weights
        bias:               (1, 4H)     f32   b_ih + b_hh
      fcw_f, fcw_b:         (1, H)      f32   fc weight split into fwd/bwd halves
      fcb:                  (1, 1)      f32
    Output:
      out_ref:              (Bblk, 1)   f32   logits for this batch block
    Scratch:
      xgf_ref, xgb_ref:     (T*Bblk, 4H) f32  staged gate pre-activations
      actf_ref, actb_ref:   (T*Bblk, H)  bf16 previous layer's per-step outputs
    """
    G4 = 4 * H

    def kernel(x_ref, *rest):
        n_w = n_layers * 2 * 3
        w_refs = rest[:n_w]
        (fcwf_ref, fcwb_ref, fcb_ref, out_ref,
         xgf_ref, xgb_ref, actf_ref, actb_ref) = rest[n_w:]

        def cell(xg, h, c, whh_t):
            # xg:    (Bblk, 4H) f32  hoisted input projection (+ bias), gate order i|f|g|o
            # h, c:  (Bblk, H)  f32
            # whh_t: (H, 4H)    bf16 packed recurrent weights -> ONE fused matmul
            gates = xg + jnp.dot(h.astype(jnp.bfloat16), whh_t,
                                 preferred_element_type=jnp.float32)
            # 3 EUP pushes per cell: one sigmoid over the packed lane-dense
            # (Bblk, 4H) gate vector, tanh on the g slice, tanh(c_new).
            sig = jax.nn.sigmoid(gates)
            g = jnp.tanh(gates[:, 2 * H:3 * H])
            i = sig[:, 0 * H:1 * H]
            f = sig[:, 1 * H:2 * H]
            o = sig[:, 3 * H:4 * H]
            c_new = f * c + i * g
            h_new = o * jnp.tanh(c_new)
            return h_new, c_new

        h_f = h_b = None
        for layer in range(n_layers):
            (wihf_ref, whhf_ref, bf_ref,
             wihb_ref, whhb_ref, bb_ref) = w_refs[layer * 6:(layer + 1) * 6]

            # --- Hoisted input projection: one wide bf16 matmul per direction
            # --- for ALL timesteps, computed before the serial recurrence.
            if layer == 0:
                x0 = x_ref[...]                                   # (T*Bblk, E) bf16
                xg_f = (jnp.dot(x0, wihf_ref[...],
                                preferred_element_type=jnp.float32) + bf_ref[...])
                xg_b = (jnp.dot(x0, wihb_ref[...],
                                preferred_element_type=jnp.float32) + bb_ref[...])
            else:
                af = actf_ref[...]                                # (T*Bblk, H) bf16
                ab = actb_ref[...]
                wih_f = wihf_ref[...]                             # (2H, 4H) bf16
                wih_b = wihb_ref[...]
                xg_f = (jnp.dot(af, wih_f[:H, :], preferred_element_type=jnp.float32)
                        + jnp.dot(ab, wih_f[H:, :], preferred_element_type=jnp.float32)
                        + bf_ref[...])
                xg_b = (jnp.dot(af, wih_b[:H, :], preferred_element_type=jnp.float32)
                        + jnp.dot(ab, wih_b[H:, :], preferred_element_type=jnp.float32)
                        + bb_ref[...])

            # Stage gate pre-activations in VMEM scratch: per-step reads below
            # are tile-aligned (8 sublane x 128 lane) slabs and the (T*Bblk,4H)
            # temporaries don't stay live across the unrolled serial loop.
            xgf_ref[...] = xg_f
            xgb_ref[...] = xg_b

            whf = whhf_ref[...]                                   # (H, 4H) bf16
            whb = whhb_ref[...]

            h_f = jnp.zeros((Bblk, H), jnp.float32)
            c_f = jnp.zeros((Bblk, H), jnp.float32)
            h_b = jnp.zeros((Bblk, H), jnp.float32)
            c_b = jnp.zeros((Bblk, H), jnp.float32)

            last_layer = layer == n_layers - 1
            # Serial recurrence, fully unrolled (small static T); fwd and bwd
            # cells interleaved so their independent matmuls overlap.
            # TODO(synk): for large T switch to lax.fori_loop(..., unroll=4..8)
            # with pl.ds/pl.multiple_of row offsets to bound vreg pressure.
            for s in range(T):
                tb = T - 1 - s
                h_f, c_f = cell(xgf_ref[s * Bblk:(s + 1) * Bblk, :], h_f, c_f, whf)
                h_b, c_b = cell(xgb_ref[tb * Bblk:(tb + 1) * Bblk, :], h_b, c_b, whb)
                if not last_layer:
                    actf_ref[s * Bblk:(s + 1) * Bblk, :] = h_f.astype(jnp.bfloat16)
                    actb_ref[tb * Bblk:(tb + 1) * Bblk, :] = h_b.astype(jnp.bfloat16)

        # --- FC head: out_features == 1 -> VPU multiply + lane reduction.    ---
        # last_hidden = concat(fwd hidden at t=T-1, bwd hidden at t=0); both are
        # the final h of each direction's recurrence.
        logits = (jnp.sum(h_f * fcwf_ref[...], axis=-1, keepdims=True)
                  + jnp.sum(h_b * fcwb_ref[...], axis=-1, keepdims=True)
                  + fcb_ref[...])
        out_ref[...] = logits

    return kernel


# ----------------------------------------------------------------------------
# Wrapper around pallas_call
# ----------------------------------------------------------------------------
@functools.partial(jax.jit, static_argnames=("hidden_dim", "n_layers"))
def lstm_forward(params, text, *, hidden_dim, n_layers):
    """text: (B, T, E) float32 (batch_first, like PyTorch) -> (B, 1) logits."""
    B, T, E = text.shape
    H = hidden_dim
    G4 = 4 * H
    BBLK = 8                               # sublane-aligned batch block
    Bp = -(-B // BBLK) * BBLK              # batch padded to multiple of 8
    nb = Bp // BBLK

    # Layout plumbing (HBM-side): pad batch, go time-major inside each batch
    # block, cast matmul operands to bf16.
    x = jnp.pad(text, ((0, Bp - B), (0, 0), (0, 0)))           # (Bp, T, E)
    x = x.reshape(nb, BBLK, T, E).transpose(0, 2, 1, 3)        # (nb, T, BBLK, E)
    x = x.reshape(nb, T * BBLK, E).astype(jnp.bfloat16)

    def full_spec(shape):
        zeros = (0,) * len(shape)
        return pl.BlockSpec(shape, lambda j: zeros)

    args = [x]
    in_specs = [pl.BlockSpec((None, T * BBLK, E), lambda j: (j, 0, 0))]
    for layer in range(n_layers):
        for direction in range(2):
            p = params["layers"][layer][direction]
            wih_t = p["wih_t"].astype(jnp.bfloat16)
            whh_t = p["whh_t"].astype(jnp.bfloat16)
            bias = p["bias"]
            args += [wih_t, whh_t, bias]
            in_specs += [full_spec(wih_t.shape), full_spec(whh_t.shape),
                         full_spec(bias.shape)]
    fc_w = params["fc_w"]
    args += [fc_w[:, :H], fc_w[:, H:], params["fc_b"]]
    in_specs += [full_spec((1, H)), full_spec((1, H)), full_spec((1, 1))]

    scratch_shapes = [
        pltpu.VMEM((T * BBLK, G4), jnp.float32),   # fwd gate pre-activations
        pltpu.VMEM((T * BBLK, G4), jnp.float32),   # bwd gate pre-activations
        pltpu.VMEM((T * BBLK, H), jnp.bfloat16),   # fwd outputs of previous layer
        pltpu.VMEM((T * BBLK, H), jnp.bfloat16),   # bwd outputs of previous layer
    ]

    # Explicit VMEM budget (v7x only has 64 MiB physical VMEM; default scoped
    # limit is 16/32 MiB). Sized to the real working set with headroom.
    def _nbytes(a):
        return int(a.size) * jnp.dtype(a.dtype).itemsize
    block_bytes = (T * BBLK * E * 2                    # x block (bf16)
                   + sum(_nbytes(a) for a in args[1:])  # weights (unblocked)
                   + BBLK * 4)                          # out block
    scratch_bytes = 2 * T * BBLK * G4 * 4 + 2 * T * BBLK * H * 2
    vmem_limit = min(56 * 1024 * 1024,
                     max(32 * 1024 * 1024,
                         2 * (block_bytes + scratch_bytes) + (4 << 20)))
    # TODO(synk): if the working set exceeds ~56 MiB (large T/H/n_layers),
    # block the time axis (grid or manual double-buffered DMA of xg chunks).

    kernel = make_fused_lstm_kernel(T, BBLK, H, n_layers)
    out = pl.pallas_call(
        kernel,
        out_shape=jax.ShapeDtypeStruct((Bp, 1), jnp.float32),
        grid=(nb,),
        in_specs=in_specs,
        out_specs=pl.BlockSpec((BBLK, 1), lambda j: (j, 0)),
        scratch_shapes=scratch_shapes,
        compiler_params=pltpu.CompilerParams(
            dimension_semantics=("parallel",),
            vmem_limit_bytes=vmem_limit),
    )(*args)
    return out[:B]


def lstm_predict(params, text, *, hidden_dim, n_layers):
    return jax.nn.sigmoid(
        lstm_forward(params, text, hidden_dim=hidden_dim, n_layers=n_layers))


# ----------------------------------------------------------------------------
# Parameter construction (PyTorch-style uniform init, pre-transposed layout)
# ----------------------------------------------------------------------------
def init_params(key, embedding_dim, hidden_dim, n_layers):
    H = hidden_dim
    k = 1.0 / (H ** 0.5)
    layers = []
    for layer in range(n_layers):
        d_in = embedding_dim if layer == 0 else 2 * H
        dirs = []
        for _direction in range(2):
            key, k1, k2, k3, k4 = jax.random.split(key, 5)
            wih = jax.random.uniform(k1, (4 * H, d_in), jnp.float32, -k, k)
            whh = jax.random.uniform(k2, (4 * H, H), jnp.float32, -k, k)
            b_ih = jax.random.uniform(k3, (4 * H,), jnp.float32, -k, k)
            b_hh = jax.random.uniform(k4, (4 * H,), jnp.float32, -k, k)
            dirs.append({
                "wih_t": wih.T,                            # (d_in, 4H), gate cols i|f|g|o
                "whh_t": whh.T,                            # (H, 4H),   gate cols i|f|g|o
                "bias": (b_ih + b_hh).reshape(1, 4 * H),   # (1, 4H)
            })
        layers.append(dirs)
    key, k1, k2 = jax.random.split(key, 3)
    kf = 1.0 / ((2 * H) ** 0.5)
    return {
        "layers": layers,
        "fc_w": jax.random.uniform(k1, (1, 2 * H), jnp.float32, -kf, kf),
        "fc_b": jax.random.uniform(k2, (1, 1), jnp.float32, -kf, kf),
    }


# ----------------------------------------------------------------------------
# Pure-JAX reference (mirrors PyTorch bidirectional LSTM + FC) for validation
# ----------------------------------------------------------------------------
def _lstm_forward_reference(params, text, *, hidden_dim, n_layers):
    H = hidden_dim
    B, T, _ = text.shape
    hp = jax.lax.Precision.HIGHEST
    layer_in = text
    for layer in range(n_layers):
        outs = []
        for direction in range(2):
            p = params["layers"][layer][direction]
            wih_t, whh_t, bias = p["wih_t"], p["whh_t"], p["bias"]
            xs = layer_in if direction == 0 else layer_in[:, ::-1, :]
            h = jnp.zeros((B, H), jnp.float32)
            c = jnp.zeros((B, H), jnp.float32)
            hs = []
            for t in range(T):
                gates = (jnp.dot(xs[:, t, :], wih_t, precision=hp) + bias
                         + jnp.dot(h, whh_t, precision=hp))
                i = jax.nn.sigmoid(gates[:, 0 * H:1 * H])
                f = jax.nn.sigmoid(gates[:, 1 * H:2 * H])
                g_ = jnp.tanh(gates[:, 2 * H:3 * H])
                o = jax.nn.sigmoid(gates[:, 3 * H:4 * H])
                c = f * c + i * g_
                h = o * jnp.tanh(c)
                hs.append(h)
            out = jnp.stack(hs, axis=1)            # (B, T, H)
            if direction == 1:
                out = out[:, ::-1, :]
            outs.append(out)
        layer_in = jnp.concatenate(outs, axis=-1)  # (B, T, 2H)
    last = jnp.concatenate([layer_in[:, -1, :H], layer_in[:, 0, H:]], axis=1)
    return jnp.dot(last, params["fc_w"].T, precision=hp) + params["fc_b"]


# ----------------------------------------------------------------------------
# Main
# ----------------------------------------------------------------------------
if __name__ == "__main__":
    B, T = 2, 8
    embedding_dim = 16
    hidden_dim = 32
    n_layers = 2
    dropout = 0.5  # unused at inference (identity)

    key = jax.random.PRNGKey(0)
    key, pkey, xkey = jax.random.split(key, 3)
    params = init_params(pkey, embedding_dim, hidden_dim, n_layers)
    text = jax.random.normal(xkey, (B, T, embedding_dim), jnp.float32)

    logits = lstm_forward(params, text, hidden_dim=hidden_dim, n_layers=n_layers)
    logits = jax.block_until_ready(logits)
    assert logits.shape == (B, 1) and logits.dtype == jnp.float32

    ref = _lstm_forward_reference(params, text, hidden_dim=hidden_dim,
                                  n_layers=n_layers)
    # bf16 matmul operands with f32 accumulation vs. f32 HIGHEST reference.
    assert jnp.allclose(logits, ref, atol=5e-2, rtol=5e-2), (logits, ref)

    probs = jax.block_until_ready(
        lstm_predict(params, text, hidden_dim=hidden_dim, n_layers=n_layers))
    assert probs.shape == (B, 1)

    print("KERNEL_OK")
</pallas_src>

<mosaic_0001>
module attributes {stable_mosaic.version = 11 : i64} {
  func.func @kernel(%arg0: i32, %arg1: memref<1x64x16xbf16, #tpu.memory_space<vmem>>, %arg2: memref<16x128xbf16, #tpu.memory_space<vmem>>, %arg3: memref<32x128xbf16, #tpu.memory_space<vmem>>, %arg4: memref<1x128xf32, #tpu.memory_space<vmem>>, %arg5: memref<16x128xbf16, #tpu.memory_space<vmem>>, %arg6: memref<32x128xbf16, #tpu.memory_space<vmem>>, %arg7: memref<1x128xf32, #tpu.memory_space<vmem>>, %arg8: memref<64x128xbf16, #tpu.memory_space<vmem>>, %arg9: memref<32x128xbf16, #tpu.memory_space<vmem>>, %arg10: memref<1x128xf32, #tpu.memory_space<vmem>>, %arg11: memref<64x128xbf16, #tpu.memory_space<vmem>>, %arg12: memref<32x128xbf16, #tpu.memory_space<vmem>>, %arg13: memref<1x128xf32, #tpu.memory_space<vmem>>, %arg14: memref<1x32xf32, #tpu.memory_space<vmem>>, %arg15: memref<1x32xf32, #tpu.memory_space<vmem>>, %arg16: memref<1x1xf32, #tpu.memory_space<vmem>>, %arg17: memref<8x1xf32, #tpu.memory_space<vmem>>, %arg18: memref<64x128xf32, #tpu.memory_space<vmem>>, %arg19: memref<64x128xf32, #tpu.memory_space<vmem>>, %arg20: memref<64x32xbf16, #tpu.memory_space<vmem>>, %arg21: memref<64x32xbf16, #tpu.memory_space<vmem>>) attributes {dimension_semantics = [#tpu.dimension_semantics<parallel>], iteration_bounds = array<i64: 1>, scalar_prefetch = 0 : i64, scratch_operands = 4 : i64, tpu.core_type = #tpu.core_type<tc>, window_params = [{transform_indices = @transform_0, window_bounds = array<i64: 1, 64, 16>}, {pipeline_mode = #tpu.pipeline_mode<synchronous>, transform_indices = @transform_1, window_bounds = array<i64: 16, 128>}, {pipeline_mode = #tpu.pipeline_mode<synchronous>, transform_indices = @transform_2, window_bounds = array<i64: 32, 128>}, {pipeline_mode = #tpu.pipeline_mode<synchronous>, transform_indices = @transform_3, window_bounds = array<i64: 1, 128>}, {pipeline_mode = #tpu.pipeline_mode<synchronous>, transform_indices = @transform_4, window_bounds = array<i64: 16, 128>}, {pipeline_mode = #tpu.pipeline_mode<synchronous>, transform_indices = @transform_5, window_bounds = array<i64: 32, 128>}, {pipeline_mode = #tpu.pipeline_mode<synchronous>, transform_indices = @transform_6, window_bounds = array<i64: 1, 128>}, {pipeline_mode = #tpu.pipeline_mode<synchronous>, transform_indices = @transform_7, window_bounds = array<i64: 64, 128>}, {pipeline_mode = #tpu.pipeline_mode<synchronous>, transform_indices = @transform_8, window_bounds = array<i64: 32, 128>}, {pipeline_mode = #tpu.pipeline_mode<synchronous>, transform_indices = @transform_9, window_bounds = array<i64: 1, 128>}, {pipeline_mode = #tpu.pipeline_mode<synchronous>, transform_indices = @transform_10, window_bounds = array<i64: 64, 128>}, {pipeline_mode = #tpu.pipeline_mode<synchronous>, transform_indices = @transform_11, window_bounds = array<i64: 32, 128>}, {pipeline_mode = #tpu.pipeline_mode<synchronous>, transform_indices = @transform_12, window_bounds = array<i64: 1, 128>}, {pipeline_mode = #tpu.pipeline_mode<synchronous>, transform_indices = @transform_13, window_bounds = array<i64: 1, 32>}, {pipeline_mode = #tpu.pipeline_mode<synchronous>, transform_indices = @transform_14, window_bounds = array<i64: 1, 32>}, {pipeline_mode = #tpu.pipeline_mode<synchronous>, transform_indices = @transform_15, window_bounds = array<i64: 1, 1>}, {transform_indices = @transform_16, window_bounds = array<i64: 8, 1>}]} {
    %c0 = arith.constant 0 : index
    %c0_0 = arith.constant 0 : index
    %c0_1 = arith.constant 0 : index
    %0 = vector.load %arg1[%c0, %c0_0, %c0_1] : memref<1x64x16xbf16, #tpu.memory_space<vmem>>, vector<1x64x16xbf16>
    %1 = vector.shape_cast %0 : vector<1x64x16xbf16> to vector<64x16xbf16>
    %c0_2 = arith.constant 0 : index
    %c0_3 = arith.constant 0 : index
    %2 = vector.load %arg2[%c0_2, %c0_3] : memref<16x128xbf16, #tpu.memory_space<vmem>>, vector<16x128xbf16>
    %cst = arith.constant dense<0.000000e+00> : vector<64x128xf32>
    %3 = tpu.matmul %1, %2, %cst {dimension_numbers = #tpu.dot_dimension_numbers<[1], [0], [0], [1], [0, 0, 1, 1], [], []>} : vector<64x16xbf16>, vector<16x128xbf16>, vector<64x128xf32> -> vector<64x128xf32>
    %c0_4 = arith.constant 0 : index
    %c0_5 = arith.constant 0 : index
    %4 = vector.load %arg4[%c0_4, %c0_5] : memref<1x128xf32, #tpu.memory_space<vmem>>, vector<1x128xf32>
    %5 = vector.broadcast %4 : vector<1x128xf32> to vector<64x128xf32>
    %6 = arith.addf %3, %5 : vector<64x128xf32>
    %c0_6 = arith.constant 0 : index
    %c0_7 = arith.constant 0 : index
    %7 = vector.load %arg5[%c0_6, %c0_7] : memref<16x128xbf16, #tpu.memory_space<vmem>>, vector<16x128xbf16>
    %cst_8 = arith.constant dense<0.000000e+00> : vector<64x128xf32>
    %8 = tpu.matmul %1, %7, %cst_8 {dimension_numbers = #tpu.dot_dimension_numbers<[1], [0], [0], [1], [0, 0, 1, 1], [], []>} : vector<64x16xbf16>, vector<16x128xbf16>, vector<64x128xf32> -> vector<64x128xf32>
    %c0_9 = arith.constant 0 : index
    %c0_10 = arith.constant 0 : index
    %9 = vector.load %arg7[%c0_9, %c0_10] : memref<1x128xf32, #tpu.memory_space<vmem>>, vector<1x128xf32>
    %10 = vector.broadcast %9 : vector<1x128xf32> to vector<64x128xf32>
    %11 = arith.addf %8, %10 : vector<64x128xf32>
    %c0_11 = arith.constant 0 : index
    %c0_12 = arith.constant 0 : index
    %12 = vector.load %arg18[%c0_11, %c0_12] : memref<64x128xf32, #tpu.memory_space<vmem>>, vector<64x128xf32>
    tpu.vector_store %arg18[%c0_11, %c0_12], %6 {strides = array<i32>} : memref<64x128xf32, #tpu.memory_space<vmem>>, vector<64x128xf32>,
    %c0_13 = arith.constant 0 : index
    %c0_14 = arith.constant 0 : index
    %13 = vector.load %arg19[%c0_13, %c0_14] : memref<64x128xf32, #tpu.memory_space<vmem>>, vector<64x128xf32>
    tpu.vector_store %arg19[%c0_13, %c0_14], %11 {strides = array<i32>} : memref<64x128xf32, #tpu.memory_space<vmem>>, vector<64x128xf32>,
    %c0_15 = arith.constant 0 : index
    %c0_16 = arith.constant 0 : index
    %14 = vector.load %arg3[%c0_15, %c0_16] : memref<32x128xbf16, #tpu.memory_space<vmem>>, vector<32x128xbf16>
    %c0_17 = arith.constant 0 : index
    %c0_18 = arith.constant 0 : index
    %15 = vector.load %arg6[%c0_17, %c0_18] : memref<32x128xbf16, #tpu.memory_space<vmem>>, vector<32x128xbf16>
    %cst_19 = arith.constant 0.000000e+00 : f32
    %16 = vector.broadcast %cst_19 : f32 to vector<8x32xf32>
    %cst_20 = arith.constant 0.000000e+00 : f32
    %17 = vector.broadcast %cst_20 : f32 to vector<8x32xf32>
    %cst_21 = arith.constant 0.000000e+00 : f32
    %18 = vector.broadcast %cst_21 : f32 to vector<8x32xf32>
    %cst_22 = arith.constant 0.000000e+00 : f32
    %19 = vector.broadcast %cst_22 : f32 to vector<8x32xf32>
    %c0_23 = arith.constant 0 : index
    %c0_24 = arith.constant 0 : index
    %20 = vector.load %arg18[%c0_23, %c0_24] : memref<64x128xf32, #tpu.memory_space<vmem>>, vector<8x128xf32>
    %21 = arith.truncf %16 : vector<8x32xf32> to vector<8x32xbf16>
    %cst_25 = arith.constant dense<0.000000e+00> : vector<8x128xf32>
    %22 = tpu.matmul %21, %14, %cst_25 {dimension_numbers = #tpu.dot_dimension_numbers<[1], [0], [0], [1], [0, 0, 1, 1], [], []>} : vector<8x32xbf16>, vector<32x128xbf16>, vector<8x128xf32> -> vector<8x128xf32>
    %23 = arith.addf %20, %22 : vector<8x128xf32>
    %24 = arith.negf %23 : vector<8x128xf32>
    %25 = math.exp %24 : vector<8x128xf32>
    %cst_26 = arith.constant 1.000000e+00 : f32
    %26 = vector.broadcast %cst_26 : f32 to vector<8x128xf32>
    %27 = arith.addf %26, %25 : vector<8x128xf32>
    %28 = arith.divf %26, %27 : vector<8x128xf32>
    %29 = vector.extract_strided_slice %23 {offsets = [0, 64], sizes = [8, 32], strides = [1, 1]} : vector<8x128xf32> to vector<8x32xf32>
    %30 = math.tanh %29 : vector<8x32xf32>
    %31 = vector.extract_strided_slice %28 {offsets = [0, 0], sizes = [8, 32], strides = [1, 1]} : vector<8x128xf32> to vector<8x32xf32>
    %32 = vector.extract_strided_slice %28 {offsets = [0, 32], sizes = [8, 32], strides = [1, 1]} : vector<8x128xf32> to vector<8x32xf32>
    %33 = vector.extract_strided_slice %28 {offsets = [0, 96], sizes = [8, 32], strides = [1, 1]} : vector<8x128xf32> to vector<8x32xf32>
    %34 = arith.mulf %32, %17 : vector<8x32xf32>
    %35 = arith.mulf %31, %30 : vector<8x32xf32>
    %36 = arith.addf %34, %35 : vector<8x32xf32>
    %37 = math.tanh %36 : vector<8x32xf32>
    %38 = arith.mulf %33, %37 : vector<8x32xf32>
    %c56 = arith.constant 56 : index
    %c0_27 = arith.constant 0 : index
    %39 = vector.load %arg19[%c56, %c0_27] : memref<64x128xf32, #tpu.memory_space<vmem>>, vector<8x128xf32>
    %40 = arith.truncf %18 : vector<8x32xf32> to vector<8x32xbf16>
    %cst_28 = arith.constant dense<0.000000e+00> : vector<8x128xf32>
    %41 = tpu.matmul %40, %15, %cst_28 {dimension_numbers = #tpu.dot_dimension_numbers<[1], [0], [0], [1], [0, 0, 1, 1], [], []>} : vector<8x32xbf16>, vector<32x128xbf16>, vector<8x128xf32> -> vector<8x128xf32>
    %42 = arith.addf %39, %41 : vector<8x128xf32>
    %43 = arith.negf %42 : vector<8x128xf32>
    %44 = math.exp %43 : vector<8x128xf32>
    %cst_29 = arith.constant 1.000000e+00 : f32
    %45 = vector.broadcast %cst_29 : f32 to vector<8x128xf32>
    %46 = arith.addf %45, %44 : vector<8x128xf32>
    %47 = arith.divf %45, %46 : vector<8x128xf32>
    %48 = vector.extract_strided_slice %42 {offsets = [0, 64], sizes = [8, 32], strides = [1, 1]} : vector<8x128xf32> to vector<8x32xf32>
    %49 = math.tanh %48 : vector<8x32xf32>
    %50 = vector.extract_strided_slice %47 {offsets = [0, 0], sizes = [8, 32], strides = [1, 1]} : vector<8x128xf32> to vector<8x32xf32>
    %51 = vector.extract_strided_slice %47 {offsets = [0, 32], sizes = [8, 32], strides = [1, 1]} : vector<8x128xf32> to vector<8x32xf32>
    %52 = vector.extract_strided_slice %47 {offsets = [0, 96], sizes = [8, 32], strides = [1, 1]} : vector<8x128xf32> to vector<8x32xf32>
    %53 = arith.mulf %51, %19 : vector<8x32xf32>
    %54 = arith.mulf %50, %49 : vector<8x32xf32>
    %55 = arith.addf %53, %54 : vector<8x32xf32>
    %56 = math.tanh %55 : vector<8x32xf32>
    %57 = arith.mulf %52, %56 : vector<8x32xf32>
    %58 = arith.truncf %38 : vector<8x32xf32> to vector<8x32xbf16>
    %c0_30 = arith.constant 0 : index
    %c0_31 = arith.constant 0 : index
    %59 = vector.load %arg20[%c0_30, %c0_31] : memref<64x32xbf16, #tpu.memory_space<vmem>>, vector<8x32xbf16>
    tpu.vector_store %arg20[%c0_30, %c0_31], %58 {strides = array<i32>} : memref<64x32xbf16, #tpu.memory_space<vmem>>, vector<8x32xbf16>,
    %60 = arith.truncf %57 : vector<8x32xf32> to vector<8x32xbf16>
    %c56_32 = arith.constant 56 : index
    %c0_33 = arith.constant 0 : index
    %61 = vector.load %arg21[%c56_32, %c0_33] : memref<64x32xbf16, #tpu.memory_space<vmem>>, vector<8x32xbf16>
    tpu.vector_store %arg21[%c56_32, %c0_33], %60 {strides = array<i32>} : memref<64x32xbf16, #tpu.memory_space<vmem>>, vector<8x32xbf16>,
    %c8 = arith.constant 8 : index
    %c0_34 = arith.constant 0 : index
    %62 = vector.load %arg18[%c8, %c0_34] : memref<64x128xf32, #tpu.memory_space<vmem>>, vector<8x128xf32>
    %63 = arith.truncf %38 : vector<8x32xf32> to vector<8x32xbf16>
    %cst_35 = arith.constant dense<0.000000e+00> : vector<8x128xf32>
    %64 = tpu.matmul %63, %14, %cst_35 {dimension_numbers = #tpu.dot_dimension_numbers<[1], [0], [0], [1], [0, 0, 1, 1], [], []>} : vector<8x32xbf16>, vector<32x128xbf16>, vector<8x128xf32> -> vector<8x128xf32>
    %65 = arith.addf %62, %64 : vector<8x128xf32>
    %66 = arith.negf %65 : vector<8x128xf32>
    %67 = math.exp %66 : vector<8x128xf32>
    %cst_36 = arith.constant 1.000000e+00 : f32
    %68 = vector.broadcast %cst_36 : f32 to vector<8x128xf32>
    %69 = arith.addf %68, %67 : vector<8x128xf32>
    %70 = arith.divf %68, %69 : vector<8x128xf32>
    %71 = vector.extract_strided_slice %65 {offsets = [0, 64], sizes = [8, 32], strides = [1, 1]} : vector<8x128xf32> to vector<8x32xf32>
    %72 = math.tanh %71 : vector<8x32xf32>
    %73 = vector.extract_strided_slice %70 {offsets = [0, 0], sizes = [8, 32], strides = [1, 1]} : vector<8x128xf32> to vector<8x32xf32>
    %74 = vector.extract_strided_slice %70 {offsets = [0, 32], sizes = [8, 32], strides = [1, 1]} : vector<8x128xf32> to vector<8x32xf32>
    %75 = vector.extract_strided_slice %70 {offsets = [0, 96], sizes = [8, 32], strides = [1, 1]} : vector<8x128xf32> to vector<8x32xf32>
    %76 = arith.mulf %74, %36 : vector<8x32xf32>
    %77 = arith.mulf %73, %72 : vector<8x32xf32>
    %78 = arith.addf %76, %77 : vector<8x32xf32>
    %79 = math.tanh %78 : vector<8x32xf32>
    %80 = arith.mulf %75, %79 : vector<8x32xf32>
    %c48 = arith.constant 48 : index
    %c0_37 = arith.constant 0 : index
    %81 = vector.load %arg19[%c48, %c0_37] : memref<64x128xf32, #tpu.memory_space<vmem>>, vector<8x128xf32>
    %82 = arith.truncf %57 : vector<8x32xf32> to vector<8x32xbf16>
    %cst_38 = arith.constant dense<0.000000e+00> : vector<8x128xf32>
    %83 = tpu.matmul %82, %15, %cst_38 {dimension_numbers = #tpu.dot_dimension_numbers<[1], [0], [0], [1], [0, 0, 1, 1], [], []>} : vector<8x32xbf16>, vector<32x128xbf16>, vector<8x128xf32> -> vector<8x128xf32>
    %84 = arith.addf %81, %83 : vector<8x128xf32>
    %85 = arith.negf %84 : vector<8x128xf32>
    %86 = math.exp %85 : vector<8x128xf32>
    %cst_39 = arith.constant 1.000000e+00 : f32
    %87 = vector.broadcast %cst_39 : f32 to vector<8x128xf32>
    %88 = arith.addf %87, %86 : vector<8x128xf32>
    %89 = arith.divf %87, %88 : vector<8x128xf32>
    %90 = vector.extract_strided_slice %84 {offsets = [0, 64], sizes = [8, 32], strides = [1, 1]} : vector<8x128xf32> to vector<8x32xf32>
    %91 = math.tanh %90 : vector<8x32xf32>
    %92 = vector.extract_strided_slice %89 {offsets = [0, 0], sizes = [8, 32], strides = [1, 1]} : vector<8x128xf32> to vector<8x32xf32>
    %93 = vector.extract_strided_slice %89 {offsets = [0, 32], sizes = [8, 32], strides = [1, 1]} : vector<8x128xf32> to vector<8x32xf32>
    %94 = vector.extract_strided_slice %89 {offsets = [0, 96], sizes = [8, 32], strides = [1, 1]} : vector<8x128xf32> to vector<8x32xf32>
    %95 = arith.mulf %93, %55 : vector<8x32xf32>
    %96 = arith.mulf %92, %91 : vector<8x32xf32>
    %97 = arith.addf %95, %96 : vector<8x32xf32>
    %98 = math.tanh %97 : vector<8x32xf32>
    %99 = arith.mulf %94, %98 : vector<8x32xf32>
    %100 = arith.truncf %80 : vector<8x32xf32> to vector<8x32xbf16>
    %c8_40 = arith.constant 8 : index
    %c0_41 = arith.constant 0 : index
    %101 = vector.load %arg20[%c8_40, %c0_41] : memref<64x32xbf16, #tpu.memory_space<vmem>>, vector<8x32xbf16>
    tpu.vector_store %arg20[%c8_40, %c0_41], %100 {strides = array<i32>} : memref<64x32xbf16, #tpu.memory_space<vmem>>, vector<8x32xbf16>,
    %102 = arith.truncf %99 : vector<8x32xf32> to vector<8x32xbf16>
    %c48_42 = arith.constant 48 : index
    %c0_43 = arith.constant 0 : index
    %103 = vector.load %arg21[%c48_42, %c0_43] : memref<64x32xbf16, #tpu.memory_space<vmem>>, vector<8x32xbf16>
    tpu.vector_store %arg21[%c48_42, %c0_43], %102 {strides = array<i32>} : memref<64x32xbf16, #tpu.memory_space<vmem>>, vector<8x32xbf16>,
    %c16 = arith.constant 16 : index
    %c0_44 = arith.constant 0 : index
    %104 = vector.load %arg18[%c16, %c0_44] : memref<64x128xf32, #tpu.memory_space<vmem>>, vector<8x128xf32>
    %105 = arith.truncf %80 : vector<8x32xf32> to vector<8x32xbf16>
    %cst_45 = arith.constant dense<0.000000e+00> : vector<8x128xf32>
    %106 = tpu.matmul %105, %14, %cst_45 {dimension_numbers = #tpu.dot_dimension_numbers<[1], [0], [0], [1], [0, 0, 1, 1], [], []>} : vector<8x32xbf16>, vector<32x128xbf16>, vector<8x128xf32> -> vector<8x128xf32>
    %107 = arith.addf %104, %106 : vector<8x128xf32>
    %108 = arith.negf %107 : vector<8x128xf32>
    %109 = math.exp %108 : vector<8x128xf32>
    %cst_46 = arith.constant 1.000000e+00 : f32
    %110 = vector.broadcast %cst_46 : f32 to vector<8x128xf32>
    %111 = arith.addf %110, %109 : vector<8x128xf32>
    %112 = arith.divf %110, %111 : vector<8x128xf32>
    %113 = vector.extract_strided_slice %107 {offsets = [0, 64], sizes = [8, 32], strides = [1, 1]} : vector<8x128xf32> to vector<8x32xf32>
    %114 = math.tanh %113 : vector<8x32xf32>
    %115 = vector.extract_strided_slice %112 {offsets = [0, 0], sizes = [8, 32], strides = [1, 1]} : vector<8x128xf32> to vector<8x32xf32>
    %116 = vector.extract_strided_slice %112 {offsets = [0, 32], sizes = [8, 32], strides = [1, 1]} : vector<8x128xf32> to vector<8x32xf32>
    %117 = vector.extract_strided_slice %112 {offsets = [0, 96], sizes = [8, 32], strides = [1, 1]} : vector<8x128xf32> to vector<8x32xf32>
    %118 = arith.mulf %116, %78 : vector<8x32xf32>
    %119 = arith.mulf %115, %114 : vector<8x32xf32>
    %120 = arith.addf %118, %119 : vector<8x32xf32>
    %121 = math.tanh %120 : vector<8x32xf32>
    %122 = arith.mulf %117, %121 : vector<8x32xf32>
    %c40 = arith.constant 40 : index
    %c0_47 = arith.constant 0 : index
    %123 = vector.load %arg19[%c40, %c0_47] : memref<64x128xf32, #tpu.memory_space<vmem>>, vector<8x128xf32>
    %124 = arith.truncf %99 : vector<8x32xf32> to vector<8x32xbf16>
    %cst_48 = arith.constant dense<0.000000e+00> : vector<8x128xf32>
    %125 = tpu.matmul %124, %15, %cst_48 {dimension_numbers = #tpu.dot_dimension_numbers<[1], [0], [0], [1], [0, 0, 1, 1], [], []>} : vector<8x32xbf16>, vector<32x128xbf16>, vector<8x128xf32> -> vector<8x128xf32>
    %126 = arith.addf %123, %125 : vector<8x128xf32>
    %127 = arith.negf %126 : vector<8x128xf32>
    %128 = math.exp %127 : vector<8x128xf32>
    %cst_49 = arith.constant 1.000000e+00 : f32
    %129 = vector.broadcast %cst_49 : f32 to vector<8x128xf32>
    %130 = arith.addf %129, %128 : vector<8x128xf32>
    %131 = arith.divf %129, %130 : vector<8x128xf32>
    %132 = vector.extract_strided_slice %126 {offsets = [0, 64], sizes = [8, 32], strides = [1, 1]} : vector<8x128xf32> to vector<8x32xf32>
    %133 = math.tanh %132 : vector<8x32xf32>
    %134 = vector.extract_strided_slice %131 {offsets = [0, 0], sizes = [8, 32], strides = [1, 1]} : vector<8x128xf32> to vector<8x32xf32>
    %135 = vector.extract_strided_slice %131 {offsets = [0, 32], sizes = [8, 32], strides = [1, 1]} : vector<8x128xf32> to vector<8x32xf32>
    %136 = vector.extract_strided_slice %131 {offsets = [0, 96], sizes = [8, 32], strides = [1, 1]} : vector<8x128xf32> to vector<8x32xf32>
    %137 = arith.mulf %135, %97 : vector<8x32xf32>
    %138 = arith.mulf %134, %133 : vector<8x32xf32>
    %139 = arith.addf %137, %138 : vector<8x32xf32>
    %140 = math.tanh %139 : vector<8x32xf32>
    %141 = arith.mulf %136, %140 : vector<8x32xf32>
    %142 = arith.truncf %122 : vector<8x32xf32> to vector<8x32xbf16>
    %c16_50 = arith.constant 16 : index
    %c0_51 = arith.constant 0 : index
    %143 = vector.load %arg20[%c16_50, %c0_51] : memref<64x32xbf16, #tpu.memory_space<vmem>>, vector<8x32xbf16>
    tpu.vector_store %arg20[%c16_50, %c0_51], %142 {strides = array<i32>} : memref<64x32xbf16, #tpu.memory_space<vmem>>, vector<8x32xbf16>,
    %144 = arith.truncf %141 : vector<8x32xf32> to vector<8x32xbf16>
    %c40_52 = arith.constant 40 : index
    %c0_53 = arith.constant 0 : index
    %145 = vector.load %arg21[%c40_52, %c0_53] : memref<64x32xbf16, #tpu.memory_space<vmem>>, vector<8x32xbf16>
    tpu.vector_store %arg21[%c40_52, %c0_53], %144 {strides = array<i32>} : memref<64x32xbf16, #tpu.memory_space<vmem>>, vector<8x32xbf16>,
    %c24 = arith.constant 24 : index
    %c0_54 = arith.constant 0 : index
    %146 = vector.load %arg18[%c24, %c0_54] : memref<64x128xf32, #tpu.memory_space<vmem>>, vector<8x128xf32>
    %147 = arith.truncf %122 : vector<8x32xf32> to vector<8x32xbf16>
    %cst_55 = arith.constant dense<0.000000e+00> : vector<8x128xf32>
    %148 = tpu.matmul %147, %14, %cst_55 {dimension_numbers = #tpu.dot_dimension_numbers<[1], [0], [0], [1], [0, 0, 1, 1], [], []>} : vector<8x32xbf16>, vector<32x128xbf16>, vector<8x128xf32> -> vector<8x128xf32>
    %149 = arith.addf %146, %148 : vector<8x128xf32>
    %150 = arith.negf %149 : vector<8x128xf32>
    %151 = math.exp %150 : vector<8x128xf32>
    %cst_56 = arith.constant 1.000000e+00 : f32
    %152 = vector.broadcast %cst_56 : f32 to vector<8x128xf32>
    %153 = arith.addf %152, %151 : vector<8x128xf32>
    %154 = arith.divf %152, %153 : vector<8x128xf32>
    %155 = vector.extract_strided_slice %149 {offsets = [0, 64], sizes = [8, 32], strides = [1, 1]} : vector<8x128xf32> to vector<8x32xf32>
    %156 = math.tanh %155 : vector<8x32xf32>
    %157 = vector.extract_strided_slice %154 {offsets = [0, 0], sizes = [8, 32], strides = [1, 1]} : vector<8x128xf32> to vector<8x32xf32>
    %158 = vector.extract_strided_slice %154 {offsets = [0, 32], sizes = [8, 32], strides = [1, 1]} : vector<8x128xf32> to vector<8x32xf32>
    %159 = vector.extract_strided_slice %154 {offsets = [0, 96], sizes = [8, 32], strides = [1, 1]} : vector<8x128xf32> to vector<8x32xf32>
    %160 = arith.mulf %158, %120 : vector<8x32xf32>
    %161 = arith.mulf %157, %156 : vector<8x32xf32>
    %162 = arith.addf %160, %161 : vector<8x32xf32>
    %163 = math.tanh %162 : vector<8x32xf32>
    %164 = arith.mulf %159, %163 : vector<8x32xf32>
    %c32 = arith.constant 32 : index
    %c0_57 = arith.constant 0 : index
    %165 = vector.load %arg19[%c32, %c0_57] : memref<64x128xf32, #tpu.memory_space<vmem>>, vector<8x128xf32>
    %166 = arith.truncf %141 : vector<8x32xf32> to vector<8x32xbf16>
    %cst_58 = arith.constant dense<0.000000e+00> : vector<8x128xf32>
    %167 = tpu.matmul %166, %15, %cst_58 {dimension_numbers = #tpu.dot_dimension_numbers<[1], [0], [0], [1], [0, 0, 1, 1], [], []>} : vector<8x32xbf16>, vector<32x128xbf16>, vector<8x128xf32> -> vector<8x128xf32>
    %168 = arith.addf %165, %167 : vector<8x128xf32>
    %169 = arith.negf %168 : vector<8x128xf32>
    %170 = math.exp %169 : vector<8x128xf32>
    %cst_59 = arith.constant 1.000000e+00 : f32
    %171 = vector.broadcast %cst_59 : f32 to vector<8x128xf32>
    %172 = arith.addf %171, %170 : vector<8x128xf32>
    %173 = arith.divf %171, %172 : vector<8x128xf32>
    %174 = vector.extract_strided_slice %168 {offsets = [0, 64], sizes = [8, 32], strides = [1, 1]} : vector<8x128xf32> to vector<8x32xf32>
    %175 = math.tanh %174 : vector<8x32xf32>
    %176 = vector.extract_strided_slice %173 {offsets = [0, 0], sizes = [8, 32], strides = [1, 1]} : vector<8x128xf32> to vector<8x32xf32>
    %177 = vector.extract_strided_slice %173 {offsets = [0, 32], sizes = [8, 32], strides = [1, 1]} : vector<8x128xf32> to vector<8x32xf32>
    %178 = vector.extract_strided_slice %173 {offsets = [0, 96], sizes = [8, 32], strides = [1, 1]} : vector<8x128xf32> to vector<8x32xf32>
    %179 = arith.mulf %177, %139 : vector<8x32xf32>
    %180 = arith.mulf %176, %175 : vector<8x32xf32>
    %181 = arith.addf %179, %180 : vector<8x32xf32>
    %182 = math.tanh %181 : vector<8x32xf32>
    %183 = arith.mulf %178, %182 : vector<8x32xf32>
    %184 = arith.truncf %164 : vector<8x32xf32> to vector<8x32xbf16>
    %c24_60 = arith.constant 24 : index
    %c0_61 = arith.constant 0 : index
    %185 = vector.load %arg20[%c24_60, %c0_61] : memref<64x32xbf16, #tpu.memory_space<vmem>>, vector<8x32xbf16>
    tpu.vector_store %arg20[%c24_60, %c0_61], %184 {strides = array<i32>} : memref<64x32xbf16, #tpu.memory_space<vmem>>, vector<8x32xbf16>,
    %186 = arith.truncf %183 : vector<8x32xf32> to vector<8x32xbf16>
    %c32_62 = arith.constant 32 : index
    %c0_63 = arith.constant 0 : index
    %187 = vector.load %arg21[%c32_62, %c0_63] : memref<64x32xbf16, #tpu.memory_space<vmem>>, vector<8x32xbf16>
    tpu.vector_store %arg21[%c32_62, %c0_63], %186 {strides = array<i32>} : memref<64x32xbf16, #tpu.memory_space<vmem>>, vector<8x32xbf16>,
    %c32_64 = arith.constant 32 : index
    %c0_65 = arith.constant 0 : index
    %188 = vector.load %arg18[%c32_64, %c0_65] : memref<64x128xf32, #tpu.memory_space<vmem>>, vector<8x128xf32>
    %189 = arith.truncf %164 : vector<8x32xf32> to vector<8x32xbf16>
    %cst_66 = arith.constant dense<0.000000e+00> : vector<8x128xf32>
    %190 = tpu.matmul %189, %14, %cst_66 {dimension_numbers = #tpu.dot_dimension_numbers<[1], [0], [0], [1], [0, 0, 1, 1], [], []>} : vector<8x32xbf16>, vector<32x128xbf16>, vector<8x128xf32> -> vector<8x128xf32>
    %191 = arith.addf %188, %190 : vector<8x128xf32>
    %192 = arith.negf %191 : vector<8x128xf32>
    %193 = math.exp %192 : vector<8x128xf32>
    %cst_67 = arith.constant 1.000000e+00 : f32
    %194 = vector.broadcast %cst_67 : f32 to vector<8x128xf32>
    %195 = arith.addf %194, %193 : vector<8x128xf32>
    %196 = arith.divf %194, %195 : vector<8x128xf32>
    %197 = vector.extract_strided_slice %191 {offsets = [0, 64], sizes = [8, 32], strides = [1, 1]} : vector<8x128xf32> to vector<8x32xf32>
    %198 = math.tanh %197 : vector<8x32xf32>
    %199 = vector.extract_strided_slice %196 {offsets = [0, 0], sizes = [8, 32], strides = [1, 1]} : vector<8x128xf32> to vector<8x32xf32>
    %200 = vector.extract_strided_slice %196 {offsets = [0, 32], sizes = [8, 32], strides = [1, 1]} : vector<8x128xf32> to vector<8x32xf32>
    %201 = vector.extract_strided_slice %196 {offsets = [0, 96], sizes = [8, 32], strides = [1, 1]} : vector<8x128xf32> to vector<8x32xf32>
    %202 = arith.mulf %200, %162 : vector<8x32xf32>
    %203 = arith.mulf %199, %198 : vector<8x32xf32>
    %204 = arith.addf %202, %203 : vector<8x32xf32>
    %205 = math.tanh %204 : vector<8x32xf32>
    %206 = arith.mulf %201, %205 : vector<8x32xf32>
    %c24_68 = arith.constant 24 : index
    %c0_69 = arith.constant 0 : index
    %207 = vector.load %arg19[%c24_68, %c0_69] : memref<64x128xf32, #tpu.memory_space<vmem>>, vector<8x128xf32>
    %208 = arith.truncf %183 : vector<8x32xf32> to vector<8x32xbf16>
    %cst_70 = arith.constant dense<0.000000e+00> : vector<8x128xf32>
    %209 = tpu.matmul %208, %15, %cst_70 {dimension_numbers = #tpu.dot_dimension_numbers<[1], [0], [0], [1], [0, 0, 1, 1], [], []>} : vector<8x32xbf16>, vector<32x128xbf16>, vector<8x128xf32> -> vector<8x128xf32>
    %210 = arith.addf %207, %209 : vector<8x128xf32>
    %211 = arith.negf %210 : vector<8x128xf32>
    %212 = math.exp %211 : vector<8x128xf32>
    %cst_71 = arith.constant 1.000000e+00 : f32
    %213 = vector.broadcast %cst_71 : f32 to vector<8x128xf32>
    %214 = arith.addf %213, %212 : vector<8x128xf32>
    %215 = arith.divf %213, %214 : vector<8x128xf32>
    %216 = vector.extract_strided_slice %210 {offsets = [0, 64], sizes = [8, 32], strides = [1, 1]} : vector<8x128xf32> to vector<8x32xf32>
    %217 = math.tanh %216 : vector<8x32xf32>
    %218 = vector.extract_strided_slice %215 {offsets = [0, 0], sizes = [8, 32], strides = [1, 1]} : vector<8x128xf32> to vector<8x32xf32>
    %219 = vector.extract_strided_slice %215 {offsets = [0, 32], sizes = [8, 32], strides = [1, 1]} : vector<8x128xf32> to vector<8x32xf32>
    %220 = vector.extract_strided_slice %215 {offsets = [0, 96], sizes = [8, 32], strides = [1, 1]} : vector<8x128xf32> to vector<8x32xf32>
    %221 = arith.mulf %219, %181 : vector<8x32xf32>
    %222 = arith.mulf %218, %217 : vector<8x32xf32>
    %223 = arith.addf %221, %222 : vector<8x32xf32>
    %224 = math.tanh %223 : vector<8x32xf32>
    %225 = arith.mulf %220, %224 : vector<8x32xf32>
    %226 = arith.truncf %206 : vector<8x32xf32> to vector<8x32xbf16>
    %c32_72 = arith.constant 32 : index
    %c0_73 = arith.constant 0 : index
    %227 = vector.load %arg20[%c32_72, %c0_73] : memref<64x32xbf16, #tpu.memory_space<vmem>>, vector<8x32xbf16>
    tpu.vector_store %arg20[%c32_72, %c0_73], %226 {strides = array<i32>} : memref<64x32xbf16, #tpu.memory_space<vmem>>, vector<8x32xbf16>,
    %228 = arith.truncf %225 : vector<8x32xf32> to vector<8x32xbf16>
    %c24_74 = arith.constant 24 : index
    %c0_75 = arith.constant 0 : index
    %229 = vector.load %arg21[%c24_74, %c0_75] : memref<64x32xbf16, #tpu.memory_space<vmem>>, vector<8x32xbf16>
    tpu.vector_store %arg21[%c24_74, %c0_75], %228 {strides = array<i32>} : memref<64x32xbf16, #tpu.memory_space<vmem>>, vector<8x32xbf16>,
    %c40_76 = arith.constant 40 : index
    %c0_77 = arith.constant 0 : index
    %230 = vector.load %arg18[%c40_76, %c0_77] : memref<64x128xf32, #tpu.memory_space<vmem>>, vector<8x128xf32>
    %231 = arith.truncf %206 : vector<8x32xf32> to vector<8x32xbf16>
    %cst_78 = arith.constant dense<0.000000e+00> : vector<8x128xf32>
    %232 = tpu.matmul %231, %14, %cst_78 {dimension_numbers = #tpu.dot_dimension_numbers<[1], [0], [0], [1], [0, 0, 1, 1], [], []>} : vector<8x32xbf16>, vector<32x128xbf16>, vector<8x128xf32> -> vector<8x128xf32>
    %233 = arith.addf %230, %232 : vector<8x128xf32>
    %234 = arith.negf %233 : vector<8x128xf32>
    %235 = math.exp %234 : vector<8x128xf32>
    %cst_79 = arith.constant 1.000000e+00 : f32
    %236 = vector.broadcast %cst_79 : f32 to vector<8x128xf32>
    %237 = arith.addf %236, %235 : vector<8x128xf32>
    %238 = arith.divf %236, %237 : vector<8x128xf32>
    %239 = vector.extract_strided_slice %233 {offsets = [0, 64], sizes = [8, 32], strides = [1, 1]} : vector<8x128xf32> to vector<8x32xf32>
    %240 = math.tanh %239 : vector<8x32xf32>
    %241 = vector.extract_strided_slice %238 {offsets = [0, 0], sizes = [8, 32], strides = [1, 1]} : vector<8x128xf32> to vector<8x32xf32>
    %242 = vector.extract_strided_slice %238 {offsets = [0, 32], sizes = [8, 32], strides = [1, 1]} : vector<8x128xf32> to vector<8x32xf32>
    %243 = vector.extract_strided_slice %238 {offsets = [0, 96], sizes = [8, 32], strides = [1, 1]} : vector<8x128xf32> to vector<8x32xf32>
    %244 = arith.mulf %242, %204 : vector<8x32xf32>
    %245 = arith.mulf %241, %240 : vector<8x32xf32>
    %246 = arith.addf %244, %245 : vector<8x32xf32>
    %247 = math.tanh %246 : vector<8x32xf32>
    %248 = arith.mulf %243, %247 : vector<8x32xf32>
    %c16_80 = arith.constant 16 : index
    %c0_81 = arith.constant 0 : index
    %249 = vector.load %arg19[%c16_80, %c0_81] : memref<64x128xf32, #tpu.memory_space<vmem>>, vector<8x128xf32>
    %250 = arith.truncf %225 : vector<8x32xf32> to vector<8x32xbf16>
    %cst_82 = arith.constant dense<0.000000e+00> : vector<8x128xf32>
    %251 = tpu.matmul %250, %15, %cst_82 {dimension_numbers = #tpu.dot_dimension_numbers<[1], [0], [0], [1], [0, 0, 1, 1], [], []>} : vector<8x32xbf16>, vector<32x128xbf16>, vector<8x128xf32> -> vector<8x128xf32>
    %252 = arith.addf %249, %251 : vector<8x128xf32>
    %253 = arith.negf %252 : vector<8x128xf32>
    %254 = math.exp %253 : vector<8x128xf32>
    %cst_83 = arith.constant 1.000000e+00 : f32
    %255 = vector.broadcast %cst_83 : f32 to vector<8x128xf32>
    %256 = arith.addf %255, %254 : vector<8x128xf32>
    %257 = arith.divf %255, %256 : vector<8x128xf32>
    %258 = vector.extract_strided_slice %252 {offsets = [0, 64], sizes = [8, 32], strides = [1, 1]} : vector<8x128xf32> to vector<8x32xf32>
    %259 = math.tanh %258 : vector<8x32xf32>
    %260 = vector.extract_strided_slice %257 {offsets = [0, 0], sizes = [8, 32], strides = [1, 1]} : vector<8x128xf32> to vector<8x32xf32>
    %261 = vector.extract_strided_slice %257 {offsets = [0, 32], sizes = [8, 32], strides = [1, 1]} : vector<8x128xf32> to vector<8x32xf32>
    %262 = vector.extract_strided_slice %257 {offsets = [0, 96], sizes = [8, 32], strides = [1, 1]} : vector<8x128xf32> to vector<8x32xf32>
    %263 = arith.mulf %261, %223 : vector<8x32xf32>
    %264 = arith.mulf %260, %259 : vector<8x32xf32>
    %265 = arith.addf %263, %264 : vector<8x32xf32>
    %266 = math.tanh %265 : vector<8x32xf32>
    %267 = arith.mulf %262, %266 : vector<8x32xf32>
    %268 = arith.truncf %248 : vector<8x32xf32> to vector<8x32xbf16>
    %c40_84 = arith.constant 40 : index
    %c0_85 = arith.constant 0 : index
    %269 = vector.load %arg20[%c40_84, %c0_85] : memref<64x32xbf16, #tpu.memory_space<vmem>>, vector<8x32xbf16>
    tpu.vector_store %arg20[%c40_84, %c0_85], %268 {strides = array<i32>} : memref<64x32xbf16, #tpu.memory_space<vmem>>, vector<8x32xbf16>,
    %270 = arith.truncf %267 : vector<8x32xf32> to vector<8x32xbf16>
    %c16_86 = arith.constant 16 : index
    %c0_87 = arith.constant 0 : index
    %271 = vector.load %arg21[%c16_86, %c0_87] : memref<64x32xbf16, #tpu.memory_space<vmem>>, vector<8x32xbf16>
    tpu.vector_store %arg21[%c16_86, %c0_87], %270 {strides = array<i32>} : memref<64x32xbf16, #tpu.memory_space<vmem>>, vector<8x32xbf16>,
    %c48_88 = arith.constant 48 : index
    %c0_89 = arith.constant 0 : index
    %272 = vector.load %arg18[%c48_88, %c0_89] : memref<64x128xf32, #tpu.memory_space<vmem>>, vector<8x128xf32>
    %273 = arith.truncf %248 : vector<8x32xf32> to vector<8x32xbf16>
    %cst_90 = arith.constant dense<0.000000e+00> : vector<8x128xf32>
    %274 = tpu.matmul %273, %14, %cst_90 {dimension_numbers = #tpu.dot_dimension_numbers<[1], [0], [0], [1], [0, 0, 1, 1], [], []>} : vector<8x32xbf16>, vector<32x128xbf16>, vector<8x128xf32> -> vector<8x128xf32>
    %275 = arith.addf %272, %274 : vector<8x128xf32>
    %276 = arith.negf %275 : vector<8x128xf32>
    %277 = math.exp %276 : vector<8x128xf32>
    %cst_91 = arith.constant 1.000000e+00 : f32
    %278 = vector.broadcast %cst_91 : f32 to vector<8x128xf32>
    %279 = arith.addf %278, %277 : vector<8x128xf32>
    %280 = arith.divf %278, %279 : vector<8x128xf32>
    %281 = vector.extract_strided_slice %275 {offsets = [0, 64], sizes = [8, 32], strides = [1, 1]} : vector<8x128xf32> to vector<8x32xf32>
    %282 = math.tanh %281 : vector<8x32xf32>
    %283 = vector.extract_strided_slice %280 {offsets = [0, 0], sizes = [8, 32], strides = [1, 1]} : vector<8x128xf32> to vector<8x32xf32>
    %284 = vector.extract_strided_slice %280 {offsets = [0, 32], sizes = [8, 32], strides = [1, 1]} : vector<8x128xf32> to vector<8x32xf32>
    %285 = vector.extract_strided_slice %280 {offsets = [0, 96], sizes = [8, 32], strides = [1, 1]} : vector<8x128xf32> to vector<8x32xf32>
    %286 = arith.mulf %284, %246 : vector<8x32xf32>
    %287 = arith.mulf %283, %282 : vector<8x32xf32>
    %288 = arith.addf %286, %287 : vector<8x32xf32>
    %289 = math.tanh %288 : vector<8x32xf32>
    %290 = arith.mulf %285, %289 : vector<8x32xf32>
    %c8_92 = arith.constant 8 : index
    %c0_93 = arith.constant 0 : index
    %291 = vector.load %arg19[%c8_92, %c0_93] : memref<64x128xf32, #tpu.memory_space<vmem>>, vector<8x128xf32>
    %292 = arith.truncf %267 : vector<8x32xf32> to vector<8x32xbf16>
    %cst_94 = arith.constant dense<0.000000e+00> : vector<8x128xf32>
    %293 = tpu.matmul %292, %15, %cst_94 {dimension_numbers = #tpu.dot_dimension_numbers<[1], [0], [0], [1], [0, 0, 1, 1], [], []>} : vector<8x32xbf16>, vector<32x128xbf16>, vector<8x128xf32> -> vector<8x128xf32>
    %294 = arith.addf %291, %293 : vector<8x128xf32>
    %295 = arith.negf %294 : vector<8x128xf32>
    %296 = math.exp %295 : vector<8x128xf32>
    %cst_95 = arith.constant 1.000000e+00 : f32
    %297 = vector.broadcast %cst_95 : f32 to vector<8x128xf32>
    %298 = arith.addf %297, %296 : vector<8x128xf32>
    %299 = arith.divf %297, %298 : vector<8x128xf32>
    %300 = vector.extract_strided_slice %294 {offsets = [0, 64], sizes = [8, 32], strides = [1, 1]} : vector<8x128xf32> to vector<8x32xf32>
    %301 = math.tanh %300 : vector<8x32xf32>
    %302 = vector.extract_strided_slice %299 {offsets = [0, 0], sizes = [8, 32], strides = [1, 1]} : vector<8x128xf32> to vector<8x32xf32>
    %303 = vector.extract_strided_slice %299 {offsets = [0, 32], sizes = [8, 32], strides = [1, 1]} : vector<8x128xf32> to vector<8x32xf32>
    %304 = vector.extract_strided_slice %299 {offsets = [0, 96], sizes = [8, 32], strides = [1, 1]} : vector<8x128xf32> to vector<8x32xf32>
    %305 = arith.mulf %303, %265 : vector<8x32xf32>
    %306 = arith.mulf %302, %301 : vector<8x32xf32>
    %307 = arith.addf %305, %306 : vector<8x32xf32>
    %308 = math.tanh %307 : vector<8x32xf32>
    %309 = arith.mulf %304, %308 : vector<8x32xf32>
    %310 = arith.truncf %290 : vector<8x32xf32> to vector<8x32xbf16>
    %c48_96 = arith.constant 48 : index
    %c0_97 = arith.constant 0 : index
    %311 = vector.load %arg20[%c48_96, %c0_97] : memref<64x32xbf16, #tpu.memory_space<vmem>>, vector<8x32xbf16>
    tpu.vector_store %arg20[%c48_96, %c0_97], %310 {strides = array<i32>} : memref<64x32xbf16, #tpu.memory_space<vmem>>, vector<8x32xbf16>,
    %312 = arith.truncf %309 : vector<8x32xf32> to vector<8x32xbf16>
    %c8_98 = arith.constant 8 : index
    %c0_99 = arith.constant 0 : index
    %313 = vector.load %arg21[%c8_98, %c0_99] : memref<64x32xbf16, #tpu.memory_space<vmem>>, vector<8x32xbf16>
    tpu.vector_store %arg21[%c8_98, %c0_99], %312 {strides = array<i32>} : memref<64x32xbf16, #tpu.memory_space<vmem>>, vector<8x32xbf16>,
    %c56_100 = arith.constant 56 : index
    %c0_101 = arith.constant 0 : index
    %314 = vector.load %arg18[%c56_100, %c0_101] : memref<64x128xf32, #tpu.memory_space<vmem>>, vector<8x128xf32>
    %315 = arith.truncf %290 : vector<8x32xf32> to vector<8x32xbf16>
    %cst_102 = arith.constant dense<0.000000e+00> : vector<8x128xf32>
    %316 = tpu.matmul %315, %14, %cst_102 {dimension_numbers = #tpu.dot_dimension_numbers<[1], [0], [0], [1], [0, 0, 1, 1], [], []>} : vector<8x32xbf16>, vector<32x128xbf16>, vector<8x128xf32> -> vector<8x128xf32>
    %317 = arith.addf %314, %316 : vector<8x128xf32>
    %318 = arith.negf %317 : vector<8x128xf32>
    %319 = math.exp %318 : vector<8x128xf32>
    %cst_103 = arith.constant 1.000000e+00 : f32
    %320 = vector.broadcast %cst_103 : f32 to vector<8x128xf32>
    %321 = arith.addf %320, %319 : vector<8x128xf32>
    %322 = arith.divf %320, %321 : vector<8x128xf32>
    %323 = vector.extract_strided_slice %317 {offsets = [0, 64], sizes = [8, 32], strides = [1, 1]} : vector<8x128xf32> to vector<8x32xf32>
    %324 = math.tanh %323 : vector<8x32xf32>
    %325 = vector.extract_strided_slice %322 {offsets = [0, 0], sizes = [8, 32], strides = [1, 1]} : vector<8x128xf32> to vector<8x32xf32>
    %326 = vector.extract_strided_slice %322 {offsets = [0, 32], sizes = [8, 32], strides = [1, 1]} : vector<8x128xf32> to vector<8x32xf32>
    %327 = vector.extract_strided_slice %322 {offsets = [0, 96], sizes = [8, 32], strides = [1, 1]} : vector<8x128xf32> to vector<8x32xf32>
    %328 = arith.mulf %326, %288 : vector<8x32xf32>
    %329 = arith.mulf %325, %324 : vector<8x32xf32>
    %330 = arith.addf %328, %329 : vector<8x32xf32>
    %331 = math.tanh %330 : vector<8x32xf32>
    %332 = arith.mulf %327, %331 : vector<8x32xf32>
    %c0_104 = arith.constant 0 : index
    %c0_105 = arith.constant 0 : index
    %333 = vector.load %arg19[%c0_104, %c0_105] : memref<64x128xf32, #tpu.memory_space<vmem>>, vector<8x128xf32>
    %334 = arith.truncf %309 : vector<8x32xf32> to vector<8x32xbf16>
    %cst_106 = arith.constant dense<0.000000e+00> : vector<8x128xf32>
    %335 = tpu.matmul %334, %15, %cst_106 {dimension_numbers = #tpu.dot_dimension_numbers<[1], [0], [0], [1], [0, 0, 1, 1], [], []>} : vector<8x32xbf16>, vector<32x128xbf16>, vector<8x128xf32> -> vector<8x128xf32>
    %336 = arith.addf %333, %335 : vector<8x128xf32>
    %337 = arith.negf %336 : vector<8x128xf32>
    %338 = math.exp %337 : vector<8x128xf32>
    %cst_107 = arith.constant 1.000000e+00 : f32
    %339 = vector.broadcast %cst_107 : f32 to vector<8x128xf32>
    %340 = arith.addf %339, %338 : vector<8x128xf32>
    %341 = arith.divf %339, %340 : vector<8x128xf32>
    %342 = vector.extract_strided_slice %336 {offsets = [0, 64], sizes = [8, 32], strides = [1, 1]} : vector<8x128xf32> to vector<8x32xf32>
    %343 = math.tanh %342 : vector<8x32xf32>
    %344 = vector.extract_strided_slice %341 {offsets = [0, 0], sizes = [8, 32], strides = [1, 1]} : vector<8x128xf32> to vector<8x32xf32>
    %345 = vector.extract_strided_slice %341 {offsets = [0, 32], sizes = [8, 32], strides = [1, 1]} : vector<8x128xf32> to vector<8x32xf32>
    %346 = vector.extract_strided_slice %341 {offsets = [0, 96], sizes = [8, 32], strides = [1, 1]} : vector<8x128xf32> to vector<8x32xf32>
    %347 = arith.mulf %345, %307 : vector<8x32xf32>
    %348 = arith.mulf %344, %343 : vector<8x32xf32>
    %349 = arith.addf %347, %348 : vector<8x32xf32>
    %350 = math.tanh %349 : vector<8x32xf32>
    %351 = arith.mulf %346, %350 : vector<8x32xf32>
    %352 = arith.truncf %332 : vector<8x32xf32> to vector<8x32xbf16>
    %c56_108 = arith.constant 56 : index
    %c0_109 = arith.constant 0 : index
    %353 = vector.load %arg20[%c56_108, %c0_109] : memref<64x32xbf16, #tpu.memory_space<vmem>>, vector<8x32xbf16>
    tpu.vector_store %arg20[%c56_108, %c0_109], %352 {strides = array<i32>} : memref<64x32xbf16, #tpu.memory_space<vmem>>, vector<8x32xbf16>,
    %354 = arith.truncf %351 : vector<8x32xf32> to vector<8x32xbf16>
    %c0_110 = arith.constant 0 : index
    %c0_111 = arith.constant 0 : index
    %355 = vector.load %arg21[%c0_110, %c0_111] : memref<64x32xbf16, #tpu.memory_space<vmem>>, vector<8x32xbf16>
    tpu.vector_store %arg21[%c0_110, %c0_111], %354 {strides = array<i32>} : memref<64x32xbf16, #tpu.memory_space<vmem>>, vector<8x32xbf16>,
    %c0_112 = arith.constant 0 : index
    %c0_113 = arith.constant 0 : index
    %356 = vector.load %arg20[%c0_112, %c0_113] : memref<64x32xbf16, #tpu.memory_space<vmem>>, vector<64x32xbf16>
    %c0_114 = arith.constant 0 : index
    %c0_115 = arith.constant 0 : index
    %357 = vector.load %arg21[%c0_114, %c0_115] : memref<64x32xbf16, #tpu.memory_space<vmem>>, vector<64x32xbf16>
    %c0_116 = arith.constant 0 : index
    %c0_117 = arith.constant 0 : index
    %358 = vector.load %arg8[%c0_116, %c0_117] : memref<64x128xbf16, #tpu.memory_space<vmem>>, vector<64x128xbf16>
    %c0_118 = arith.constant 0 : index
    %c0_119 = arith.constant 0 : index
    %359 = vector.load %arg11[%c0_118, %c0_119] : memref<64x128xbf16, #tpu.memory_space<vmem>>, vector<64x128xbf16>
    %360 = vector.extract_strided_slice %358 {offsets = [0, 0], sizes = [32, 128], strides = [1, 1]} : vector<64x128xbf16> to vector<32x128xbf16>
    %cst_120 = arith.constant dense<0.000000e+00> : vector<64x128xf32>
    %361 = tpu.matmul %356, %360, %cst_120 {dimension_numbers = #tpu.dot_dimension_numbers<[1], [0], [0], [1], [0, 0, 1, 1], [], []>} : vector<64x32xbf16>, vector<32x128xbf16>, vector<64x128xf32> -> vector<64x128xf32>
    %362 = vector.extract_strided_slice %358 {offsets = [32, 0], sizes = [32, 128], strides = [1, 1]} : vector<64x128xbf16> to vector<32x128xbf16>
    %cst_121 = arith.constant dense<0.000000e+00> : vector<64x128xf32>
    %363 = tpu.matmul %357, %362, %cst_121 {dimension_numbers = #tpu.dot_dimension_numbers<[1], [0], [0], [1], [0, 0, 1, 1], [], []>} : vector<64x32xbf16>, vector<32x128xbf16>, vector<64x128xf32> -> vector<64x128xf32>
    %364 = arith.addf %361, %363 : vector<64x128xf32>
    %c0_122 = arith.constant 0 : index
    %c0_123 = arith.constant 0 : index
    %365 = vector.load %arg10[%c0_122, %c0_123] : memref<1x128xf32, #tpu.memory_space<vmem>>, vector<1x128xf32>
    %366 = vector.broadcast %365 : vector<1x128xf32> to vector<64x128xf32>
    %367 = arith.addf %364, %366 : vector<64x128xf32>
    %368 = vector.extract_strided_slice %359 {offsets = [0, 0], sizes = [32, 128], strides = [1, 1]} : vector<64x128xbf16> to vector<32x128xbf16>
    %cst_124 = arith.constant dense<0.000000e+00> : vector<64x128xf32>
    %369 = tpu.matmul %356, %368, %cst_124 {dimension_numbers = #tpu.dot_dimension_numbers<[1], [0], [0], [1], [0, 0, 1, 1], [], []>} : vector<64x32xbf16>, vector<32x128xbf16>, vector<64x128xf32> -> vector<64x128xf32>
    %370 = vector.extract_strided_slice %359 {offsets = [32, 0], sizes = [32, 128], strides = [1, 1]} : vector<64x128xbf16> to vector<32x128xbf16>
    %cst_125 = arith.constant dense<0.000000e+00> : vector<64x128xf32>
    %371 = tpu.matmul %357, %370, %cst_125 {dimension_numbers = #tpu.dot_dimension_numbers<[1], [0], [0], [1], [0, 0, 1, 1], [], []>} : vector<64x32xbf16>, vector<32x128xbf16>, vector<64x128xf32> -> vector<64x128xf32>
    %372 = arith.addf %369, %371 : vector<64x128xf32>
    %c0_126 = arith.constant 0 : index
    %c0_127 = arith.constant 0 : index
    %373 = vector.load %arg13[%c0_126, %c0_127] : memref<1x128xf32, #tpu.memory_space<vmem>>, vector<1x128xf32>
    %374 = vector.broadcast %373 : vector<1x128xf32> to vector<64x128xf32>
    %375 = arith.addf %372, %374 : vector<64x128xf32>
    %c0_128 = arith.constant 0 : index
    %c0_129 = arith.constant 0 : index
    %376 = vector.load %arg18[%c0_128, %c0_129] : memref<64x128xf32, #tpu.memory_space<vmem>>, vector<64x128xf32>
    tpu.vector_store %arg18[%c0_128, %c0_129], %367 {strides = array<i32>} : memref<64x128xf32, #tpu.memory_space<vmem>>, vector<64x128xf32>,
    %c0_130 = arith.constant 0 : index
    %c0_131 = arith.constant 0 : index
    %377 = vector.load %arg19[%c0_130, %c0_131] : memref<64x128xf32, #tpu.memory_space<vmem>>, vector<64x128xf32>
    tpu.vector_store %arg19[%c0_130, %c0_131], %375 {strides = array<i32>} : memref<64x128xf32, #tpu.memory_space<vmem>>, vector<64x128xf32>,
    %c0_132 = arith.constant 0 : index
    %c0_133 = arith.constant 0 : index
    %378 = vector.load %arg9[%c0_132, %c0_133] : memref<32x128xbf16, #tpu.memory_space<vmem>>, vector<32x128xbf16>
    %c0_134 = arith.constant 0 : index
    %c0_135 = arith.constant 0 : index
    %379 = vector.load %arg12[%c0_134, %c0_135] : memref<32x128xbf16, #tpu.memory_space<vmem>>, vector<32x128xbf16>
    %cst_136 = arith.constant 0.000000e+00 : f32
    %380 = vector.broadcast %cst_136 : f32 to vector<8x32xf32>
    %cst_137 = arith.constant 0.000000e+00 : f32
    %381 = vector.broadcast %cst_137 : f32 to vector<8x32xf32>
    %cst_138 = arith.constant 0.000000e+00 : f32
    %382 = vector.broadcast %cst_138 : f32 to vector<8x32xf32>
    %cst_139 = arith.constant 0.000000e+00 : f32
    %383 = vector.broadcast %cst_139 : f32 to vector<8x32xf32>
    %c0_140 = arith.constant 0 : index
    %c0_141 = arith.constant 0 : index
    %384 = vector.load %arg18[%c0_140, %c0_141] : memref<64x128xf32, #tpu.memory_space<vmem>>, vector<8x128xf32>
    %385 = arith.truncf %380 : vector<8x32xf32> to vector<8x32xbf16>
    %cst_142 = arith.constant dense<0.000000e+00> : vector<8x128xf32>
    %386 = tpu.matmul %385, %378, %cst_142 {dimension_numbers = #tpu.dot_dimension_numbers<[1], [0], [0], [1], [0, 0, 1, 1], [], []>} : vector<8x32xbf16>, vector<32x128xbf16>, vector<8x128xf32> -> vector<8x128xf32>
    %387 = arith.addf %384, %386 : vector<8x128xf32>
    %388 = arith.negf %387 : vector<8x128xf32>
    %389 = math.exp %388 : vector<8x128xf32>
    %cst_143 = arith.constant 1.000000e+00 : f32
    %390 = vector.broadcast %cst_143 : f32 to vector<8x128xf32>
    %391 = arith.addf %390, %389 : vector<8x128xf32>
    %392 = arith.divf %390, %391 : vector<8x128xf32>
    %393 = vector.extract_strided_slice %387 {offsets = [0, 64], sizes = [8, 32], strides = [1, 1]} : vector<8x128xf32> to vector<8x32xf32>
    %394 = math.tanh %393 : vector<8x32xf32>
    %395 = vector.extract_strided_slice %392 {offsets = [0, 0], sizes = [8, 32], strides = [1, 1]} : vector<8x128xf32> to vector<8x32xf32>
    %396 = vector.extract_strided_slice %392 {offsets = [0, 32], sizes = [8, 32], strides = [1, 1]} : vector<8x128xf32> to vector<8x32xf32>
    %397 = vector.extract_strided_slice %392 {offsets = [0, 96], sizes = [8, 32], strides = [1, 1]} : vector<8x128xf32> to vector<8x32xf32>
    %398 = arith.mulf %396, %381 : vector<8x32xf32>
    %399 = arith.mulf %395, %394 : vector<8x32xf32>
    %400 = arith.addf %398, %399 : vector<8x32xf32>
    %401 = math.tanh %400 : vector<8x32xf32>
    %402 = arith.mulf %397, %401 : vector<8x32xf32>
    %c56_144 = arith.constant 56 : index
    %c0_145 = arith.constant 0 : index
    %403 = vector.load %arg19[%c56_144, %c0_145] : memref<64x128xf32, #tpu.memory_space<vmem>>, vector<8x128xf32>
    %404 = arith.truncf %382 : vector<8x32xf32> to vector<8x32xbf16>
    %cst_146 = arith.constant dense<0.000000e+00> : vector<8x128xf32>
    %405 = tpu.matmul %404, %379, %cst_146 {dimension_numbers = #tpu.dot_dimension_numbers<[1], [0], [0], [1], [0, 0, 1, 1], [], []>} : vector<8x32xbf16>, vector<32x128xbf16>, vector<8x128xf32> -> vector<8x128xf32>
    %406 = arith.addf %403, %405 : vector<8x128xf32>
    %407 = arith.negf %406 : vector<8x128xf32>
    %408 = math.exp %407 : vector<8x128xf32>
    %cst_147 = arith.constant 1.000000e+00 : f32
    %409 = vector.broadcast %cst_147 : f32 to vector<8x128xf32>
    %410 = arith.addf %409, %408 : vector<8x128xf32>
    %411 = arith.divf %409, %410 : vector<8x128xf32>
    %412 = vector.extract_strided_slice %406 {offsets = [0, 64], sizes = [8, 32], strides = [1, 1]} : vector<8x128xf32> to vector<8x32xf32>
    %413 = math.tanh %412 : vector<8x32xf32>
    %414 = vector.extract_strided_slice %411 {offsets = [0, 0], sizes = [8, 32], strides = [1, 1]} : vector<8x128xf32> to vector<8x32xf32>
    %415 = vector.extract_strided_slice %411 {offsets = [0, 32], sizes = [8, 32], strides = [1, 1]} : vector<8x128xf32> to vector<8x32xf32>
    %416 = vector.extract_strided_slice %411 {offsets = [0, 96], sizes = [8, 32], strides = [1, 1]} : vector<8x128xf32> to vector<8x32xf32>
    %417 = arith.mulf %415, %383 : vector<8x32xf32>
    %418 = arith.mulf %414, %413 : vector<8x32xf32>
    %419 = arith.addf %417, %418 : vector<8x32xf32>
    %420 = math.tanh %419 : vector<8x32xf32>
    %421 = arith.mulf %416, %420 : vector<8x32xf32>
    %c8_148 = arith.constant 8 : index
    %c0_149 = arith.constant 0 : index
    %422 = vector.load %arg18[%c8_148, %c0_149] : memref<64x128xf32, #tpu.memory_space<vmem>>, vector<8x128xf32>
    %423 = arith.truncf %402 : vector<8x32xf32> to vector<8x32xbf16>
    %cst_150 = arith.constant dense<0.000000e+00> : vector<8x128xf32>
    %424 = tpu.matmul %423, %378, %cst_150 {dimension_numbers = #tpu.dot_dimension_numbers<[1], [0], [0], [1], [0, 0, 1, 1], [], []>} : vector<8x32xbf16>, vector<32x128xbf16>, vector<8x128xf32> -> vector<8x128xf32>
    %425 = arith.addf %422, %424 : vector<8x128xf32>
    %426 = arith.negf %425 : vector<8x128xf32>
    %427 = math.exp %426 : vector<8x128xf32>
    %cst_151 = arith.constant 1.000000e+00 : f32
    %428 = vector.broadcast %cst_151 : f32 to vector<8x128xf32>
    %429 = arith.addf %428, %427 : vector<8x128xf32>
    %430 = arith.divf %428, %429 : vector<8x128xf32>
    %431 = vector.extract_strided_slice %425 {offsets = [0, 64], sizes = [8, 32], strides = [1, 1]} : vector<8x128xf32> to vector<8x32xf32>
    %432 = math.tanh %431 : vector<8x32xf32>
    %433 = vector.extract_strided_slice %430 {offsets = [0, 0], sizes = [8, 32], strides = [1, 1]} : vector<8x128xf32> to vector<8x32xf32>
    %434 = vector.extract_strided_slice %430 {offsets = [0, 32], sizes = [8, 32], strides = [1, 1]} : vector<8x128xf32> to vector<8x32xf32>
    %435 = vector.extract_strided_slice %430 {offsets = [0, 96], sizes = [8, 32], strides = [1, 1]} : vector<8x128xf32> to vector<8x32xf32>
    %436 = arith.mulf %434, %400 : vector<8x32xf32>
    %437 = arith.mulf %433, %432 : vector<8x32xf32>
    %438 = arith.addf %436, %437 : vector<8x32xf32>
    %439 = math.tanh %438 : vector<8x32xf32>
    %440 = arith.mulf %435, %439 : vector<8x32xf32>
    %c48_152 = arith.constant 48 : index
    %c0_153 = arith.constant 0 : index
    %441 = vector.load %arg19[%c48_152, %c0_153] : memref<64x128xf32, #tpu.memory_space<vmem>>, vector<8x128xf32>
    %442 = arith.truncf %421 : vector<8x32xf32> to vector<8x32xbf16>
    %cst_154 = arith.constant dense<0.000000e+00> : vector<8x128xf32>
    %443 = tpu.matmul %442, %379, %cst_154 {dimension_numbers = #tpu.dot_dimension_numbers<[1], [0], [0], [1], [0, 0, 1, 1], [], []>} : vector<8x32xbf16>, vector<32x128xbf16>, vector<8x128xf32> -> vector<8x128xf32>
    %444 = arith.addf %441, %443 : vector<8x128xf32>
    %445 = arith.negf %444 : vector<8x128xf32>
    %446 = math.exp %445 : vector<8x128xf32>
    %cst_155 = arith.constant 1.000000e+00 : f32
    %447 = vector.broadcast %cst_155 : f32 to vector<8x128xf32>
    %448 = arith.addf %447, %446 : vector<8x128xf32>
    %449 = arith.divf %447, %448 : vector<8x128xf32>
    %450 = vector.extract_strided_slice %444 {offsets = [0, 64], sizes = [8, 32], strides = [1, 1]} : vector<8x128xf32> to vector<8x32xf32>
    %451 = math.tanh %450 : vector<8x32xf32>
    %452 = vector.extract_strided_slice %449 {offsets = [0, 0], sizes = [8, 32], strides = [1, 1]} : vector<8x128xf32> to vector<8x32xf32>
    %453 = vector.extract_strided_slice %449 {offsets = [0, 32], sizes = [8, 32], strides = [1, 1]} : vector<8x128xf32> to vector<8x32xf32>
    %454 = vector.extract_strided_slice %449 {offsets = [0, 96], sizes = [8, 32], strides = [1, 1]} : vector<8x128xf32> to vector<8x32xf32>
    %455 = arith.mulf %453, %419 : vector<8x32xf32>
    %456 = arith.mulf %452, %451 : vector<8x32xf32>
    %457 = arith.addf %455, %456 : vector<8x32xf32>
    %458 = math.tanh %457 : vector<8x32xf32>
    %459 = arith.mulf %454, %458 : vector<8x32xf32>
    %c16_156 = arith.constant 16 : index
    %c0_157 = arith.constant 0 : index
    %460 = vector.load %arg18[%c16_156, %c0_157] : memref<64x128xf32, #tpu.memory_space<vmem>>, vector<8x128xf32>
    %461 = arith.truncf %440 : vector<8x32xf32> to vector<8x32xbf16>
    %cst_158 = arith.constant dense<0.000000e+00> : vector<8x128xf32>
    %462 = tpu.matmul %461, %378, %cst_158 {dimension_numbers = #tpu.dot_dimension_numbers<[1], [0], [0], [1], [0, 0, 1, 1], [], []>} : vector<8x32xbf16>, vector<32x128xbf16>, vector<8x128xf32> -> vector<8x128xf32>
    %463 = arith.addf %460, %462 : vector<8x128xf32>
    %464 = arith.negf %463 : vector<8x128xf32>
    %465 = math.exp %464 : vector<8x128xf32>
    %cst_159 = arith.constant 1.000000e+00 : f32
    %466 = vector.broadcast %cst_159 : f32 to vector<8x128xf32>
    %467 = arith.addf %466, %465 : vector<8x128xf32>
    %468 = arith.divf %466, %467 : vector<8x128xf32>
    %469 = vector.extract_strided_slice %463 {offsets = [0, 64], sizes = [8, 32], strides = [1, 1]} : vector<8x128xf32> to vector<8x32xf32>
    %470 = math.tanh %469 : vector<8x32xf32>
    %471 = vector.extract_strided_slice %468 {offsets = [0, 0], sizes = [8, 32], strides = [1, 1]} : vector<8x128xf32> to vector<8x32xf32>
    %472 = vector.extract_strided_slice %468 {offsets = [0, 32], sizes = [8, 32], strides = [1, 1]} : vector<8x128xf32> to vector<8x32xf32>
    %473 = vector.extract_strided_slice %468 {offsets = [0, 96], sizes = [8, 32], strides = [1, 1]} : vector<8x128xf32> to vector<8x32xf32>
    %474 = arith.mulf %472, %438 : vector<8x32xf32>
    %475 = arith.mulf %471, %470 : vector<8x32xf32>
    %476 = arith.addf %474, %475 : vector<8x32xf32>
    %477 = math.tanh %476 : vector<8x32xf32>
    %478 = arith.mulf %473, %477 : vector<8x32xf32>
    %c40_160 = arith.constant 40 : index
    %c0_161 = arith.constant 0 : index
    %479 = vector.load %arg19[%c40_160, %c0_161] : memref<64x128xf32, #tpu.memory_space<vmem>>, vector<8x128xf32>
    %480 = arith.truncf %459 : vector<8x32xf32> to vector<8x32xbf16>
    %cst_162 = arith.constant dense<0.000000e+00> : vector<8x128xf32>
    %481 = tpu.matmul %480, %379, %cst_162 {dimension_numbers = #tpu.dot_dimension_numbers<[1], [0], [0], [1], [0, 0, 1, 1], [], []>} : vector<8x32xbf16>, vector<32x128xbf16>, vector<8x128xf32> -> vector<8x128xf32>
    %482 = arith.addf %479, %481 : vector<8x128xf32>
    %483 = arith.negf %482 : vector<8x128xf32>
    %484 = math.exp %483 : vector<8x128xf32>
    %cst_163 = arith.constant 1.000000e+00 : f32
    %485 = vector.broadcast %cst_163 : f32 to vector<8x128xf32>
    %486 = arith.addf %485, %484 : vector<8x128xf32>
    %487 = arith.divf %485, %486 : vector<8x128xf32>
    %488 = vector.extract_strided_slice %482 {offsets = [0, 64], sizes = [8, 32], strides = [1, 1]} : vector<8x128xf32> to vector<8x32xf32>
    %489 = math.tanh %488 : vector<8x32xf32>
    %490 = vector.extract_strided_slice %487 {offsets = [0, 0], sizes = [8, 32], strides = [1, 1]} : vector<8x128xf32> to vector<8x32xf32>
    %491 = vector.extract_strided_slice %487 {offsets = [0, 32], sizes = [8, 32], strides = [1, 1]} : vector<8x128xf32> to vector<8x32xf32>
    %492 = vector.extract_strided_slice %487 {offsets = [0, 96], sizes = [8, 32], strides = [1, 1]} : vector<8x128xf32> to vector<8x32xf32>
    %493 = arith.mulf %491, %457 : vector<8x32xf32>
    %494 = arith.mulf %490, %489 : vector<8x32xf32>
    %495 = arith.addf %493, %494 : vector<8x32xf32>
    %496 = math.tanh %495 : vector<8x32xf32>
    %497 = arith.mulf %492, %496 : vector<8x32xf32>
    %c24_164 = arith.constant 24 : index
    %c0_165 = arith.constant 0 : index
    %498 = vector.load %arg18[%c24_164, %c0_165] : memref<64x128xf32, #tpu.memory_space<vmem>>, vector<8x128xf32>
    %499 = arith.truncf %478 : vector<8x32xf32> to vector<8x32xbf16>
    %cst_166 = arith.constant dense<0.000000e+00> : vector<8x128xf32>
    %500 = tpu.matmul %499, %378, %cst_166 {dimension_numbers = #tpu.dot_dimension_numbers<[1], [0], [0], [1], [0, 0, 1, 1], [], []>} : vector<8x32xbf16>, vector<32x128xbf16>, vector<8x128xf32> -> vector<8x128xf32>
    %501 = arith.addf %498, %500 : vector<8x128xf32>
    %502 = arith.negf %501 : vector<8x128xf32>
    %503 = math.exp %502 : vector<8x128xf32>
    %cst_167 = arith.constant 1.000000e+00 : f32
    %504 = vector.broadcast %cst_167 : f32 to vector<8x128xf32>
    %505 = arith.addf %504, %503 : vector<8x128xf32>
    %506 = arith.divf %504, %505 : vector<8x128xf32>
    %507 = vector.extract_strided_slice %501 {offsets = [0, 64], sizes = [8, 32], strides = [1, 1]} : vector<8x128xf32> to vector<8x32xf32>
    %508 = math.tanh %507 : vector<8x32xf32>
    %509 = vector.extract_strided_slice %506 {offsets = [0, 0], sizes = [8, 32], strides = [1, 1]} : vector<8x128xf32> to vector<8x32xf32>
    %510 = vector.extract_strided_slice %506 {offsets = [0, 32], sizes = [8, 32], strides = [1, 1]} : vector<8x128xf32> to vector<8x32xf32>
    %511 = vector.extract_strided_slice %506 {offsets = [0, 96], sizes = [8, 32], strides = [1, 1]} : vector<8x128xf32> to vector<8x32xf32>
    %512 = arith.mulf %510, %476 : vector<8x32xf32>
    %513 = arith.mulf %509, %508 : vector<8x32xf32>
    %514 = arith.addf %512, %513 : vector<8x32xf32>
    %515 = math.tanh %514 : vector<8x32xf32>
    %516 = arith.mulf %511, %515 : vector<8x32xf32>
    %c32_168 = arith.constant 32 : index
    %c0_169 = arith.constant 0 : index
    %517 = vector.load %arg19[%c32_168, %c0_169] : memref<64x128xf32, #tpu.memory_space<vmem>>, vector<8x128xf32>
    %518 = arith.truncf %497 : vector<8x32xf32> to vector<8x32xbf16>
    %cst_170 = arith.constant dense<0.000000e+00> : vector<8x128xf32>
    %519 = tpu.matmul %518, %379, %cst_170 {dimension_numbers = #tpu.dot_dimension_numbers<[1], [0], [0], [1], [0, 0, 1, 1], [], []>} : vector<8x32xbf16>, vector<32x128xbf16>, vector<8x128xf32> -> vector<8x128xf32>
    %520 = arith.addf %517, %519 : vector<8x128xf32>
    %521 = arith.negf %520 : vector<8x128xf32>
    %522 = math.exp %521 : vector<8x128xf32>
    %cst_171 = arith.constant 1.000000e+00 : f32
    %523 = vector.broadcast %cst_171 : f32 to vector<8x128xf32>
    %524 = arith.addf %523, %522 : vector<8x128xf32>
    %525 = arith.divf %523, %524 : vector<8x128xf32>
    %526 = vector.extract_strided_slice %520 {offsets = [0, 64], sizes = [8, 32], strides = [1, 1]} : vector<8x128xf32> to vector<8x32xf32>
    %527 = math.tanh %526 : vector<8x32xf32>
    %528 = vector.extract_strided_slice %525 {offsets = [0, 0], sizes = [8, 32], strides = [1, 1]} : vector<8x128xf32> to vector<8x32xf32>
    %529 = vector.extract_strided_slice %525 {offsets = [0, 32], sizes = [8, 32], strides = [1, 1]} : vector<8x128xf32> to vector<8x32xf32>
    %530 = vector.extract_strided_slice %525 {offsets = [0, 96], sizes = [8, 32], strides = [1, 1]} : vector<8x128xf32> to vector<8x32xf32>
    %531 = arith.mulf %529, %495 : vector<8x32xf32>
    %532 = arith.mulf %528, %527 : vector<8x32xf32>
    %533 = arith.addf %531, %532 : vector<8x32xf32>
    %534 = math.tanh %533 : vector<8x32xf32>
    %535 = arith.mulf %530, %534 : vector<8x32xf32>
    %c32_172 = arith.constant 32 : index
    %c0_173 = arith.constant 0 : index
    %536 = vector.load %arg18[%c32_172, %c0_173] : memref<64x128xf32, #tpu.memory_space<vmem>>, vector<8x128xf32>
    %537 = arith.truncf %516 : vector<8x32xf32> to vector<8x32xbf16>
    %cst_174 = arith.constant dense<0.000000e+00> : vector<8x128xf32>
    %538 = tpu.matmul %537, %378, %cst_174 {dimension_numbers = #tpu.dot_dimension_numbers<[1], [0], [0], [1], [0, 0, 1, 1], [], []>} : vector<8x32xbf16>, vector<32x128xbf16>, vector<8x128xf32> -> vector<8x128xf32>
    %539 = arith.addf %536, %538 : vector<8x128xf32>
    %540 = arith.negf %539 : vector<8x128xf32>
    %541 = math.exp %540 : vector<8x128xf32>
    %cst_175 = arith.constant 1.000000e+00 : f32
    %542 = vector.broadcast %cst_175 : f32 to vector<8x128xf32>
    %543 = arith.addf %542, %541 : vector<8x128xf32>
    %544 = arith.divf %542, %543 : vector<8x128xf32>
    %545 = vector.extract_strided_slice %539 {offsets = [0, 64], sizes = [8, 32], strides = [1, 1]} : vector<8x128xf32> to vector<8x32xf32>
    %546 = math.tanh %545 : vector<8x32xf32>
    %547 = vector.extract_strided_slice %544 {offsets = [0, 0], sizes = [8, 32], strides = [1, 1]} : vector<8x128xf32> to vector<8x32xf32>
    %548 = vector.extract_strided_slice %544 {offsets = [0, 32], sizes = [8, 32], strides = [1, 1]} : vector<8x128xf32> to vector<8x32xf32>
    %549 = vector.extract_strided_slice %544 {offsets = [0, 96], sizes = [8, 32], strides = [1, 1]} : vector<8x128xf32> to vector<8x32xf32>
    %550 = arith.mulf %548, %514 : vector<8x32xf32>
    %551 = arith.mulf %547, %546 : vector<8x32xf32>
    %552 = arith.addf %550, %551 : vector<8x32xf32>
    %553 = math.tanh %552 : vector<8x32xf32>
    %554 = arith.mulf %549, %553 : vector<8x32xf32>
    %c24_176 = arith.constant 24 : index
    %c0_177 = arith.constant 0 : index
    %555 = vector.load %arg19[%c24_176, %c0_177] : memref<64x128xf32, #tpu.memory_space<vmem>>, vector<8x128xf32>
    %556 = arith.truncf %535 : vector<8x32xf32> to vector<8x32xbf16>
    %cst_178 = arith.constant dense<0.000000e+00> : vector<8x128xf32>
    %557 = tpu.matmul %556, %379, %cst_178 {dimension_numbers = #tpu.dot_dimension_numbers<[1], [0], [0], [1], [0, 0, 1, 1], [], []>} : vector<8x32xbf16>, vector<32x128xbf16>, vector<8x128xf32> -> vector<8x128xf32>
    %558 = arith.addf %555, %557 : vector<8x128xf32>
    %559 = arith.negf %558 : vector<8x128xf32>
    %560 = math.exp %559 : vector<8x128xf32>
    %cst_179 = arith.constant 1.000000e+00 : f32
    %561 = vector.broadcast %cst_179 : f32 to vector<8x128xf32>
    %562 = arith.addf %561, %560 : vector<8x128xf32>
    %563 = arith.divf %561, %562 : vector<8x128xf32>
    %564 = vector.extract_strided_slice %558 {offsets = [0, 64], sizes = [8, 32], strides = [1, 1]} : vector<8x128xf32> to vector<8x32xf32>
    %565 = math.tanh %564 : vector<8x32xf32>
    %566 = vector.extract_strided_slice %563 {offsets = [0, 0], sizes = [8, 32], strides = [1, 1]} : vector<8x128xf32> to vector<8x32xf32>
    %567 = vector.extract_strided_slice %563 {offsets = [0, 32], sizes = [8, 32], strides = [1, 1]} : vector<8x128xf32> to vector<8x32xf32>
    %568 = vector.extract_strided_slice %563 {offsets = [0, 96], sizes = [8, 32], strides = [1, 1]} : vector<8x128xf32> to vector<8x32xf32>
    %569 = arith.mulf %567, %533 : vector<8x32xf32>
    %570 = arith.mulf %566, %565 : vector<8x32xf32>
    %571 = arith.addf %569, %570 : vector<8x32xf32>
    %572 = math.tanh %571 : vector<8x32xf32>
    %573 = arith.mulf %568, %572 : vector<8x32xf32>
    %c40_180 = arith.constant 40 : index
    %c0_181 = arith.constant 0 : index
    %574 = vector.load %arg18[%c40_180, %c0_181] : memref<64x128xf32, #tpu.memory_space<vmem>>, vector<8x128xf32>
    %575 = arith.truncf %554 : vector<8x32xf32> to vector<8x32xbf16>
    %cst_182 = arith.constant dense<0.000000e+00> : vector<8x128xf32>
    %576 = tpu.matmul %575, %378, %cst_182 {dimension_numbers = #tpu.dot_dimension_numbers<[1], [0], [0], [1], [0, 0, 1, 1], [], []>} : vector<8x32xbf16>, vector<32x128xbf16>, vector<8x128xf32> -> vector<8x128xf32>
    %577 = arith.addf %574, %576 : vector<8x128xf32>
    %578 = arith.negf %577 : vector<8x128xf32>
    %579 = math.exp %578 : vector<8x128xf32>
    %cst_183 = arith.constant 1.000000e+00 : f32
    %580 = vector.broadcast %cst_183 : f32 to vector<8x128xf32>
    %581 = arith.addf %580, %579 : vector<8x128xf32>
    %582 = arith.divf %580, %581 : vector<8x128xf32>
    %583 = vector.extract_strided_slice %577 {offsets = [0, 64], sizes = [8, 32], strides = [1, 1]} : vector<8x128xf32> to vector<8x32xf32>
    %584 = math.tanh %583 : vector<8x32xf32>
    %585 = vector.extract_strided_slice %582 {offsets = [0, 0], sizes = [8, 32], strides = [1, 1]} : vector<8x128xf32> to vector<8x32xf32>
    %586 = vector.extract_strided_slice %582 {offsets = [0, 32], sizes = [8, 32], strides = [1, 1]} : vector<8x128xf32> to vector<8x32xf32>
    %587 = vector.extract_strided_slice %582 {offsets = [0, 96], sizes = [8, 32], strides = [1, 1]} : vector<8x128xf32> to vector<8x32xf32>
    %588 = arith.mulf %586, %552 : vector<8x32xf32>
    %589 = arith.mulf %585, %584 : vector<8x32xf32>
    %590 = arith.addf %588, %589 : vector<8x32xf32>
    %591 = math.tanh %590 : vector<8x32xf32>
    %592 = arith.mulf %587, %591 : vector<8x32xf32>
    %c16_184 = arith.constant 16 : index
    %c0_185 = arith.constant 0 : index
    %593 = vector.load %arg19[%c16_184, %c0_185] : memref<64x128xf32, #tpu.memory_space<vmem>>, vector<8x128xf32>
    %594 = arith.truncf %573 : vector<8x32xf32> to vector<8x32xbf16>
    %cst_186 = arith.constant dense<0.000000e+00> : vector<8x128xf32>
    %595 = tpu.matmul %594, %379, %cst_186 {dimension_numbers = #tpu.dot_dimension_numbers<[1], [0], [0], [1], [0, 0, 1, 1], [], []>} : vector<8x32xbf16>, vector<32x128xbf16>, vector<8x128xf32> -> vector<8x128xf32>
    %596 = arith.addf %593, %595 : vector<8x128xf32>
    %597 = arith.negf %596 : vector<8x128xf32>
    %598 = math.exp %597 : vector<8x128xf32>
    %cst_187 = arith.constant 1.000000e+00 : f32
    %599 = vector.broadcast %cst_187 : f32 to vector<8x128xf32>
    %600 = arith.addf %599, %598 : vector<8x128xf32>
    %601 = arith.divf %599, %600 : vector<8x128xf32>
    %602 = vector.extract_strided_slice %596 {offsets = [0, 64], sizes = [8, 32], strides = [1, 1]} : vector<8x128xf32> to vector<8x32xf32>
    %603 = math.tanh %602 : vector<8x32xf32>
    %604 = vector.extract_strided_slice %601 {offsets = [0, 0], sizes = [8, 32], strides = [1, 1]} : vector<8x128xf32> to vector<8x32xf32>
    %605 = vector.extract_strided_slice %601 {offsets = [0, 32], sizes = [8, 32], strides = [1, 1]} : vector<8x128xf32> to vector<8x32xf32>
    %606 = vector.extract_strided_slice %601 {offsets = [0, 96], sizes = [8, 32], strides = [1, 1]} : vector<8x128xf32> to vector<8x32xf32>
    %607 = arith.mulf %605, %571 : vector<8x32xf32>
    %608 = arith.mulf %604, %603 : vector<8x32xf32>
    %609 = arith.addf %607, %608 : vector<8x32xf32>
    %610 = math.tanh %609 : vector<8x32xf32>
    %611 = arith.mulf %606, %610 : vector<8x32xf32>
    %c48_188 = arith.constant 48 : index
    %c0_189 = arith.constant 0 : index
    %612 = vector.load %arg18[%c48_188, %c0_189] : memref<64x128xf32, #tpu.memory_space<vmem>>, vector<8x128xf32>
    %613 = arith.truncf %592 : vector<8x32xf32> to vector<8x32xbf16>
    %cst_190 = arith.constant dense<0.000000e+00> : vector<8x128xf32>
    %614 = tpu.matmul %613, %378, %cst_190 {dimension_numbers = #tpu.dot_dimension_numbers<[1], [0], [0], [1], [0, 0, 1, 1], [], []>} : vector<8x32xbf16>, vector<32x128xbf16>, vector<8x128xf32> -> vector<8x128xf32>
    %615 = arith.addf %612, %614 : vector<8x128xf32>
    %616 = arith.negf %615 : vector<8x128xf32>
    %617 = math.exp %616 : vector<8x128xf32>
    %cst_191 = arith.constant 1.000000e+00 : f32
    %618 = vector.broadcast %cst_191 : f32 to vector<8x128xf32>
    %619 = arith.addf %618, %617 : vector<8x128xf32>
    %620 = arith.divf %618, %619 : vector<8x128xf32>
    %621 = vector.extract_strided_slice %615 {offsets = [0, 64], sizes = [8, 32], strides = [1, 1]} : vector<8x128xf32> to vector<8x32xf32>
    %622 = math.tanh %621 : vector<8x32xf32>
    %623 = vector.extract_strided_slice %620 {offsets = [0, 0], sizes = [8, 32], strides = [1, 1]} : vector<8x128xf32> to vector<8x32xf32>
    %624 = vector.extract_strided_slice %620 {offsets = [0, 32], sizes = [8, 32], strides = [1, 1]} : vector<8x128xf32> to vector<8x32xf32>
    %625 = vector.extract_strided_slice %620 {offsets = [0, 96], sizes = [8, 32], strides = [1, 1]} : vector<8x128xf32> to vector<8x32xf32>
    %626 = arith.mulf %624, %590 : vector<8x32xf32>
    %627 = arith.mulf %623, %622 : vector<8x32xf32>
    %628 = arith.addf %626, %627 : vector<8x32xf32>
    %629 = math.tanh %628 : vector<8x32xf32>
    %630 = arith.mulf %625, %629 : vector<8x32xf32>
    %c8_192 = arith.constant 8 : index
    %c0_193 = arith.constant 0 : index
    %631 = vector.load %arg19[%c8_192, %c0_193] : memref<64x128xf32, #tpu.memory_space<vmem>>, vector<8x128xf32>
    %632 = arith.truncf %611 : vector<8x32xf32> to vector<8x32xbf16>
    %cst_194 = arith.constant dense<0.000000e+00> : vector<8x128xf32>
    %633 = tpu.matmul %632, %379, %cst_194 {dimension_numbers = #tpu.dot_dimension_numbers<[1], [0], [0], [1], [0, 0, 1, 1], [], []>} : vector<8x32xbf16>, vector<32x128xbf16>, vector<8x128xf32> -> vector<8x128xf32>
    %634 = arith.addf %631, %633 : vector<8x128xf32>
    %635 = arith.negf %634 : vector<8x128xf32>
    %636 = math.exp %635 : vector<8x128xf32>
    %cst_195 = arith.constant 1.000000e+00 : f32
    %637 = vector.broadcast %cst_195 : f32 to vector<8x128xf32>
    %638 = arith.addf %637, %636 : vector<8x128xf32>
    %639 = arith.divf %637, %638 : vector<8x128xf32>
    %640 = vector.extract_strided_slice %634 {offsets = [0, 64], sizes = [8, 32], strides = [1, 1]} : vector<8x128xf32> to vector<8x32xf32>
    %641 = math.tanh %640 : vector<8x32xf32>
    %642 = vector.extract_strided_slice %639 {offsets = [0, 0], sizes = [8, 32], strides = [1, 1]} : vector<8x128xf32> to vector<8x32xf32>
    %643 = vector.extract_strided_slice %639 {offsets = [0, 32], sizes = [8, 32], strides = [1, 1]} : vector<8x128xf32> to vector<8x32xf32>
    %644 = vector.extract_strided_slice %639 {offsets = [0, 96], sizes = [8, 32], strides = [1, 1]} : vector<8x128xf32> to vector<8x32xf32>
    %645 = arith.mulf %643, %609 : vector<8x32xf32>
    %646 = arith.mulf %642, %641 : vector<8x32xf32>
    %647 = arith.addf %645, %646 : vector<8x32xf32>
    %648 = math.tanh %647 : vector<8x32xf32>
    %649 = arith.mulf %644, %648 : vector<8x32xf32>
    %c56_196 = arith.constant 56 : index
    %c0_197 = arith.constant 0 : index
    %650 = vector.load %arg18[%c56_196, %c0_197] : memref<64x128xf32, #tpu.memory_space<vmem>>, vector<8x128xf32>
    %651 = arith.truncf %630 : vector<8x32xf32> to vector<8x32xbf16>
    %cst_198 = arith.constant dense<0.000000e+00> : vector<8x128xf32>
    %652 = tpu.matmul %651, %378, %cst_198 {dimension_numbers = #tpu.dot_dimension_numbers<[1], [0], [0], [1], [0, 0, 1, 1], [], []>} : vector<8x32xbf16>, vector<32x128xbf16>, vector<8x128xf32> -> vector<8x128xf32>
    %653 = arith.addf %650, %652 : vector<8x128xf32>
    %654 = arith.negf %653 : vector<8x128xf32>
    %655 = math.exp %654 : vector<8x128xf32>
    %cst_199 = arith.constant 1.000000e+00 : f32
    %656 = vector.broadcast %cst_199 : f32 to vector<8x128xf32>
    %657 = arith.addf %656, %655 : vector<8x128xf32>
    %658 = arith.divf %656, %657 : vector<8x128xf32>
    %659 = vector.extract_strided_slice %653 {offsets = [0, 64], sizes = [8, 32], strides = [1, 1]} : vector<8x128xf32> to vector<8x32xf32>
    %660 = math.tanh %659 : vector<8x32xf32>
    %661 = vector.extract_strided_slice %658 {offsets = [0, 0], sizes = [8, 32], strides = [1, 1]} : vector<8x128xf32> to vector<8x32xf32>
    %662 = vector.extract_strided_slice %658 {offsets = [0, 32], sizes = [8, 32], strides = [1, 1]} : vector<8x128xf32> to vector<8x32xf32>
    %663 = vector.extract_strided_slice %658 {offsets = [0, 96], sizes = [8, 32], strides = [1, 1]} : vector<8x128xf32> to vector<8x32xf32>
    %664 = arith.mulf %662, %628 : vector<8x32xf32>
    %665 = arith.mulf %661, %660 : vector<8x32xf32>
    %666 = arith.addf %664, %665 : vector<8x32xf32>
    %667 = math.tanh %666 : vector<8x32xf32>
    %668 = arith.mulf %663, %667 : vector<8x32xf32>
    %c0_200 = arith.constant 0 : index
    %c0_201 = arith.constant 0 : index
    %669 = vector.load %arg19[%c0_200, %c0_201] : memref<64x128xf32, #tpu.memory_space<vmem>>, vector<8x128xf32>
    %670 = arith.truncf %649 : vector<8x32xf32> to vector<8x32xbf16>
    %cst_202 = arith.constant dense<0.000000e+00> : vector<8x128xf32>
    %671 = tpu.matmul %670, %379, %cst_202 {dimension_numbers = #tpu.dot_dimension_numbers<[1], [0], [0], [1], [0, 0, 1, 1], [], []>} : vector<8x32xbf16>, vector<32x128xbf16>, vector<8x128xf32> -> vector<8x128xf32>
    %672 = arith.addf %669, %671 : vector<8x128xf32>
    %673 = arith.negf %672 : vector<8x128xf32>
    %674 = math.exp %673 : vector<8x128xf32>
    %cst_203 = arith.constant 1.000000e+00 : f32
    %675 = vector.broadcast %cst_203 : f32 to vector<8x128xf32>
    %676 = arith.addf %675, %674 : vector<8x128xf32>
    %677 = arith.divf %675, %676 : vector<8x128xf32>
    %678 = vector.extract_strided_slice %672 {offsets = [0, 64], sizes = [8, 32], strides = [1, 1]} : vector<8x128xf32> to vector<8x32xf32>
    %679 = math.tanh %678 : vector<8x32xf32>
    %680 = vector.extract_strided_slice %677 {offsets = [0, 0], sizes = [8, 32], strides = [1, 1]} : vector<8x128xf32> to vector<8x32xf32>
    %681 = vector.extract_strided_slice %677 {offsets = [0, 32], sizes = [8, 32], strides = [1, 1]} : vector<8x128xf32> to vector<8x32xf32>
    %682 = vector.extract_strided_slice %677 {offsets = [0, 96], sizes = [8, 32], strides = [1, 1]} : vector<8x128xf32> to vector<8x32xf32>
    %683 = arith.mulf %681, %647 : vector<8x32xf32>
    %684 = arith.mulf %680, %679 : vector<8x32xf32>
    %685 = arith.addf %683, %684 : vector<8x32xf32>
    %686 = math.tanh %685 : vector<8x32xf32>
    %687 = arith.mulf %682, %686 : vector<8x32xf32>
    %c0_204 = arith.constant 0 : index
    %c0_205 = arith.constant 0 : index
    %688 = vector.load %arg14[%c0_204, %c0_205] : memref<1x32xf32, #tpu.memory_space<vmem>>, vector<1x32xf32>
    %689 = vector.broadcast %688 : vector<1x32xf32> to vector<8x32xf32>
    %690 = arith.mulf %668, %689 : vector<8x32xf32>
    %cst_206 = arith.constant dense<0.000000e+00> : vector<8xf32>
    %691 = vector.multi_reduction <add>, %690, %cst_206 [1] : vector<8x32xf32> to vector<8xf32>
    %692 = vector.shape_cast %691 : vector<8xf32> to vector<8x1xf32>
    %c0_207 = arith.constant 0 : index
    %c0_208 = arith.constant 0 : index
    %693 = vector.load %arg15[%c0_207, %c0_208] : memref<1x32xf32, #tpu.memory_space<vmem>>, vector<1x32xf32>
    %694 = vector.broadcast %693 : vector<1x32xf32> to vector<8x32xf32>
    %695 = arith.mulf %687, %694 : vector<8x32xf32>
    %cst_209 = arith.constant dense<0.000000e+00> : vector<8xf32>
    %696 = vector.multi_reduction <add>, %695, %cst_209 [1] : vector<8x32xf32> to vector<8xf32>
    %697 = vector.shape_cast %696 : vector<8xf32> to vector<8x1xf32>
    %698 = arith.addf %692, %697 : vector<8x1xf32>
    %c0_210 = arith.constant 0 : index
    %c0_211 = arith.constant 0 : index
    %699 = vector.load %arg16[%c0_210, %c0_211] : memref<1x1xf32, #tpu.memory_space<vmem>>, vector<1x1xf32>
    %700 = vector.broadcast %699 : vector<1x1xf32> to vector<8x1xf32>
    %701 = arith.addf %698, %700 : vector<8x1xf32>
    %c0_212 = arith.constant 0 : index
    %c0_213 = arith.constant 0 : index
    %702 = vector.load %arg17[%c0_212, %c0_213] : memref<8x1xf32, #tpu.memory_space<vmem>>, vector<8x1xf32>
    tpu.vector_store %arg17[%c0_212, %c0_213], %701 {strides = array<i32>} : memref<8x1xf32, #tpu.memory_space<vmem>>, vector<8x1xf32>,
    return
  }
  func.func @transform_0(%arg0: i32) -> (i32, i32, i32) {
    %c0_i32 = arith.constant 0 : i32
    %c0_i32_0 = arith.constant 0 : i32
    %c0_i32_1 = arith.constant 0 : i32
    return %arg0, %c0_i32, %c0_i32_0 : i32, i32, i32
  }
  func.func @transform_1(%arg0: i32) -> (i32, i32) {
    %c0_i32 = arith.constant 0 : i32
    %c0_i32_0 = arith.constant 0 : i32
    %c0_i32_1 = arith.constant 0 : i32
    return %c0_i32, %c0_i32_0 : i32, i32
  }
  func.func @transform_2(%arg0: i32) -> (i32, i32) {
    %c0_i32 = arith.constant 0 : i32
    %c0_i32_0 = arith.constant 0 : i32
    %c0_i32_1 = arith.constant 0 : i32
    return %c0_i32, %c0_i32_0 : i32, i32
  }
  func.func @transform_3(%arg0: i32) -> (i32, i32) {
    %c0_i32 = arith.constant 0 : i32
    %c0_i32_0 = arith.constant 0 : i32
    %c0_i32_1 = arith.constant 0 : i32
    return %c0_i32, %c0_i32_0 : i32, i32
  }
  func.func @transform_4(%arg0: i32) -> (i32, i32) {
    %c0_i32 = arith.constant 0 : i32
    %c0_i32_0 = arith.constant 0 : i32
    %c0_i32_1 = arith.constant 0 : i32
    return %c0_i32, %c0_i32_0 : i32, i32
  }
  func.func @transform_5(%arg0: i32) -> (i32, i32) {
    %c0_i32 = arith.constant 0 : i32
    %c0_i32_0 = arith.constant 0 : i32
    %c0_i32_1 = arith.constant 0 : i32
    return %c0_i32, %c0_i32_0 : i32, i32
  }
  func.func @transform_6(%arg0: i32) -> (i32, i32) {
    %c0_i32 = arith.constant 0 : i32
    %c0_i32_0 = arith.constant 0 : i32
    %c0_i32_1 = arith.constant 0 : i32
    return %c0_i32, %c0_i32_0 : i32, i32
  }
  func.func @transform_7(%arg0: i32) -> (i32, i32) {
    %c0_i32 = arith.constant 0 : i32
    %c0_i32_0 = arith.constant 0 : i32
    %c0_i32_1 = arith.constant 0 : i32
    return %c0_i32, %c0_i32_0 : i32, i32
  }
  func.func @transform_8(%arg0: i32) -> (i32, i32) {
    %c0_i32 = arith.constant 0 : i32
    %c0_i32_0 = arith.constant 0 : i32
    %c0_i32_1 = arith.constant 0 : i32
    return %c0_i32, %c0_i32_0 : i32, i32
  }
  func.func @transform_9(%arg0: i32) -> (i32, i32) {
    %c0_i32 = arith.constant 0 : i32
    %c0_i32_0 = arith.constant 0 : i32
    %c0_i32_1 = arith.constant 0 : i32
    return %c0_i32, %c0_i32_0 : i32, i32
  }
  func.func @transform_10(%arg0: i32) -> (i32, i32) {
    %c0_i32 = arith.constant 0 : i32
    %c0_i32_0 = arith.constant 0 : i32
    %c0_i32_1 = arith.constant 0 : i32
    return %c0_i32, %c0_i32_0 : i32, i32
  }
  func.func @transform_11(%arg0: i32) -> (i32, i32) {
    %c0_i32 = arith.constant 0 : i32
    %c0_i32_0 = arith.constant 0 : i32
    %c0_i32_1 = arith.constant 0 : i32
    return %c0_i32, %c0_i32_0 : i32, i32
  }
  func.func @transform_12(%arg0: i32) -> (i32, i32) {
    %c0_i32 = arith.constant 0 : i32
    %c0_i32_0 = arith.constant 0 : i32
    %c0_i32_1 = arith.constant 0 : i32
    return %c0_i32, %c0_i32_0 : i32, i32
  }
  func.func @transform_13(%arg0: i32) -> (i32, i32) {
    %c0_i32 = arith.constant 0 : i32
    %c0_i32_0 = arith.constant 0 : i32
    %c0_i32_1 = arith.constant 0 : i32
    return %c0_i32, %c0_i32_0 : i32, i32
  }
  func.func @transform_14(%arg0: i32) -> (i32, i32) {
    %c0_i32 = arith.constant 0 : i32
    %c0_i32_0 = arith.constant 0 : i32
    %c0_i32_1 = arith.constant 0 : i32
    return %c0_i32, %c0_i32_0 : i32, i32
  }
  func.func @transform_15(%arg0: i32) -> (i32, i32) {
    %c0_i32 = arith.constant 0 : i32
    %c0_i32_0 = arith.constant 0 : i32
    %c0_i32_1 = arith.constant 0 : i32
    return %c0_i32, %c0_i32_0 : i32, i32
  }
  func.func @transform_16(%arg0: i32) -> (i32, i32) {
    %c0_i32 = arith.constant 0 : i32
    %c0_i32_0 = arith.constant 0 : i32
    return %arg0, %c0_i32 : i32, i32
  }
}

</mosaic_0001>

<bundles_post_ra>
// kernel: lstm_forward.1
= control target key start
LH: loop header
LB: loop body
LE: loop exit
PB: predicated region body
PF: predicated region fallthrough
CT: control target
= control target key end

     0   :  { %vm99_vm0 = vcmask 130048   ;;  %v4148_v5 = vmov 0.0   ;;  %vm4149_vm1 = vmmov 0   ;;  %v4150_v11 = vmov 0   ;;  %s4989_s1 = inlined_call_operand.vmem [shape: bf16[16,128], index: 1, kind: input, shape index: {}]   ;;  %s4990_s4 = inlined_call_operand.vmem [shape: bf16[16,128], index: 4, kind: input, shape index: {}]   ;;  %s4991_s0 = inlined_call_operand.vmem [shape: bf16[1,64,16], index: 0, kind: input, shape index: {}]   ;;  %s4992_s5 = inlined_call_operand.vmem [shape: bf16[32,128], index: 5, kind: input, shape index: {}]   ;;  %s4993_s2 = inlined_call_operand.vmem [shape: bf16[32,128], index: 2, kind: input, shape index: {}]   ;;  %s4994_s3 = inlined_call_operand.vmem [shape: f32[1,128], index: 3, kind: input, shape index: {}]   ;;  %s4995_s6 = inlined_call_operand.vmem [shape: f32[1,128], index: 6, kind: input, shape index: {}]   ;;  %s4996_s7 = inlined_call_operand.vmem [shape: bf16[64,128], index: 7, kind: input, shape index: {}]   ;;  %s4997_s10 = inlined_call_operand.vmem [shape: bf16[64,128], index: 10, kind: input, shape index: {}]   ;;  %s4998_s8 = inlined_call_operand.vmem [shape: bf16[32,128], index: 8, kind: input, shape index: {}]   ;;  %s4999_s11 = inlined_call_operand.vmem [shape: bf16[32,128], index: 11, kind: input, shape index: {}]   ;;  %s5000_s9 = inlined_call_operand.vmem [shape: f32[1,128], index: 9, kind: input, shape index: {}]   ;;  %s5001_s12 = inlined_call_operand.vmem [shape: f32[1,128], index: 12, kind: input, shape index: {}]   ;;  %s5002_s13 = inlined_call_operand.vmem [shape: f32[1,32], index: 13, kind: input, shape index: {}]   ;;  %s5003_s14 = inlined_call_operand.vmem [shape: f32[1,32], index: 14, kind: input, shape index: {}]   ;;  %s5004_s15 = inlined_call_operand.<no memory space> [shape: f32[1,1], index: 15, kind: input, shape index: {}]   ;;  %s5005_s16 = inlined_call_operand.vmem [shape: f32[8,1], index: 16, kind: output, shape index: {}]  }
   0x1   :  { %5006 = sst [smem:[#allocation7_spill]] %s4989_s1  ;;  %v3863_v1 = vld [vmem:[%s4990_s4] sm:$0xff]   ;;  %v3865_v3 = vld [vmem:[%s4991_s0 + $0x8] sm:$0xff]   ;;  %v3867_v6 = vld [vmem:[%s4991_s0 + $0x10] sm:$0xff]   ;;  %vm294_vm2 = vcmask 261120   ;;  %vm448_vm3 = vcmask 257024  }
   0x2   :  { %s5007_s23 = sld [smem:[#allocation7_spill]]  ;;  %v3864_v2 = vld [vmem:[%s4991_s0] sm:$0xff]   ;;  %3542 = vmatprep.subr.bf16.mxu1 %v3863_v1  ;;  %v4255_v4 = vld [vmem:[%s4992_s5 + $0x8] sm:$0xff]   ;;  %v3868_v10 = vld [vmem:[%s4991_s0 + $0x18] sm:$0xff]   ;;  %s4153_s4 = smov 96   ;;  %vm3243_vm4 = vcmask 7168  }
   0x3   :  { %3543 = vmatpush3.bf16.msra.mxu1 %v3863_v1  ;;  %3534 = vmatprep.mubr.msk.bf16.mxu0 %vm99_vm0, %v3864_v2  ;;  %v4269_v7 = vld [vmem:[%s4993_s2 + $0x8] sm:$0xff]   ;;  %v4276_v8 = vld [vmem:[%s4992_s5] sm:$0xff]  }
   0x4   :  { %3544 = vmatprep.mubr.msk.bf16.mxu1 %vm99_vm0, %v3864_v2  ;;  %3560 = vmatprep.subr.bf16.mxu1 %v4148_v5  ;;  %v4283_v9 = vld [vmem:[%s4993_s2] sm:$0xff]  }
   0x5   :  { %v3249_v12 = vld [vmem:[%s4994_s3] ss:$0 sm:$0xff]  ;;  %s4151_s3 = smov 64  }
   0x6   :  { %3545 = vmatmul.mubr.msk.bf16.vlgmr.msra.gmra.mxu1 %vm99_vm0, %v3865_v3  ;;  %v3259_v13 = vld [vmem:[%s4995_s6] ss:$0 sm:$0xff]  ;;  %s4152_s6 = smov 32  }
   0x7   :  { %3561 = vmatpush3.bf16.msra.mxu1 %v4255_v4  ;;  %3548 = vmatprep.mubr.msk.bf16.mxu1 %vm99_vm0, %v3867_v6 }
   0x8   :  { %v3862_v0 = vld [vmem:[%s5007_s23] sm:$0xff]   ;;  %3562 = vmatprep.subr.bf16.mxu1 %v4148_v5 }
   0x9   :  { %3532 = vmatprep.subr.bf16.mxu0 %v3862_v0 }
   0xa   :  { %3533 = vmatpush3.bf16.msra.mxu0 %v3862_v0 }
   0xb   :  { %3552 = vmatprep.subr.bf16.mxu0 %v4148_v5  ;;  %3563 = vmatpush3.bf16.msra.mxu1 %v4276_v8 }
   0xc   :  { %3576 = vmatprep.subr.bf16.mxu1 %v4148_v5 }
   0xd   :  { %3535 = vmatmul.mubr.msk.bf16.vlgmr.msra.gmra.mxu0 %vm99_vm0, %v3865_v3 }
   0xe   :  { %3538 = vmatprep.mubr.msk.bf16.mxu0 %vm99_vm0, %v3867_v6  ;;  %3553 = vmatpush3.bf16.msra.mxu0 %v4269_v7 }
   0xf   :  { %3554 = vmatprep.subr.bf16.mxu0 %v4148_v5  ;;  %3549 = vmatmul.mubr.msk.bf16.gmra.mxu1 %vm99_vm0, %v3868_v10 }
  0x10   :  { %3564 = vmatprep.mubr.msk.bf16.mxu1 %vm4149_vm1, %v4148_v5 }
  0x12   :  { %3555 = vmatpush3.bf16.msra.mxu0 %v4283_v9 }
  0x13   :  { %3568 = vmatprep.subr.bf16.mxu0 %v4148_v5 }
  0x15   :  { %3539 = vmatmul.mubr.msk.bf16.gmra.mxu0 %vm99_vm0, %v3868_v10 }
  0x16   :  { %3556 = vmatprep.mubr.msk.bf16.mxu0 %vm4149_vm1, %v4148_v5 }
  0x17   :  { %3565 = vmatmul.mubr.bf16.vlgmr.msra.gmra.mxu1 %v4150_v11 }
  0x18   :  { %3577 = vmatpush3.bf16.msra.mxu1 %v4255_v4  ;;  %3580 = vmatprep.mubr.msk.bf16.mxu1 %vm4149_vm1, %v4148_v5 }
  0x19   :  { %3578 = vmatprep.subr.bf16.mxu1 %v4148_v5 }
  0x1c   :  { %3579 = vmatpush3.bf16.msra.mxu1 %v4276_v8 }
  0x1d   :  { %3557 = vmatmul.mubr.bf16.vlgmr.msra.gmra.mxu0 %v4150_v11  ;;  %3592 = vmatprep.subr.bf16.mxu1 %v4148_v5 }
  0x1e   :  { %3569 = vmatpush3.bf16.msra.mxu0 %v4269_v7  ;;  %3572 = vmatprep.mubr.msk.bf16.mxu0 %vm4149_vm1, %v4148_v5 }
  0x1f   :  { %3570 = vmatprep.subr.bf16.mxu0 %v4148_v5 }
  0x22   :  { %3571 = vmatpush3.bf16.msra.mxu0 %v4283_v9 }
  0x23   :  { %3584 = vmatprep.subr.bf16.mxu0 %v4148_v5 }
  0xc6   :  { %v3546_v16 = vpop.f32.mrf.mxu1 }
  0xc7   :  { %v4321_v17 = vadd.f32 %v3546_v16, %v3259_v13 }
  0xc8   :  { %v226_v19 = vpop.f32.mrf.mxu1 }
  0xc9   :  { %v4323_v20 = vadd.f32 %v3259_v13, %v226_v19 }
  0xca   :  { %v3547_v23 = vpop.f32.mrf.mxu1 }
  0xcb   :  { %v4327_v24 = vadd.f32 %v3547_v23, %v3259_v13 }
  0xcc   :  { %v229_v27 = vpop.f32.mrf.mxu1 }
  0xcd   :  { %v3536_v14 = vpop.f32.mrf.mxu0  ;;  %v4331_v28 = vadd.f32 %v3259_v13, %v229_v27 }
  0xce   :  { %v4319_v15 = vadd.f32 %v3536_v14, %v3249_v12 }
  0xcf   :  { %v146_v18 = vpop.f32.mrf.mxu0  ;;  %v3550_v31 = vpop.f32.mrf.mxu1 }
  0xd0   :  { %v4335_v32 = vadd.f32 %v3550_v31, %v3259_v13  ;;  %v147_v47 = vadd.f32 %v3249_v12, %v146_v18 }
  0xd1   :  { %v3537_v21 = vpop.f32.mrf.mxu0  ;;  %v242_v35 = vpop.f32.mrf.mxu1 }
  0xd2   :  { %v4325_v22 = vadd.f32 %v3537_v21, %v3249_v12  ;;  %v4339_v36 = vadd.f32 %v3259_v13, %v242_v35 }
  0xd3   :  { %v149_v25 = vpop.f32.mrf.mxu0  ;;  %v3551_v39 = vpop.f32.mrf.mxu1 }
  0xd4   :  { %v4329_v26 = vadd.f32 %v3249_v12, %v149_v25  ;;  %v254_v43 = vadd.f32 %v3551_v39, %v3259_v13 }
  0xd5   :  { %v3540_v29 = vpop.f32.mrf.mxu0  ;;  %v245_v42 = vpop.f32.mrf.mxu1 }
  0xd6   :  { %v4333_v30 = vadd.f32 %v3540_v29, %v3249_v12  ;;  %v4345_v44 = vadd.f32 %v3259_v13, %v245_v42 }
  0xd7   :  { %v162_v33 = vpop.f32.mrf.mxu0  ;;  %v410_v46 = vpop.f32.mrf.mxu1 }
  0xd8   :  { %v4337_v34 = vadd.f32 %v3249_v12, %v162_v33  ;;  %v416_v48 = vadd.f32 %v410_v46, %v254_v43 }
  0xd9   :  { %v3541_v37 = vpop.f32.mrf.mxu0  ;;  %v3566_v50 = vpop.f32.mrf.mxu1 }
  0xda   :  { %v4341_v38 = vadd.f32 %v3541_v37, %v3249_v12  ;;  %3892 = vtanh.f32 %v416_v48  ;;  %v3270_v58 = vmul.f32 -1.442695, %v416_v48 }
  0xdb   :  { %v165_v40 = vpop.f32.mrf.mxu0  ;;  %v413_v53 = vpop.f32.mrf.mxu1 }
  0xdc   :  { %v4343_v41 = vadd.f32 %v3249_v12, %v165_v40 }
  0xdd   :  { %v332_v45 = vpop.f32.mrf.mxu0  ;;  %v3567_v55 = vpop.f32.mrf.mxu1 }
  0xde   :  { %v338_v51 = vadd.f32 %v332_v45, %v147_v47 }
  0xdf   :  { %v3558_v49 = vpop.f32.mrf.mxu0 }
  0xe0   :  { %3894 = vtanh.f32 %v338_v51  ;;  %v3267_v59 = vmul.f32 -1.442695, %v338_v51 }
  0xe1   :  { %v335_v52 = vpop.f32.mrf.mxu0  ;;  %3896 = vpow2.f32 %v3270_v58 }
  0xe2   :  { %3898 = vpow2.f32 %v3267_v59 }
  0xe3   :  { %v3559_v54 = vpop.f32.mrf.mxu0 }
  0xe7   :  { %v3893_v56 = vpop.eup %3892 }
  0xe8   :  { %426 = vrot.lane.b32.xlu0 %v3893_v56, %s4151_s3 }
  0xed   :  { %v3895_v57 = vpop.eup %3894 }
  0xee   :  { %348 = vrot.lane.b32.xlu0 %v3895_v57, %s4151_s3  ;;  %v3897_v60 = vpop.eup %3896 }
  0xef   :  { %v420_v61 = vadd.f32 1.0, %v3897_v60  ;;  %v3899_v62 = vpop.eup %3898 }
  0xf0   :  { %v342_v63 = vadd.f32 1.0, %v3899_v62 }
  0xf1   :  { %3900 = vrcp.f32 %v420_v61 }
  0xf2   :  { %3902 = vrcp.f32 %v342_v63 }
  0xfe   :  { %v3901_v0 = vpop.eup %3900 }
  0xff   :  { %v3903_v3 = vpop.eup %3902  ;;  %v424_v12 = vmul.f32 0.0, %v3901_v0 }
 0x100   :  { %v346_v16 = vmul.f32 0.0, %v3903_v3 }
 0x15a   :  { %v427_v1 = vpop.permute.xlu0 %426 }
 0x15b   :  { %v429_v2 = vmul.f32 %v3901_v0, %v427_v1 }
 0x15d   :  { %431 = vrot.lane.b32.xlu1 %v429_v2, %s4152_s6 }
 0x160   :  { %v349_v6 = vpop.permute.xlu0 %348 }
 0x161   :  { %v351_v10 = vmul.f32 %v3903_v3, %v349_v6 }
 0x163   :  { %353 = vrot.lane.b32.xlu1 %v351_v10, %s4152_s6 }
 0x1cf   :  { %v432_v13 = vpop.permute.xlu1 %431 }
 0x1d0   :  { %v4351_v14 = vadd.f32 %v432_v13, %v424_v12 }
 0x1d2   :  { %3904 = vtanh.f32 %v4351_v14 }
 0x1d5   :  { %v354_v18 = vpop.permute.xlu1 %353 }
 0x1d6   :  { %v4354_v19 = vadd.f32 %v354_v18, %v346_v16 }
 0x1d8   :  { %3906 = vtanh.f32 %v4354_v19 }
 0x1df   :  { %v3905_v21 = vpop.eup %3904 }
 0x1e0   :  { %437 = vrot.lane.b32.xlu0 %v3905_v21, %s4151_s3 }
 0x1e5   :  { %v3907_v23 = vpop.eup %3906 }
 0x1e6   :  { %359 = vrot.lane.b32.xlu1 %v3907_v23, %s4151_s3 }
 0x252   :  { %v438_v25 = vpop.permute.xlu0 %437 }
 0x253   :  { %v440_v27 = vmul.f32 %v3901_v0, %v438_v25 }
 0x255   :  { %v4359_v29 = vpack.c.bf16 %v440_v27, %v440_v27 }
 0x257   :  { %530 = vrot.lane.b32.xlu0 %v4359_v29, %s4152_s6 }
 0x258   :  { %v360_v31 = vpop.permute.xlu1 %359 }
 0x259   :  { %v362_v33 = vmul.f32 %v3903_v3, %v360_v31 }
 0x25b   :  { %v4363_v35 = vpack.c.bf16 %v362_v33, %v362_v33 }
 0x25d   :  { %459 = vrot.lane.b32.xlu1 %v4363_v35, %s4152_s6 }
 0x2c9   :  { %v531_v37 = vpop.permute.xlu0 %530 }
 0x2ca   :  { %3581 = vmatmul.mubr.msk.bf16.vlgmr.msra.gmra.mxu1 %vm294_vm2, %v531_v37 }
 0x2cb   :  { %3593 = vmatpush3.bf16.msra.mxu1 %v4255_v4  ;;  %3596 = vmatprep.mubr.msk.bf16.mxu1 %vm4149_vm1, %v4148_v5 }
 0x2cc   :  { %3594 = vmatprep.subr.bf16.mxu1 %v4148_v5 }
 0x2cf   :  { %v460_v39 = vpop.permute.xlu1 %459  ;;  %3595 = vmatpush3.bf16.msra.mxu1 %v4276_v8 }
 0x2d0   :  { %3573 = vmatmul.mubr.msk.bf16.vlgmr.msra.gmra.mxu0 %vm294_vm2, %v460_v39  ;;  %3608 = vmatprep.subr.bf16.mxu1 %v4148_v5 }
 0x2d1   :  { %3585 = vmatpush3.bf16.msra.mxu0 %v4269_v7  ;;  %3588 = vmatprep.mubr.msk.bf16.mxu0 %vm4149_vm1, %v4148_v5 }
 0x2d2   :  { %3586 = vmatprep.subr.bf16.mxu0 %v4148_v5 }
 0x2d5   :  { %3587 = vmatpush3.bf16.msra.mxu0 %v4283_v9 }
 0x2d6   :  { %3600 = vmatprep.subr.bf16.mxu0 %v4148_v5 }
 0x38a   :  { %v569_v40 = vpop.f32.mrf.mxu1 }
 0x38b   :  { %v575_v42 = vadd.f32 %v569_v40, %v4335_v32 }
 0x38c   :  { %v3582_v43 = vpop.f32.mrf.mxu1 }
 0x38d   :  { %3908 = vtanh.f32 %v575_v42  ;;  %v3276_v54 = vmul.f32 -1.442695, %v575_v42 }
 0x38e   :  { %v572_v46 = vpop.f32.mrf.mxu1 }
 0x390   :  { %v498_v45 = vpop.f32.mrf.mxu0  ;;  %v3583_v49 = vpop.f32.mrf.mxu1 }
 0x391   :  { %v504_v47 = vadd.f32 %v498_v45, %v4329_v26 }
 0x392   :  { %v3574_v48 = vpop.f32.mrf.mxu0 }
 0x393   :  { %3910 = vtanh.f32 %v504_v47  ;;  %v3274_v32 = vmul.f32 -1.442695, %v504_v47 }
 0x394   :  { %v501_v50 = vpop.f32.mrf.mxu0  ;;  %3912 = vpow2.f32 %v3276_v54 }
 0x395   :  { %3914 = vpow2.f32 %v3274_v32 }
 0x396   :  { %v3575_v51 = vpop.f32.mrf.mxu0 }
 0x39a   :  { %v3909_v52 = vpop.eup %3908 }
 0x39b   :  { %585 = vrot.lane.b32.xlu0 %v3909_v52, %s4151_s3 }
 0x3a0   :  { %v3911_v53 = vpop.eup %3910 }
 0x3a1   :  { %514 = vrot.lane.b32.xlu1 %v3911_v53, %s4151_s3  ;;  %v3913_v55 = vpop.eup %3912 }
 0x3a2   :  { %v579_v56 = vadd.f32 1.0, %v3913_v55  ;;  %v3915_v57 = vpop.eup %3914 }
 0x3a3   :  { %v508_v26 = vadd.f32 1.0, %v3915_v57 }
 0x3a4   :  { %3916 = vrcp.f32 %v579_v56 }
 0x3a5   :  { %3918 = vrcp.f32 %v508_v26 }
 0x3b1   :  { %v3917_v58 = vpop.eup %3916 }
 0x3b2   :  { %v3919_v61 = vpop.eup %3918  ;;  %v583_v0 = vmul.f32 %v3917_v58, %v4351_v14 }
 0x3b3   :  { %v512_v3 = vmul.f32 %v3919_v61, %v4354_v19 }
 0x40d   :  { %v586_v59 = vpop.permute.xlu0 %585 }
 0x40e   :  { %v588_v60 = vmul.f32 %v3917_v58, %v586_v59 }
 0x410   :  { %590 = vrot.lane.b32.xlu0 %v588_v60, %s4152_s6 }
 0x413   :  { %v515_v62 = vpop.permute.xlu1 %514 }
 0x414   :  { %v517_v63 = vmul.f32 %v3919_v61, %v515_v62 }
 0x416   :  { %519 = vrot.lane.b32.xlu1 %v517_v63, %s4152_s6 }
 0x482   :  { %v591_v1 = vpop.permute.xlu0 %590 }
 0x483   :  { %v4388_v2 = vadd.f32 %v591_v1, %v583_v0 }
 0x485   :  { %3920 = vtanh.f32 %v4388_v2 }
 0x488   :  { %v520_v6 = vpop.permute.xlu1 %519 }
 0x489   :  { %v4392_v10 = vadd.f32 %v520_v6, %v512_v3 }
 0x48b   :  { %3922 = vtanh.f32 %v4392_v10 }
 0x492   :  { %v3921_v12 = vpop.eup %3920 }
 0x493   :  { %596 = vrot.lane.b32.xlu0 %v3921_v12, %s4151_s3 }
 0x498   :  { %v3923_v13 = vpop.eup %3922 }
 0x499   :  { %525 = vrot.lane.b32.xlu1 %v3923_v13, %s4151_s3 }
 0x505   :  { %v597_v16 = vpop.permute.xlu0 %596 }
 0x506   :  { %v599_v14 = vmul.f32 %v3917_v58, %v597_v16 }
 0x508   :  { %v4397_v18 = vpack.c.bf16 %v599_v14, %v599_v14 }
 0x50a   :  { %688 = vrot.lane.b32.xlu0 %v4397_v18, %s4152_s6 }
 0x50b   :  { %v526_v21 = vpop.permute.xlu1 %525 }
 0x50c   :  { %v528_v23 = vmul.f32 %v3919_v61, %v526_v21 }
 0x50e   :  { %v4401_v19 = vpack.c.bf16 %v528_v23, %v528_v23 }
 0x510   :  { %617 = vrot.lane.b32.xlu1 %v4401_v19, %s4152_s6 }
 0x57c   :  { %v689_v25 = vpop.permute.xlu0 %688 }
 0x57d   :  { %3597 = vmatmul.mubr.msk.bf16.vlgmr.msra.gmra.mxu1 %vm294_vm2, %v689_v25 }
 0x57e   :  { %3609 = vmatpush3.bf16.msra.mxu1 %v4255_v4  ;;  %3612 = vmatprep.mubr.msk.bf16.mxu1 %vm4149_vm1, %v4148_v5 }
 0x57f   :  { %3610 = vmatprep.subr.bf16.mxu1 %v4148_v5 }
 0x582   :  { %v618_v27 = vpop.permute.xlu1 %617  ;;  %3611 = vmatpush3.bf16.msra.mxu1 %v4276_v8 }
 0x583   :  { %3589 = vmatmul.mubr.msk.bf16.vlgmr.msra.gmra.mxu0 %vm294_vm2, %v618_v27  ;;  %3624 = vmatprep.subr.bf16.mxu1 %v4148_v5 }
 0x584   :  { %3601 = vmatpush3.bf16.msra.mxu0 %v4269_v7  ;;  %3604 = vmatprep.mubr.msk.bf16.mxu0 %vm4149_vm1, %v4148_v5 }
 0x585   :  { %3602 = vmatprep.subr.bf16.mxu0 %v4148_v5 }
 0x588   :  { %3603 = vmatpush3.bf16.msra.mxu0 %v4283_v9 }
 0x589   :  { %3616 = vmatprep.subr.bf16.mxu0 %v4148_v5 }
 0x63d   :  { %v727_v31 = vpop.f32.mrf.mxu1 }
 0x63e   :  { %v733_v33 = vadd.f32 %v727_v31, %v4345_v44 }
 0x63f   :  { %v3598_v37 = vpop.f32.mrf.mxu1 }
 0x640   :  { %3924 = vtanh.f32 %v733_v33  ;;  %v3282_v50 = vmul.f32 -1.442695, %v733_v33 }
 0x641   :  { %v730_v40 = vpop.f32.mrf.mxu1 }
 0x643   :  { %v656_v39 = vpop.f32.mrf.mxu0  ;;  %v3599_v45 = vpop.f32.mrf.mxu1 }
 0x644   :  { %v662_v42 = vadd.f32 %v656_v39, %v4319_v15 }
 0x645   :  { %v3590_v43 = vpop.f32.mrf.mxu0 }
 0x646   :  { %3926 = vtanh.f32 %v662_v42  ;;  %v3280_v44 = vmul.f32 -1.442695, %v662_v42 }
 0x647   :  { %v659_v46 = vpop.f32.mrf.mxu0  ;;  %3928 = vpow2.f32 %v3282_v50 }
 0x648   :  { %3930 = vpow2.f32 %v3280_v44 }
 0x649   :  { %v3591_v47 = vpop.f32.mrf.mxu0 }
 0x64d   :  { %v3925_v48 = vpop.eup %3924 }
 0x64e   :  { %743 = vrot.lane.b32.xlu0 %v3925_v48, %s4151_s3 }
 0x653   :  { %v3927_v49 = vpop.eup %3926 }
 0x654   :  { %672 = vrot.lane.b32.xlu1 %v3927_v49, %s4151_s3  ;;  %v3929_v51 = vpop.eup %3928 }
 0x655   :  { %v737_v52 = vadd.f32 1.0, %v3929_v51  ;;  %v3931_v53 = vpop.eup %3930 }
 0x656   :  { %v666_v15 = vadd.f32 1.0, %v3931_v53 }
 0x657   :  { %3932 = vrcp.f32 %v737_v52 }
 0x658   :  { %3934 = vrcp.f32 %v666_v15 }
 0x664   :  { %v3933_v54 = vpop.eup %3932 }
 0x665   :  { %v3935_v56 = vpop.eup %3934  ;;  %v741_v58 = vmul.f32 %v3933_v54, %v4388_v2 }
 0x666   :  { %v670_v61 = vmul.f32 %v3935_v56, %v4392_v10 }
 0x6c0   :  { %v744_v32 = vpop.permute.xlu0 %743 }
 0x6c1   :  { %v746_v55 = vmul.f32 %v3933_v54, %v744_v32 }
 0x6c3   :  { %748 = vrot.lane.b32.xlu0 %v746_v55, %s4152_s6 }
 0x6c6   :  { %v673_v57 = vpop.permute.xlu1 %672 }
 0x6c7   :  { %v675_v26 = vmul.f32 %v3935_v56, %v673_v57 }
 0x6c9   :  { %677 = vrot.lane.b32.xlu1 %v675_v26, %s4152_s6 }
 0x735   :  { %v749_v59 = vpop.permute.xlu0 %748 }
 0x736   :  { %v4426_v60 = vadd.f32 %v749_v59, %v741_v58 }
 0x738   :  { %3936 = vtanh.f32 %v4426_v60 }
 0x73b   :  { %v678_v62 = vpop.permute.xlu1 %677 }
 0x73c   :  { %v4430_v63 = vadd.f32 %v678_v62, %v670_v61 }
 0x73e   :  { %3938 = vtanh.f32 %v4430_v63 }
 0x745   :  { %v3937_v0 = vpop.eup %3936 }
 0x746   :  { %754 = vrot.lane.b32.xlu0 %v3937_v0, %s4151_s3 }
 0x74b   :  { %v3939_v1 = vpop.eup %3938 }
 0x74c   :  { %683 = vrot.lane.b32.xlu1 %v3939_v1, %s4151_s3 }
 0x7b8   :  { %v755_v3 = vpop.permute.xlu0 %754 }
 0x7b9   :  { %v757_v2 = vmul.f32 %v3933_v54, %v755_v3 }
 0x7bb   :  { %v4435_v6 = vpack.c.bf16 %v757_v2, %v757_v2 }
 0x7bd   :  { %846 = vrot.lane.b32.xlu0 %v4435_v6, %s4152_s6 }
 0x7be   :  { %v684_v12 = vpop.permute.xlu1 %683 }
 0x7bf   :  { %v686_v13 = vmul.f32 %v3935_v56, %v684_v12 }
 0x7c1   :  { %v4439_v10 = vpack.c.bf16 %v686_v13, %v686_v13 }
 0x7c3   :  { %775 = vrot.lane.b32.xlu1 %v4439_v10, %s4152_s6 }
 0x82f   :  { %v847_v16 = vpop.permute.xlu0 %846 }
 0x830   :  { %3613 = vmatmul.mubr.msk.bf16.vlgmr.msra.gmra.mxu1 %vm294_vm2, %v847_v16 }
 0x831   :  { %3625 = vmatpush3.bf16.msra.mxu1 %v4255_v4  ;;  %3628 = vmatprep.mubr.msk.bf16.mxu1 %vm4149_vm1, %v4148_v5 }
 0x832   :  { %3626 = vmatprep.subr.bf16.mxu1 %v4148_v5 }
 0x835   :  { %v776_v14 = vpop.permute.xlu1 %775  ;;  %3627 = vmatpush3.bf16.msra.mxu1 %v4276_v8 }
 0x836   :  { %3605 = vmatmul.mubr.msk.bf16.vlgmr.msra.gmra.mxu0 %vm294_vm2, %v776_v14  ;;  %3640 = vmatprep.subr.bf16.mxu1 %v4148_v5 }
 0x837   :  { %3617 = vmatpush3.bf16.msra.mxu0 %v4269_v7  ;;  %3620 = vmatprep.mubr.msk.bf16.mxu0 %vm4149_vm1, %v4148_v5 }
 0x838   :  { %3618 = vmatprep.subr.bf16.mxu0 %v4148_v5 }
 0x83b   :  { %3619 = vmatpush3.bf16.msra.mxu0 %v4283_v9 }
 0x83c   :  { %3632 = vmatprep.subr.bf16.mxu0 %v4148_v5 }
 0x8f0   :  { %v885_v21 = vpop.f32.mrf.mxu1 }
 0x8f1   :  { %v891_v23 = vadd.f32 %v885_v21, %v4339_v36 }
 0x8f2   :  { %v3614_v25 = vpop.f32.mrf.mxu1 }
 0x8f3   :  { %3940 = vtanh.f32 %v891_v23  ;;  %v3288_v46 = vmul.f32 -1.442695, %v891_v23 }
 0x8f4   :  { %v888_v31 = vpop.f32.mrf.mxu1 }
 0x8f6   :  { %v814_v27 = vpop.f32.mrf.mxu0  ;;  %v3615_v39 = vpop.f32.mrf.mxu1 }
 0x8f7   :  { %v820_v33 = vadd.f32 %v814_v27, %v4325_v22 }
 0x8f8   :  { %v3606_v37 = vpop.f32.mrf.mxu0 }
 0x8f9   :  { %3942 = vtanh.f32 %v820_v33  ;;  %v3286_v36 = vmul.f32 -1.442695, %v820_v33 }
 0x8fa   :  { %v817_v40 = vpop.f32.mrf.mxu0  ;;  %3944 = vpow2.f32 %v3288_v46 }
 0x8fb   :  { %3946 = vpow2.f32 %v3286_v36 }
 0x8fc   :  { %v3607_v42 = vpop.f32.mrf.mxu0 }
 0x900   :  { %v3941_v43 = vpop.eup %3940 }
 0x901   :  { %901 = vrot.lane.b32.xlu0 %v3941_v43, %s4151_s3 }
 0x906   :  { %v3943_v45 = vpop.eup %3942 }
 0x907   :  { %830 = vrot.lane.b32.xlu1 %v3943_v45, %s4151_s3  ;;  %v3945_v47 = vpop.eup %3944 }
 0x908   :  { %v895_v48 = vadd.f32 1.0, %v3945_v47  ;;  %v3947_v49 = vpop.eup %3946 }
 0x909   :  { %v824_v22 = vadd.f32 1.0, %v3947_v49 }
 0x90a   :  { %3948 = vrcp.f32 %v895_v48 }
 0x90b   :  { %3950 = vrcp.f32 %v824_v22 }
 0x917   :  { %v3949_v50 = vpop.eup %3948 }
 0x918   :  { %v3951_v52 = vpop.eup %3950  ;;  %v899_v54 = vmul.f32 %v3949_v50, %v4426_v60 }
 0x919   :  { %v828_v56 = vmul.f32 %v3951_v52, %v4430_v63 }
 0x973   :  { %v902_v44 = vpop.permute.xlu0 %901 }
 0x974   :  { %v904_v51 = vmul.f32 %v3949_v50, %v902_v44 }
 0x976   :  { %906 = vrot.lane.b32.xlu0 %v904_v51, %s4152_s6 }
 0x979   :  { %v831_v53 = vpop.permute.xlu1 %830 }
 0x97a   :  { %v833_v15 = vmul.f32 %v3951_v52, %v831_v53 }
 0x97c   :  { %835 = vrot.lane.b32.xlu1 %v833_v15, %s4152_s6 }
 0x9e8   :  { %v907_v32 = vpop.permute.xlu0 %906 }
 0x9e9   :  { %v4464_v55 = vadd.f32 %v907_v32, %v899_v54 }
 0x9eb   :  { %3952 = vtanh.f32 %v4464_v55 }
 0x9ee   :  { %v836_v57 = vpop.permute.xlu1 %835 }
 0x9ef   :  { %v4468_v26 = vadd.f32 %v836_v57, %v828_v56 }
 0x9f1   :  { %3954 = vtanh.f32 %v4468_v26 }
 0x9f8   :  { %v3953_v58 = vpop.eup %3952 }
 0x9f9   :  { %912 = vrot.lane.b32.xlu0 %v3953_v58, %s4151_s3 }
 0x9fe   :  { %v3955_v59 = vpop.eup %3954 }
 0x9ff   :  { %841 = vrot.lane.b32.xlu1 %v3955_v59, %s4151_s3 }
 0xa6b   :  { %v913_v61 = vpop.permute.xlu0 %912 }
 0xa6c   :  { %v915_v60 = vmul.f32 %v3949_v50, %v913_v61 }
 0xa6e   :  { %v4473_v62 = vpack.c.bf16 %v915_v60, %v915_v60 }
 0xa70   :  { %1004 = vrot.lane.b32.xlu0 %v4473_v62, %s4152_s6 }
 0xa71   :  { %v842_v0 = vpop.permute.xlu1 %841 }
 0xa72   :  { %v844_v1 = vmul.f32 %v3951_v52, %v842_v0 }
 0xa74   :  { %v4477_v63 = vpack.c.bf16 %v844_v1, %v844_v1 }
 0xa76   :  { %933 = vrot.lane.b32.xlu1 %v4477_v63, %s4152_s6 }
 0xae2   :  { %v1005_v3 = vpop.permute.xlu0 %1004 }
 0xae3   :  { %3629 = vmatmul.mubr.msk.bf16.vlgmr.msra.gmra.mxu1 %vm294_vm2, %v1005_v3 }
 0xae4   :  { %3641 = vmatpush3.bf16.msra.mxu1 %v4255_v4  ;;  %3644 = vmatprep.mubr.msk.bf16.mxu1 %vm4149_vm1, %v4148_v5 }
 0xae5   :  { %3642 = vmatprep.subr.bf16.mxu1 %v4148_v5 }
 0xae8   :  { %v934_v2 = vpop.permute.xlu1 %933  ;;  %3643 = vmatpush3.bf16.msra.mxu1 %v4276_v8 }
 0xae9   :  { %3621 = vmatmul.mubr.msk.bf16.vlgmr.msra.gmra.mxu0 %vm294_vm2, %v934_v2  ;;  %3656 = vmatprep.subr.bf16.mxu1 %v4148_v5 }
 0xaea   :  { %3633 = vmatpush3.bf16.msra.mxu0 %v4269_v7  ;;  %3636 = vmatprep.mubr.msk.bf16.mxu0 %vm4149_vm1, %v4148_v5 }
 0xaeb   :  { %3634 = vmatprep.subr.bf16.mxu0 %v4148_v5 }
 0xaee   :  { %3635 = vmatpush3.bf16.msra.mxu0 %v4283_v9 }
 0xaef   :  { %3648 = vmatprep.subr.bf16.mxu0 %v4148_v5 }
 0xba3   :  { %v1043_v12 = vpop.f32.mrf.mxu1 }
 0xba4   :  { %v1049_v13 = vadd.f32 %v1043_v12, %v4327_v24 }
 0xba5   :  { %v3630_v16 = vpop.f32.mrf.mxu1 }
 0xba6   :  { %3956 = vtanh.f32 %v1049_v13  ;;  %v3294_v40 = vmul.f32 -1.442695, %v1049_v13 }
 0xba7   :  { %v1046_v21 = vpop.f32.mrf.mxu1 }
 0xba9   :  { %v972_v14 = vpop.f32.mrf.mxu0  ;;  %v3631_v27 = vpop.f32.mrf.mxu1 }
 0xbaa   :  { %v978_v23 = vadd.f32 %v972_v14, %v4337_v34 }
 0xbab   :  { %v3622_v25 = vpop.f32.mrf.mxu0 }
 0xbac   :  { %3958 = vtanh.f32 %v978_v23  ;;  %v3292_v24 = vmul.f32 -1.442695, %v978_v23 }
 0xbad   :  { %v975_v31 = vpop.f32.mrf.mxu0  ;;  %3960 = vpow2.f32 %v3294_v40 }
 0xbae   :  { %3962 = vpow2.f32 %v3292_v24 }
 0xbaf   :  { %v3623_v33 = vpop.f32.mrf.mxu0 }
 0xbb3   :  { %v3957_v37 = vpop.eup %3956 }
 0xbb4   :  { %1059 = vrot.lane.b32.xlu0 %v3957_v37, %s4151_s3 }
 0xbb9   :  { %v3959_v39 = vpop.eup %3958 }
 0xbba   :  { %988 = vrot.lane.b32.xlu1 %v3959_v39, %s4151_s3  ;;  %v3961_v42 = vpop.eup %3960 }
 0xbbb   :  { %v1053_v43 = vadd.f32 1.0, %v3961_v42  ;;  %v3963_v45 = vpop.eup %3962 }
 0xbbc   :  { %v982_v34 = vadd.f32 1.0, %v3963_v45 }
 0xbbd   :  { %3964 = vrcp.f32 %v1053_v43 }
 0xbbe   :  { %3966 = vrcp.f32 %v982_v34 }
 0xbca   :  { %v3965_v46 = vpop.eup %3964 }
 0xbcb   :  { %v3967_v48 = vpop.eup %3966  ;;  %v1057_v50 = vmul.f32 %v3965_v46, %v4464_v55 }
 0xbcc   :  { %v986_v52 = vmul.f32 %v3967_v48, %v4468_v26 }
 0xc26   :  { %v1060_v36 = vpop.permute.xlu0 %1059 }
 0xc27   :  { %v1062_v47 = vmul.f32 %v3965_v46, %v1060_v36 }
 0xc29   :  { %1064 = vrot.lane.b32.xlu0 %v1062_v47, %s4152_s6 }
 0xc2c   :  { %v989_v49 = vpop.permute.xlu1 %988 }
 0xc2d   :  { %v991_v22 = vmul.f32 %v3967_v48, %v989_v49 }
 0xc2f   :  { %993 = vrot.lane.b32.xlu1 %v991_v22, %s4152_s6 }
 0xc9b   :  { %v1065_v44 = vpop.permute.xlu0 %1064 }
 0xc9c   :  { %v4502_v51 = vadd.f32 %v1065_v44, %v1057_v50 }
 0xc9e   :  { %3968 = vtanh.f32 %v4502_v51 }
 0xca1   :  { %v994_v53 = vpop.permute.xlu1 %993 }
 0xca2   :  { %v4506_v15 = vadd.f32 %v994_v53, %v986_v52 }
 0xca4   :  { %3970 = vtanh.f32 %v4506_v15 }
 0xcab   :  { %v3969_v54 = vpop.eup %3968 }
 0xcac   :  { %1070 = vrot.lane.b32.xlu0 %v3969_v54, %s4151_s3 }
 0xcb1   :  { %v3971_v32 = vpop.eup %3970 }
 0xcb2   :  { %999 = vrot.lane.b32.xlu1 %v3971_v32, %s4151_s3 }
 0xd1e   :  { %v1071_v56 = vpop.permute.xlu0 %1070 }
 0xd1f   :  { %v1073_v55 = vmul.f32 %v3965_v46, %v1071_v56 }
 0xd21   :  { %v4511_v57 = vpack.c.bf16 %v1073_v55, %v1073_v55 }
 0xd23   :  { %1162 = vrot.lane.b32.xlu0 %v4511_v57, %s4152_s6 }
 0xd24   :  { %v1000_v58 = vpop.permute.xlu1 %999 }
 0xd25   :  { %v1002_v59 = vmul.f32 %v3967_v48, %v1000_v58 }
 0xd27   :  { %v4515_v26 = vpack.c.bf16 %v1002_v59, %v1002_v59 }
 0xd29   :  { %1091 = vrot.lane.b32.xlu1 %v4515_v26, %s4152_s6 }
 0xd95   :  { %v1163_v61 = vpop.permute.xlu0 %1162 }
 0xd96   :  { %3645 = vmatmul.mubr.msk.bf16.vlgmr.msra.gmra.mxu1 %vm294_vm2, %v1163_v61 }
 0xd97   :  { %3657 = vmatpush3.bf16.msra.mxu1 %v4255_v4  ;;  %3660 = vmatprep.mubr.msk.bf16.mxu1 %vm4149_vm1, %v4148_v5 }
 0xd98   :  { %3658 = vmatprep.subr.bf16.mxu1 %v4148_v5 }
 0xd9b   :  { %v1092_v60 = vpop.permute.xlu1 %1091  ;;  %3659 = vmatpush3.bf16.msra.mxu1 %v4276_v8 }
 0xd9c   :  { %3637 = vmatmul.mubr.msk.bf16.vlgmr.msra.gmra.mxu0 %vm294_vm2, %v1092_v60  ;;  %3672 = vmatprep.subr.bf16.mxu1 %v4148_v5 }
 0xd9d   :  { %3649 = vmatpush3.bf16.msra.mxu0 %v4269_v7  ;;  %3652 = vmatprep.mubr.msk.bf16.mxu0 %vm4149_vm1, %v4148_v5 }
 0xd9e   :  { %3650 = vmatprep.subr.bf16.mxu0 %v4148_v5 }
 0xda1   :  { %3651 = vmatpush3.bf16.msra.mxu0 %v4283_v9 }
 0xda2   :  { %3664 = vmatprep.subr.bf16.mxu0 %v4148_v5 }
 0xe56   :  { %v1201_v0 = vpop.f32.mrf.mxu1 }
 0xe57   :  { %v1207_v1 = vadd.f32 %v1201_v0, %v4321_v17 }
 0xe58   :  { %v3646_v3 = vpop.f32.mrf.mxu1 }
 0xe59   :  { %3972 = vtanh.f32 %v1207_v1  ;;  %v3300_v31 = vmul.f32 -1.442695, %v1207_v1 }
 0xe5a   :  { %v1204_v12 = vpop.f32.mrf.mxu1 }
 0xe5c   :  { %v1130_v2 = vpop.f32.mrf.mxu0  ;;  %v3647_v14 = vpop.f32.mrf.mxu1 }
 0xe5d   :  { %v1136_v13 = vadd.f32 %v1130_v2, %v4343_v41 }
 0xe5e   :  { %v3638_v16 = vpop.f32.mrf.mxu0 }
 0xe5f   :  { %3974 = vtanh.f32 %v1136_v13  ;;  %v3298_v17 = vmul.f32 -1.442695, %v1136_v13 }
 0xe60   :  { %v1133_v21 = vpop.f32.mrf.mxu0  ;;  %3976 = vpow2.f32 %v3300_v31 }
 0xe61   :  { %3978 = vpow2.f32 %v3298_v17 }
 0xe62   :  { %v3639_v23 = vpop.f32.mrf.mxu0 }
 0xe66   :  { %v3973_v25 = vpop.eup %3972 }
 0xe67   :  { %1217 = vrot.lane.b32.xlu0 %v3973_v25, %s4151_s3 }
 0xe6c   :  { %v3975_v27 = vpop.eup %3974 }
 0xe6d   :  { %1146 = vrot.lane.b32.xlu1 %v3975_v27, %s4151_s3  ;;  %v3977_v33 = vpop.eup %3976 }
 0xe6e   :  { %v1211_v37 = vadd.f32 1.0, %v3977_v33  ;;  %v3979_v39 = vpop.eup %3978 }
 0xe6f   :  { %v1140_v41 = vadd.f32 1.0, %v3979_v39 }
 0xe70   :  { %3980 = vrcp.f32 %v1211_v37 }
 0xe71   :  { %3982 = vrcp.f32 %v1140_v41 }
 0xe7d   :  { %v3981_v40 = vpop.eup %3980 }
 0xe7e   :  { %v3983_v43 = vpop.eup %3982  ;;  %v1215_v46 = vmul.f32 %v3981_v40, %v4502_v51 }
 0xe7f   :  { %v1144_v48 = vmul.f32 %v3983_v43, %v4506_v15 }
 0xed9   :  { %v1218_v24 = vpop.permute.xlu0 %1217 }
 0xeda   :  { %v1220_v42 = vmul.f32 %v3981_v40, %v1218_v24 }
 0xedc   :  { %1222 = vrot.lane.b32.xlu0 %v1220_v42, %s4152_s6 }
 0xedf   :  { %v1147_v45 = vpop.permute.xlu1 %1146 }
 0xee0   :  { %v1149_v34 = vmul.f32 %v3983_v43, %v1147_v45 }
 0xee2   :  { %1151 = vrot.lane.b32.xlu1 %v1149_v34, %s4152_s6 }
 0xf4e   :  { %v1223_v36 = vpop.permute.xlu0 %1222 }
 0xf4f   :  { %v4540_v47 = vadd.f32 %v1223_v36, %v1215_v46 }
 0xf51   :  { %3984 = vtanh.f32 %v4540_v47 }
 0xf54   :  { %v1152_v49 = vpop.permute.xlu1 %1151 }
 0xf55   :  { %v4544_v22 = vadd.f32 %v1152_v49, %v1144_v48 }
 0xf57   :  { %3986 = vtanh.f32 %v4544_v22 }
 0xf5e   :  { %v3985_v50 = vpop.eup %3984 }
 0xf5f   :  { %1228 = vrot.lane.b32.xlu0 %v3985_v50, %s4151_s3 }
 0xf64   :  { %v3987_v44 = vpop.eup %3986 }
 0xf65   :  { %1157 = vrot.lane.b32.xlu1 %v3987_v44, %s4151_s3 }
 0xfd1   :  { %v1229_v52 = vpop.permute.xlu0 %1228 }
 0xfd2   :  { %v1231_v51 = vmul.f32 %v3981_v40, %v1229_v52 }
 0xfd4   :  { %v4549_v53 = vpack.c.bf16 %v1231_v51, %v1231_v51 }
 0xfd6   :  { %1320 = vrot.lane.b32.xlu0 %v4549_v53, %s4152_s6 }
 0xfd7   :  { %v1158_v54 = vpop.permute.xlu1 %1157 }
 0xfd8   :  { %v1160_v32 = vmul.f32 %v3983_v43, %v1158_v54 }
 0xfda   :  { %v4553_v15 = vpack.c.bf16 %v1160_v32, %v1160_v32 }
 0xfdc   :  { %1249 = vrot.lane.b32.xlu1 %v4553_v15, %s4152_s6 }
0x1048   :  { %v1321_v56 = vpop.permute.xlu0 %1320 }
0x1049   :  { %3661 = vmatmul.mubr.msk.bf16.vlgmr.msra.gmra.mxu1 %vm294_vm2, %v1321_v56 }
0x104a   :  { %3673 = vmatpush3.bf16.msra.mxu1 %v4255_v4  ;;  %3676 = vmatprep.mubr.msk.bf16.mxu1 %vm4149_vm1, %v4148_v5 }
0x104b   :  { %3674 = vmatprep.subr.bf16.mxu1 %v4148_v5 }
0x104e   :  { %v1250_v55 = vpop.permute.xlu1 %1249  ;;  %3675 = vmatpush3.bf16.msra.mxu1 %v4276_v8 }
0x104f   :  { %3653 = vmatmul.mubr.msk.bf16.vlgmr.msra.gmra.mxu0 %vm294_vm2, %v1250_v55 }
0x1050   :  { %3665 = vmatpush3.bf16.msra.mxu0 %v4269_v7  ;;  %3668 = vmatprep.mubr.msk.bf16.mxu0 %vm4149_vm1, %v4148_v5 }
0x1051   :  { %3666 = vmatprep.subr.bf16.mxu0 %v4148_v5 }
0x1054   :  { %3667 = vmatpush3.bf16.msra.mxu0 %v4283_v9 }
0x1109   :  { %v1359_v4 = vpop.f32.mrf.mxu1 }
0x110a   :  { %v1365_v58 = vadd.f32 %v1359_v4, %v4331_v28 }
0x110b   :  { %v3662_v59 = vpop.f32.mrf.mxu1 }
0x110c   :  { %3988 = vtanh.f32 %v1365_v58  ;;  %v3306_v9 = vmul.f32 -1.442695, %v1365_v58 }
0x110d   :  { %v1362_v60 = vpop.f32.mrf.mxu1 }
0x110f   :  { %v1288_v61 = vpop.f32.mrf.mxu0  ;;  %v3663_v7 = vpop.f32.mrf.mxu1 }
0x1110   :  { %v1294_v0 = vadd.f32 %v1288_v61, %v4333_v30 }
0x1111   :  { %v3654_v1 = vpop.f32.mrf.mxu0 }
0x1112   :  { %3990 = vtanh.f32 %v1294_v0  ;;  %v3304_v28 = vmul.f32 -1.442695, %v1294_v0 }
0x1113   :  { %v1291_v8 = vpop.f32.mrf.mxu0  ;;  %3992 = vpow2.f32 %v3306_v9 }
0x1114   :  { %3994 = vpow2.f32 %v3304_v28 }
0x1115   :  { %v3655_v3 = vpop.f32.mrf.mxu0 }
0x1119   :  { %v3989_v2 = vpop.eup %3988 }
0x111a   :  { %1375 = vrot.lane.b32.xlu0 %v3989_v2, %s4151_s3 }
0x111f   :  { %v3991_v12 = vpop.eup %3990 }
0x1120   :  { %1304 = vrot.lane.b32.xlu1 %v3991_v12, %s4151_s3  ;;  %v3993_v13 = vpop.eup %3992 }
0x1121   :  { %v1369_v16 = vadd.f32 1.0, %v3993_v13  ;;  %v3995_v14 = vpop.eup %3994 }
0x1122   :  { %v1298_v30 = vadd.f32 1.0, %v3995_v14 }
0x1123   :  { %3996 = vrcp.f32 %v1369_v16 }
0x1124   :  { %3998 = vrcp.f32 %v1298_v30 }
0x1130   :  { %v3997_v21 = vpop.eup %3996 }
0x1131   :  { %v3999_v27 = vpop.eup %3998  ;;  %v1373_v33 = vmul.f32 %v3997_v21, %v4540_v47 }
0x1132   :  { %v1302_v41 = vmul.f32 %v3999_v27, %v4544_v22 }
0x118c   :  { %v1376_v23 = vpop.permute.xlu0 %1375 }
0x118d   :  { %v1378_v25 = vmul.f32 %v3997_v21, %v1376_v23 }
0x118f   :  { %1380 = vrot.lane.b32.xlu0 %v1378_v25, %s4152_s6  ;;  %v3872_v25 = vld [vmem:[%s4996_s7 + $0x8] sm:$0xff]  }
0x1190   :  { %3692 = vmatprep.subr.bf16.mxu1 %v3872_v25 }
0x1192   :  { %v1305_v31 = vpop.permute.xlu1 %1304 }
0x1193   :  { %v1307_v17 = vmul.f32 %v3999_v27, %v1305_v31  ;;  %v3873_v31 = vld [vmem:[%s4996_s7] sm:$0xff]  }
0x1195   :  { %1309 = vrot.lane.b32.xlu1 %v1307_v17, %s4152_s6 }
0x1201   :  { %v1381_v37 = vpop.permute.xlu0 %1380 }
0x1202   :  { %v1383_v39 = vadd.f32 %v1381_v37, %v1373_v33 }
0x1204   :  { %4000 = vtanh.f32 %v1383_v39 }
0x1207   :  { %v1310_v40 = vpop.permute.xlu1 %1309 }
0x1208   :  { %v1312_v24 = vadd.f32 %v1310_v40, %v1302_v41 }
0x120a   :  { %4002 = vtanh.f32 %v1312_v24 }
0x1211   :  { %v4001_v42 = vpop.eup %4000 }
0x1212   :  { %1386 = vrot.lane.b32.xlu0 %v4001_v42, %s4151_s3 }
0x1217   :  { %v4003_v43 = vpop.eup %4002 }
0x1218   :  { %1315 = vrot.lane.b32.xlu1 %v4003_v43, %s4151_s3 }
0x1284   :  { %v1387_v45 = vpop.permute.xlu0 %1386 }
0x1285   :  { %v1389_v34 = vmul.f32 %v3997_v21, %v1387_v45 }
0x1287   :  { %v4579_v46 = vpack.c.bf16 %v1389_v34, %v1389_v34 }
0x1289   :  { %1478 = vrot.lane.b32.xlu0 %v4579_v46, %s4152_s6 }
0x128a   :  { %v1316_v36 = vpop.permute.xlu1 %1315 }
0x128b   :  { %v1318_v47 = vmul.f32 %v3999_v27, %v1316_v36 }
0x128d   :  { %v4583_v48 = vpack.c.bf16 %v1318_v47, %v1318_v47 }
0x128f   :  { %1407 = vrot.lane.b32.xlu1 %v4583_v48, %s4152_s6 }
0x12fb   :  { %v1479_v49 = vpop.permute.xlu0 %1478 }
0x12fc   :  { %3677 = vmatmul.mubr.msk.bf16.vlgmr.msra.gmra.mxu1 %vm294_vm2, %v1479_v49 }
0x12fd   :  { %3693 = vmatpush3.bf16.msra.mxu1 %v3872_v25 }
0x12fe   :  { %3694 = vmatprep.subr.bf16.mxu1 %v3873_v31 }
0x1301   :  { %v1408_v22 = vpop.permute.xlu1 %1407  ;;  %3695 = vmatpush3.bf16.msra.mxu1 %v3873_v31 }
0x1302   :  { %3669 = vmatmul.mubr.msk.bf16.vlgmr.msra.gmra.mxu0 %vm294_vm2, %v1408_v22 }
0x13bc   :  { %v1517_v50 = vpop.f32.mrf.mxu1 }
0x13bd   :  { %v1523_v44 = vadd.f32 %v1517_v50, %v4323_v20 }
0x13be   :  { %v3678_v52 = vpop.f32.mrf.mxu1 }
0x13bf   :  { %4004 = vtanh.f32 %v1523_v44  ;;  %v3312_v60 = vmul.f32 -1.442695, %v1523_v44  ;;  %v3886_v52 = vld [vmem:[%s4997_s10 + $0x10] sm:$0xff]  }
0x13c0   :  { %v1520_v54 = vpop.f32.mrf.mxu1 }
0x13c2   :  { %v1446_v51 = vpop.f32.mrf.mxu0  ;;  %v3679_v55 = vpop.f32.mrf.mxu1 }
0x13c3   :  { %v1452_v32 = vadd.f32 %v1446_v51, %v4341_v38 }
0x13c4   :  { %v3670_v56 = vpop.f32.mrf.mxu0 }
0x13c5   :  { %4006 = vtanh.f32 %v1452_v32  ;;  %v3310_v20 = vmul.f32 -1.442695, %v1452_v32 }
0x13c6   :  { %v1449_v4 = vpop.f32.mrf.mxu0  ;;  %4008 = vpow2.f32 %v3312_v60 }
0x13c7   :  { %4010 = vpow2.f32 %v3310_v20  ;;  %v4682_v4 = vld [vmem:[%s4998_s8 + $0x8] sm:$0xff]  }
0x13c8   :  { %v3671_v58 = vpop.f32.mrf.mxu0 }
0x13c9   :  { %v4688_v58 = vld [vmem:[%s4999_s11 + $0x8] sm:$0xff]  }
0x13cc   :  { %v4005_v59 = vpop.eup %4004 }
0x13cd   :  { %1533 = vrot.lane.b32.xlu0 %v4005_v59, %s4151_s3  ;;  %v4695_v59 = vld [vmem:[%s4998_s8] sm:$0xff]  }
0x13d2   :  { %v4007_v61 = vpop.eup %4006 }
0x13d3   :  { %1462 = vrot.lane.b32.xlu1 %v4007_v61, %s4151_s3  ;;  %v4009_v0 = vpop.eup %4008  ;;  %v4704_v61 = vld [vmem:[%s4999_s11] sm:$0xff]  }
0x13d4   :  { %v1527_v1 = vadd.f32 1.0, %v4009_v0  ;;  %v4011_v7 = vpop.eup %4010 }
0x13d5   :  { %v1456_v38 = vadd.f32 1.0, %v4011_v7 }
0x13d6   :  { %4012 = vrcp.f32 %v1527_v1 }
0x13d7   :  { %4014 = vrcp.f32 %v1456_v38 }
0x13e3   :  { %v4013_v8 = vpop.eup %4012 }
0x13e4   :  { %v4015_v12 = vpop.eup %4014  ;;  %v1531_v13 = vmul.f32 %v4013_v8, %v1383_v39 }
0x13e5   :  { %v1460_v30 = vmul.f32 %v4015_v12, %v1312_v24 }
0x143f   :  { %v1534_v3 = vpop.permute.xlu0 %1533 }
0x1440   :  { %v1536_v2 = vmul.f32 %v4013_v8, %v1534_v3 }
0x1442   :  { %1538 = vrot.lane.b32.xlu0 %v1536_v2, %s4152_s6 }
0x1445   :  { %v1463_v9 = vpop.permute.xlu1 %1462 }
0x1446   :  { %v1465_v28 = vmul.f32 %v4015_v12, %v1463_v9 }
0x1448   :  { %1467 = vrot.lane.b32.xlu1 %v1465_v28, %s4152_s6 }
0x14b4   :  { %v1539_v16 = vpop.permute.xlu0 %1538 }
0x14b5   :  { %v1541_v14 = vadd.f32 %v1539_v16, %v1531_v13 }
0x14b7   :  { %4016 = vtanh.f32 %v1541_v14 }
0x14ba   :  { %v1468_v21 = vpop.permute.xlu1 %1467 }
0x14bb   :  { %v1470_v23 = vadd.f32 %v1468_v21, %v1460_v30 }
0x14bd   :  { %4018 = vtanh.f32 %v1470_v23 }
0x14c4   :  { %v4017_v27 = vpop.eup %4016 }
0x14c5   :  { %1544 = vrot.lane.b32.xlu0 %v4017_v27, %s4151_s3 }
0x14c9   :  { %445 = vrot.lane.b32.xlu0 %v4363_v35, %s4152_s6  ;;  %v3876_v35 = vld [vmem:[%s4996_s7 + $0x18] sm:$0xff]  }
0x14ca   :  { %v4019_v17 = vpop.eup %4018  ;;  %3680 = vmatprep.subr.bf16.mxu0 %v3876_v35 }
0x14cb   :  { %1473 = vrot.lane.b32.xlu1 %v4019_v17, %s4151_s3  ;;  %3681 = vmatpush3.bf16.msra.mxu0 %v3876_v35 }
0x14cd   :  { %1402 = vrot.lane.b32.xlu0 %v4579_v46, %s4152_s6 }
0x14cf   :  { %604 = vrot.lane.b32.xlu1 %v4401_v19, %s4152_s6  ;;  %v3877_v19 = vld [vmem:[%s4996_s7 + $0x10] sm:$0xff]  }
0x14d0   :  { %3682 = vmatprep.subr.bf16.mxu0 %v3877_v19 }
0x14d1   :  { %762 = vrot.lane.b32.xlu0 %v4439_v10, %s4152_s6  ;;  %3683 = vmatpush3.bf16.msra.mxu0 %v3877_v19 }
0x14d3   :  { %920 = vrot.lane.b32.xlu1 %v4477_v63, %s4152_s6 }
0x14d5   :  { %1086 = vrot.lane.b32.xlu0 %v4511_v57, %s4152_s6  ;;  %v3882_v57 = vld [vmem:[%s4997_s10 + $0x18] sm:$0xff]  }
0x14d6   :  { %3704 = vmatprep.subr.bf16.mxu0 %v3882_v57 }
0x14d7   :  { %1244 = vrot.lane.b32.xlu1 %v4549_v53, %s4152_s6 }
0x14d9   :  { %770 = vrot.lane.b32.xlu0 %v4435_v6, %s4152_s6 }
0x14db   :  { %928 = vrot.lane.b32.xlu1 %v4473_v62, %s4152_s6 }
0x14dd   :  { %1078 = vrot.lane.b32.xlu0 %v4515_v26, %s4152_s6  ;;  %v3883_v26 = vld [vmem:[%s4997_s10 + $0x8] sm:$0xff]  }
0x14de   :  { %3716 = vmatprep.subr.bf16.mxu1 %v3883_v26 }
0x14e1   :  { %454 = vrot.lane.b32.xlu0 %v4359_v29, %s4152_s6 }
0x14e5   :  { %1394 = vrot.lane.b32.xlu0 %v4583_v48, %s4152_s6 }
0x1537   :  { %v1545_v6 = vpop.permute.xlu0 %1544 }
0x1538   :  { %v1547_v10 = vmul.f32 %v4013_v8, %v1545_v6 }
0x153a   :  { %v3401_v62 = vpack.c.bf16 %v1547_v10, %v1547_v10 }
0x153b   :  { %v446_v29 = vpop.permute.xlu0 %445 }
0x153c   :  { %449 = vst.msk [vmem:[#allocation4] sm:$0xf] %vm448_vm3, %v446_v29  ;;  %1560 = vrot.lane.b32.xlu1 %v3401_v62, %s4152_s6 }
0x153d   :  { %v1474_v63 = vpop.permute.xlu1 %1473 }
0x153e   :  { %v1476_v37 = vmul.f32 %v4015_v12, %v1474_v63 }
0x153f   :  { %v1403_v53 = vpop.permute.xlu0 %1402 }
0x1540   :  { %1405 = vst.msk [vmem:[#allocation5 + $0x4] sm:$0xf] %vm448_vm3, %v1403_v53  ;;  %1236 = vrot.lane.b32.xlu1 %v4553_v15, %s4152_s6  ;;  %v3400_v40 = vpack.c.bf16 %v1476_v37, %v1476_v37  ;;  %v3887_v15 = vld [vmem:[%s4997_s10] sm:$0xff]  }
0x1541   :  { %v605_v33 = vpop.permute.xlu1 %604 }
0x1542   :  { %607 = vst.msk [vmem:[#allocation4 + $0x4] sm:$0xf] %vm448_vm3, %v605_v33  ;;  %v3348_v33 = vld [vmem:[%s5001_s12] ss:$0 sm:$0xff] }
0x1543   :  { %v763_v39 = vpop.permute.xlu0 %762 }
0x1544   :  { %765 = vst.msk [vmem:[#allocation4 + $0x8] sm:$0xf] %vm448_vm3, %v763_v39  ;;  %612 = vrot.lane.b32.xlu1 %v4397_v18, %s4152_s6 }
0x1545   :  { %v921_v41 = vpop.permute.xlu1 %920 }
0x1546   :  { %923 = vst.msk [vmem:[#allocation4 + $0xc] sm:$0xf] %vm448_vm3, %v921_v41 }
0x1547   :  { %v1087_v24 = vpop.permute.xlu0 %1086 }
0x1548   :  { %1089 = vst.msk [vmem:[#allocation5 + $0xc] sm:$0xf] %vm448_vm3, %v1087_v24  ;;  %1552 = vrot.lane.b32.xlu1 %v3400_v40, %s4152_s6 }
0x1549   :  { %v1245_v42 = vpop.permute.xlu1 %1244  ;;  %v3874_v43 = vld [vmem:[#allocation4] sm:$0xff]  }
0x154a   :  { %1247 = vst.msk [vmem:[#allocation5 + $0x8] sm:$0xf] %vm448_vm3, %v1245_v42  ;;  %3696 = vmatprep.mubr.msk.bf16.mxu1 %vm294_vm2, %v3874_v43 }
0x154b   :  { %v771_v45 = vpop.permute.xlu0 %770 }
0x154c   :  { %773 = vst.msk [vmem:[#allocation5 + $0x14] sm:$0xf] %vm448_vm3, %v771_v45 }
0x154d   :  { %v929_v34 = vpop.permute.xlu1 %928  ;;  %v3875_v46 = vld [vmem:[#allocation4 + $0x8] sm:$0xff]  }
0x154e   :  { %931 = vst.msk [vmem:[#allocation5 + $0x10] sm:$0xf] %vm448_vm3, %v929_v34  ;;  %3697 = vmatmul.mubr.msk.bf16.vlgmr.msra.gmra.mxu1 %vm294_vm2, %v3875_v46 }
0x154f   :  { %3717 = vmatpush3.bf16.msra.mxu1 %v3883_v26  ;;  %v1079_v18 = vpop.permute.xlu0 %1078 }
0x1550   :  { %3718 = vmatprep.subr.bf16.mxu1 %v3887_v15  ;;  %1081 = vst.msk [vmem:[#allocation4 + $0x10] sm:$0xf] %vm448_vm3, %v1079_v18 }
0x1551   :  { %v3879_v44 = vld [vmem:[#allocation5 + $0x8] sm:$0xff]  }
0x1553   :  { %3719 = vmatpush3.bf16.msra.mxu1 %v3887_v15  ;;  %v455_v36 = vpop.permute.xlu0 %454 }
0x1554   :  { %3736 = vmatprep.subr.bf16.mxu1 %v4148_v5  ;;  %457 = vst.msk [vmem:[#allocation5 + $0x1c] sm:$0xf] %vm448_vm3, %v455_v36 }
0x1555   :  { %v3880_v51 = vld [vmem:[#allocation5 + $0x10] sm:$0xff]  }
0x1557   :  { %v1395_v47 = vpop.permute.xlu0 %1394 }
0x1558   :  { %1397 = vst.msk [vmem:[#allocation4 + $0x18] sm:$0xf] %vm448_vm3, %v1395_v47 }
0x15ae   :  { %v1561_v48 = vpop.permute.xlu1 %1560 }
0x15af   :  { %1563 = vst.msk [vmem:[#allocation5] sm:$0xf] %vm448_vm3, %v1561_v48 }
0x15b2   :  { %v1237_v49 = vpop.permute.xlu1 %1236 }
0x15b3   :  { %1239 = vst.msk [vmem:[#allocation4 + $0x14] sm:$0xf] %vm448_vm3, %v1237_v49 }
0x15b6   :  { %v613_v22 = vpop.permute.xlu1 %612  ;;  %v3878_v50 = vld [vmem:[#allocation5] sm:$0xff]  }
0x15b7   :  { %615 = vst.msk [vmem:[#allocation5 + $0x18] sm:$0xf] %vm448_vm3, %v613_v22  ;;  %3684 = vmatprep.mubr.msk.bf16.mxu0 %vm294_vm2, %v3878_v50 }
0x15b8   :  { %3685 = vmatmul.mubr.msk.bf16.vlgmr.msra.gmra.mxu0 %vm294_vm2, %v3879_v44 }
0x15b9   :  { %3688 = vmatprep.mubr.msk.bf16.mxu0 %vm294_vm2, %v3880_v51  ;;  %3705 = vmatpush3.bf16.msra.mxu0 %v3882_v57 }
0x15ba   :  { %v1553_v54 = vpop.permute.xlu1 %1552  ;;  %v3881_v32 = vld [vmem:[#allocation4 + $0x10] sm:$0xff]   ;;  %3706 = vmatprep.subr.bf16.mxu0 %v3886_v52 }
0x15bb   :  { %1555 = vst.msk [vmem:[#allocation4 + $0x1c] sm:$0xf] %vm448_vm3, %v1553_v54  ;;  %3700 = vmatprep.mubr.msk.bf16.mxu1 %vm294_vm2, %v3881_v32 }
0x15bd   :  { %3707 = vmatpush3.bf16.msra.mxu0 %v3886_v52 }
0x15be   :  { %v3884_v56 = vld [vmem:[#allocation5 + $0x18] sm:$0xff]   ;;  %3728 = vmatprep.subr.bf16.mxu0 %v4148_v5 }
0x15c0   :  { %3689 = vmatmul.mubr.msk.bf16.gmra.mxu0 %vm294_vm2, %v3884_v56 }
0x15c1   :  { %3708 = vmatprep.mubr.msk.bf16.mxu0 %vm294_vm2, %v3878_v50 }
0x15c2   :  { %v3885_v55 = vld [vmem:[#allocation4 + $0x18] sm:$0xff]  }
0x15c3   :  { %3701 = vmatmul.mubr.msk.bf16.gmra.mxu1 %vm294_vm2, %v3885_v55 }
0x15c4   :  { %3720 = vmatprep.mubr.msk.bf16.mxu1 %vm294_vm2, %v3874_v43 }
0x15c8   :  { %3709 = vmatmul.mubr.msk.bf16.vlgmr.msra.gmra.mxu0 %vm294_vm2, %v3879_v44 }
0x15c9   :  { %3712 = vmatprep.mubr.msk.bf16.mxu0 %vm294_vm2, %v3880_v51  ;;  %3729 = vmatpush3.bf16.msra.mxu0 %v4682_v4 }
0x15ca   :  { %3730 = vmatprep.subr.bf16.mxu0 %v4148_v5 }
0x15cb   :  { %3721 = vmatmul.mubr.msk.bf16.vlgmr.msra.gmra.mxu1 %vm294_vm2, %v3875_v46 }
0x15cc   :  { %3724 = vmatprep.mubr.msk.bf16.mxu1 %vm294_vm2, %v3881_v32  ;;  %3737 = vmatpush3.bf16.msra.mxu1 %v4688_v58 }
0x15cd   :  { %3738 = vmatprep.subr.bf16.mxu1 %v4148_v5  ;;  %3731 = vmatpush3.bf16.msra.mxu0 %v4695_v59 }
0x15ce   :  { %3744 = vmatprep.subr.bf16.mxu0 %v4148_v5 }
0x15d0   :  { %3713 = vmatmul.mubr.msk.bf16.gmra.mxu0 %vm294_vm2, %v3884_v56  ;;  %3739 = vmatpush3.bf16.msra.mxu1 %v4704_v61 }
0x15d1   :  { %3732 = vmatprep.mubr.msk.bf16.mxu0 %vm4149_vm1, %v4148_v5  ;;  %3752 = vmatprep.subr.bf16.mxu1 %v4148_v5 }
0x15d3   :  { %3725 = vmatmul.mubr.msk.bf16.gmra.mxu1 %vm294_vm2, %v3885_v55 }
0x15d4   :  { %3740 = vmatprep.mubr.msk.bf16.mxu1 %vm4149_vm1, %v4148_v5 }
0x15d8   :  { %3733 = vmatmul.mubr.bf16.vlgmr.msra.gmra.mxu0 %v4150_v11 }
0x15d9   :  { %3745 = vmatpush3.bf16.msra.mxu0 %v4682_v4  ;;  %3748 = vmatprep.mubr.msk.bf16.mxu0 %vm4149_vm1, %v4148_v5 }
0x15da   :  { %3746 = vmatprep.subr.bf16.mxu0 %v4148_v5 }
0x15db   :  { %3741 = vmatmul.mubr.bf16.vlgmr.msra.gmra.mxu1 %v4150_v11  ;;  %v3335_v11 = vld [vmem:[%s5000_s9] ss:$0 sm:$0xff] }
0x15dc   :  { %3753 = vmatpush3.bf16.msra.mxu1 %v4688_v58  ;;  %3756 = vmatprep.mubr.msk.bf16.mxu1 %vm4149_vm1, %v4148_v5 }
0x15dd   :  { %3747 = vmatpush3.bf16.msra.mxu0 %v4695_v59  ;;  %3754 = vmatprep.subr.bf16.mxu1 %v4148_v5 }
0x15de   :  { %3760 = vmatprep.subr.bf16.mxu0 %v4148_v5 }
0x15e0   :  { %3755 = vmatpush3.bf16.msra.mxu1 %v4704_v61 }
0x15e1   :  { %3768 = vmatprep.subr.bf16.mxu1 %v4148_v5 }
0x160e   :  { %v3698_v60 = vpop.f32.mrf.mxu1 }
0x1610   :  { %v1783_v20 = vpop.f32.mrf.mxu1 }
0x1612   :  { %v3699_v7 = vpop.f32.mrf.mxu1 }
0x1614   :  { %v1786_v12 = vpop.f32.mrf.mxu1 }
0x1678   :  { %v3686_v0 = vpop.f32.mrf.mxu0 }
0x1679   :  { %v1792_v1 = vadd.f32 %v3698_v60, %v3686_v0 }
0x167a   :  { %v1674_v38 = vpop.f32.mrf.mxu0 }
0x167b   :  { %v4734_v8 = vadd.f32 %v3335_v11, %v1792_v1  ;;  %v1784_v49 = vadd.f32 %v1783_v20, %v1674_v38 }
0x167c   :  { %v3687_v3 = vpop.f32.mrf.mxu0 }
0x167d   :  { %v1795_v2 = vadd.f32 %v3699_v7, %v3687_v3  ;;  %v1821_v60 = vadd.f32 %v3335_v11, %v1784_v49 }
0x167e   :  { %v1677_v9 = vpop.f32.mrf.mxu0 }
0x167f   :  { %v1787_v28 = vadd.f32 %v1786_v12, %v1677_v9  ;;  %v4736_v13 = vadd.f32 %v3335_v11, %v1795_v2 }
0x1680   :  { %v3690_v16 = vpop.f32.mrf.mxu0 }
0x1681   :  { %v4738_v14 = vadd.f32 %v3335_v11, %v1787_v28 }
0x1682   :  { %v1690_v30 = vpop.f32.mrf.mxu0 }
0x1683   :  { %v3702_v21 = vpop.f32.mrf.mxu1 }
0x1684   :  { %v1808_v23 = vadd.f32 %v3702_v21, %v3690_v16  ;;  %v3691_v25 = vpop.f32.mrf.mxu0 }
0x1685   :  { %v1799_v27 = vpop.f32.mrf.mxu1 }
0x1686   :  { %v1800_v31 = vadd.f32 %v1799_v27, %v1690_v30  ;;  %v1693_v17 = vpop.f32.mrf.mxu0  ;;  %v4740_v35 = vadd.f32 %v3335_v11, %v1808_v23 }
0x1687   :  { %v3703_v19 = vpop.f32.mrf.mxu1 }
0x1688   :  { %v1811_v6 = vadd.f32 %v3703_v19, %v3691_v25  ;;  %v3710_v10 = vpop.f32.mrf.mxu0  ;;  %v4742_v62 = vadd.f32 %v3335_v11, %v1800_v31 }
0x1689   :  { %v1802_v29 = vpop.f32.mrf.mxu1 }
0x168a   :  { %v1803_v63 = vadd.f32 %v1802_v29, %v1693_v17  ;;  %v1875_v57 = vpop.f32.mrf.mxu0  ;;  %v4744_v26 = vadd.f32 %v3335_v11, %v1811_v6 }
0x168b   :  { %v3722_v53 = vpop.f32.mrf.mxu1 }
0x168c   :  { %v1961_v37 = vadd.f32 %v3722_v53, %v3710_v10  ;;  %v3711_v39 = vpop.f32.mrf.mxu0  ;;  %v4749_v41 = vadd.f32 %v3335_v11, %v1803_v63 }
0x168d   :  { %v1952_v40 = vpop.f32.mrf.mxu1 }
0x168e   :  { %v1953_v24 = vadd.f32 %v1952_v40, %v1875_v57  ;;  %v1878_v42 = vpop.f32.mrf.mxu0  ;;  %v4751_v43 = vadd.f32 %v3348_v33, %v1961_v37 }
0x168f   :  { %v3723_v15 = vpop.f32.mrf.mxu1 }
0x1690   :  { %v1964_v45 = vadd.f32 %v3723_v15, %v3711_v39  ;;  %v3714_v34 = vpop.f32.mrf.mxu0  ;;  %v4753_v46 = vadd.f32 %v3348_v33, %v1953_v24 }
0x1691   :  { %v1955_v18 = vpop.f32.mrf.mxu1 }
0x1692   :  { %v1956_v36 = vadd.f32 %v1955_v18, %v1878_v42  ;;  %v1891_v47 = vpop.f32.mrf.mxu0  ;;  %v4755_v48 = vadd.f32 %v3348_v33, %v1964_v45 }
0x1693   :  { %v3726_v22 = vpop.f32.mrf.mxu1 }
0x1694   :  { %v1977_v50 = vadd.f32 %v3726_v22, %v3714_v34  ;;  %v3715_v44 = vpop.f32.mrf.mxu0  ;;  %v4757_v52 = vadd.f32 %v3348_v33, %v1956_v36 }
0x1695   :  { %v1968_v51 = vpop.f32.mrf.mxu1 }
0x1696   :  { %v1969_v54 = vadd.f32 %v1968_v51, %v1891_v47  ;;  %v1894_v32 = vpop.f32.mrf.mxu0  ;;  %v4759_v56 = vadd.f32 %v3348_v33, %v1977_v50 }
0x1697   :  { %v3727_v55 = vpop.f32.mrf.mxu1 }
0x1698   :  { %v1980_v0 = vadd.f32 %v3727_v55, %v3715_v44  ;;  %v2069_v1 = vpop.f32.mrf.mxu0  ;;  %v4761_v7 = vadd.f32 %v3348_v33, %v1969_v54 }
0x1699   :  { %v2075_v3 = vadd.f32 %v2069_v1, %v1821_v60  ;;  %v1971_v2 = vpop.f32.mrf.mxu1 }
0x169a   :  { %v1972_v12 = vadd.f32 %v1971_v2, %v1894_v32  ;;  %v3734_v20 = vpop.f32.mrf.mxu0  ;;  %v1997_v38 = vadd.f32 %v3348_v33, %v1980_v0 }
0x169b   :  { %4020 = vtanh.f32 %v2075_v3  ;;  %v2147_v9 = vpop.f32.mrf.mxu1  ;;  %v3351_v17 = vmul.f32 -1.442695, %v2075_v3 }
0x169c   :  { %v2153_v28 = vadd.f32 %v2147_v9, %v1997_v38  ;;  %v2072_v16 = vpop.f32.mrf.mxu0  ;;  %v4763_v30 = vadd.f32 %v3348_v33, %v1972_v12 }
0x169d   :  { %v3742_v21 = vpop.f32.mrf.mxu1 }
0x169e   :  { %4022 = vtanh.f32 %v2153_v28  ;;  %v3735_v23 = vpop.f32.mrf.mxu0  ;;  %v3354_v19 = vmul.f32 -1.442695, %v2153_v28 }
0x169f   :  { %v2150_v25 = vpop.f32.mrf.mxu1  ;;  %4024 = vpow2.f32 %v3351_v17 }
0x16a0   :  { %4026 = vpow2.f32 %v3354_v19 }
0x16a1   :  { %v3743_v11 = vpop.f32.mrf.mxu1 }
0x16a8   :  { %v4021_v27 = vpop.eup %4020 }
0x16a9   :  { %2085 = vrot.lane.b32.xlu0 %v4021_v27, %s4151_s3 }
0x16ab   :  { %v4023_v31 = vpop.eup %4022 }
0x16ac   :  { %2163 = vrot.lane.b32.xlu1 %v4023_v31, %s4151_s3  ;;  %v4025_v6 = vpop.eup %4024 }
0x16ad   :  { %v4027_v10 = vpop.eup %4026  ;;  %v2079_v29 = vadd.f32 1.0, %v4025_v6 }
0x16ae   :  { %v2157_v63 = vadd.f32 1.0, %v4027_v10 }
0x16af   :  { %4028 = vrcp.f32 %v2079_v29 }
0x16b0   :  { %4030 = vrcp.f32 %v2157_v63 }
0x16bc   :  { %v4029_v57 = vpop.eup %4028 }
0x16bd   :  { %v4031_v37 = vpop.eup %4030  ;;  %v2083_v24 = vmul.f32 0.0, %v4029_v57 }
0x16be   :  { %v2161_v45 = vmul.f32 0.0, %v4031_v37 }
0x171b   :  { %v2086_v53 = vpop.permute.xlu0 %2085 }
0x171c   :  { %v2088_v33 = vmul.f32 %v4029_v57, %v2086_v53 }
0x171e   :  { %v2164_v39 = vpop.permute.xlu1 %2163  ;;  %2090 = vrot.lane.b32.xlu0 %v2088_v33, %s4152_s6 }
0x171f   :  { %v2166_v40 = vmul.f32 %v4031_v37, %v2164_v39 }
0x1721   :  { %2168 = vrot.lane.b32.xlu1 %v2166_v40, %s4152_s6 }
0x1790   :  { %v2091_v42 = vpop.permute.xlu0 %2090 }
0x1791   :  { %v4769_v15 = vadd.f32 %v2091_v42, %v2083_v24 }
0x1793   :  { %4032 = vtanh.f32 %v4769_v15  ;;  %v2169_v34 = vpop.permute.xlu1 %2168 }
0x1794   :  { %v4772_v18 = vadd.f32 %v2169_v34, %v2161_v45 }
0x1796   :  { %4034 = vtanh.f32 %v4772_v18 }
0x17a0   :  { %v4033_v36 = vpop.eup %4032 }
0x17a1   :  { %2096 = vrot.lane.b32.xlu0 %v4033_v36, %s4151_s3 }
0x17a3   :  { %v4035_v47 = vpop.eup %4034 }
0x17a4   :  { %2174 = vrot.lane.b32.xlu1 %v4035_v47, %s4151_s3 }
0x1813   :  { %v2097_v49 = vpop.permute.xlu0 %2096 }
0x1814   :  { %v2099_v22 = vmul.f32 %v4029_v57, %v2097_v49 }
0x1816   :  { %v2179_v50 = vpack.c.bf16 %v2099_v22, %v2099_v22  ;;  %v2175_v44 = vpop.permute.xlu1 %2174 }
0x1817   :  { %v2177_v51 = vmul.f32 %v4031_v37, %v2175_v44 }
0x1818   :  { %2181 = vrot.lane.b32.xlu0 %v2179_v50, %s4152_s6 }
0x1819   :  { %v2252_v54 = vpack.c.bf16 %v2177_v51, %v2177_v51 }
0x181b   :  { %2254 = vrot.lane.b32.xlu1 %v2252_v54, %s4152_s6 }
0x188a   :  { %v2182_v32 = vpop.permute.xlu0 %2181 }
0x188b   :  { %3749 = vmatmul.mubr.msk.bf16.vlgmr.msra.gmra.mxu0 %vm294_vm2, %v2182_v32 }
0x188c   :  { %3761 = vmatpush3.bf16.msra.mxu0 %v4682_v4  ;;  %3764 = vmatprep.mubr.msk.bf16.mxu0 %vm4149_vm1, %v4148_v5 }
0x188d   :  { %v2255_v55 = vpop.permute.xlu1 %2254  ;;  %3762 = vmatprep.subr.bf16.mxu0 %v4148_v5 }
0x188e   :  { %3757 = vmatmul.mubr.msk.bf16.vlgmr.msra.gmra.mxu1 %vm294_vm2, %v2255_v55 }
0x188f   :  { %3769 = vmatpush3.bf16.msra.mxu1 %v4688_v58  ;;  %3772 = vmatprep.mubr.msk.bf16.mxu1 %vm4149_vm1, %v4148_v5 }
0x1890   :  { %3763 = vmatpush3.bf16.msra.mxu0 %v4695_v59  ;;  %3770 = vmatprep.subr.bf16.mxu1 %v4148_v5 }
0x1891   :  { %3776 = vmatprep.subr.bf16.mxu0 %v4148_v5 }
0x1893   :  { %3771 = vmatpush3.bf16.msra.mxu1 %v4704_v61 }
0x1894   :  { %3784 = vmatprep.subr.bf16.mxu1 %v4148_v5 }
0x194b   :  { %v2220_v60 = vpop.f32.mrf.mxu0 }
0x194c   :  { %v2226_v0 = vadd.f32 %v2220_v60, %v4738_v14 }
0x194d   :  { %v3750_v1 = vpop.f32.mrf.mxu0 }
0x194e   :  { %4036 = vtanh.f32 %v2226_v0  ;;  %v2293_v3 = vpop.f32.mrf.mxu1  ;;  %v3356_v23 = vmul.f32 -1.442695, %v2226_v0 }
0x194f   :  { %v2299_v2 = vadd.f32 %v2293_v3, %v4759_v56  ;;  %v2223_v12 = vpop.f32.mrf.mxu0 }
0x1950   :  { %v3758_v20 = vpop.f32.mrf.mxu1 }
0x1951   :  { %4038 = vtanh.f32 %v2299_v2  ;;  %v3751_v38 = vpop.f32.mrf.mxu0  ;;  %v3358_v25 = vmul.f32 -1.442695, %v2299_v2 }
0x1952   :  { %v2296_v9 = vpop.f32.mrf.mxu1  ;;  %4040 = vpow2.f32 %v3356_v23 }
0x1953   :  { %4042 = vpow2.f32 %v3358_v25 }
0x1954   :  { %v3759_v28 = vpop.f32.mrf.mxu1 }
0x195b   :  { %v4037_v16 = vpop.eup %4036 }
0x195c   :  { %2236 = vrot.lane.b32.xlu0 %v4037_v16, %s4151_s3 }
0x195e   :  { %v4039_v21 = vpop.eup %4038 }
0x195f   :  { %2309 = vrot.lane.b32.xlu1 %v4039_v21, %s4151_s3  ;;  %v4041_v14 = vpop.eup %4040 }
0x1960   :  { %v4043_v11 = vpop.eup %4042  ;;  %v2230_v27 = vadd.f32 1.0, %v4041_v14 }
0x1961   :  { %v2303_v56 = vadd.f32 1.0, %v4043_v11 }
0x1962   :  { %4044 = vrcp.f32 %v2230_v27 }
0x1963   :  { %4046 = vrcp.f32 %v2303_v56 }
0x196f   :  { %v4045_v31 = vpop.eup %4044 }
0x1970   :  { %v4047_v6 = vpop.eup %4046  ;;  %v2234_v63 = vmul.f32 %v4045_v31, %v4769_v15 }
0x1971   :  { %v2307_v33 = vmul.f32 %v4047_v6, %v4772_v18 }
0x19ce   :  { %v2237_v17 = vpop.permute.xlu0 %2236 }
0x19cf   :  { %v2239_v19 = vmul.f32 %v4045_v31, %v2237_v17 }
0x19d1   :  { %v2310_v10 = vpop.permute.xlu1 %2309  ;;  %2241 = vrot.lane.b32.xlu0 %v2239_v19, %s4152_s6 }
0x19d2   :  { %v2312_v29 = vmul.f32 %v4047_v6, %v2310_v10 }
0x19d4   :  { %2314 = vrot.lane.b32.xlu1 %v2312_v29, %s4152_s6 }
0x1a43   :  { %v2242_v57 = vpop.permute.xlu0 %2241 }
0x1a44   :  { %v4800_v53 = vadd.f32 %v2242_v57, %v2234_v63 }
0x1a46   :  { %4048 = vtanh.f32 %v4800_v53  ;;  %v2315_v37 = vpop.permute.xlu1 %2314 }
0x1a47   :  { %v4804_v39 = vadd.f32 %v2315_v37, %v2307_v33 }
0x1a49   :  { %4050 = vtanh.f32 %v4804_v39 }
0x1a53   :  { %v4049_v40 = vpop.eup %4048 }
0x1a54   :  { %2247 = vrot.lane.b32.xlu0 %v4049_v40, %s4151_s3 }
0x1a56   :  { %v4051_v24 = vpop.eup %4050 }
0x1a57   :  { %2320 = vrot.lane.b32.xlu1 %v4051_v24, %s4151_s3 }
0x1ac6   :  { %v2248_v42 = vpop.permute.xlu0 %2247 }
0x1ac7   :  { %v2250_v15 = vmul.f32 %v4045_v31, %v2248_v42 }
0x1ac9   :  { %v2325_v45 = vpack.c.bf16 %v2250_v15, %v2250_v15  ;;  %v2321_v34 = vpop.permute.xlu1 %2320 }
0x1aca   :  { %v2323_v36 = vmul.f32 %v4047_v6, %v2321_v34 }
0x1acb   :  { %2327 = vrot.lane.b32.xlu0 %v2325_v45, %s4152_s6 }
0x1acc   :  { %v2398_v18 = vpack.c.bf16 %v2323_v36, %v2323_v36 }
0x1ace   :  { %2400 = vrot.lane.b32.xlu1 %v2398_v18, %s4152_s6 }
0x1b3d   :  { %v2328_v47 = vpop.permute.xlu0 %2327 }
0x1b3e   :  { %3765 = vmatmul.mubr.msk.bf16.vlgmr.msra.gmra.mxu0 %vm294_vm2, %v2328_v47 }
0x1b3f   :  { %3777 = vmatpush3.bf16.msra.mxu0 %v4682_v4  ;;  %3780 = vmatprep.mubr.msk.bf16.mxu0 %vm4149_vm1, %v4148_v5 }
0x1b40   :  { %v2401_v49 = vpop.permute.xlu1 %2400  ;;  %3778 = vmatprep.subr.bf16.mxu0 %v4148_v5 }
0x1b41   :  { %3773 = vmatmul.mubr.msk.bf16.vlgmr.msra.gmra.mxu1 %vm294_vm2, %v2401_v49 }
0x1b42   :  { %3785 = vmatpush3.bf16.msra.mxu1 %v4688_v58  ;;  %3788 = vmatprep.mubr.msk.bf16.mxu1 %vm4149_vm1, %v4148_v5 }
0x1b43   :  { %3779 = vmatpush3.bf16.msra.mxu0 %v4695_v59  ;;  %3786 = vmatprep.subr.bf16.mxu1 %v4148_v5 }
0x1b44   :  { %3792 = vmatprep.subr.bf16.mxu0 %v4148_v5 }
0x1b46   :  { %3787 = vmatpush3.bf16.msra.mxu1 %v4704_v61 }
0x1b47   :  { %3800 = vmatprep.subr.bf16.mxu1 %v4148_v5 }
0x1bfe   :  { %v2366_v22 = vpop.f32.mrf.mxu0 }
0x1bff   :  { %v2372_v50 = vadd.f32 %v2366_v22, %v4734_v8 }
0x1c00   :  { %v3766_v44 = vpop.f32.mrf.mxu0 }
0x1c01   :  { %4052 = vtanh.f32 %v2372_v50  ;;  %v2439_v51 = vpop.f32.mrf.mxu1  ;;  %v3360_v12 = vmul.f32 -1.442695, %v2372_v50 }
0x1c02   :  { %v2445_v54 = vadd.f32 %v2439_v51, %v4763_v30  ;;  %v2369_v32 = vpop.f32.mrf.mxu0 }
0x1c03   :  { %v3774_v55 = vpop.f32.mrf.mxu1 }
0x1c04   :  { %4054 = vtanh.f32 %v2445_v54  ;;  %v3767_v60 = vpop.f32.mrf.mxu0  ;;  %v3362_v20 = vmul.f32 -1.442695, %v2445_v54 }
0x1c05   :  { %v2442_v0 = vpop.f32.mrf.mxu1  ;;  %4056 = vpow2.f32 %v3360_v12 }
0x1c06   :  { %4058 = vpow2.f32 %v3362_v20 }
0x1c07   :  { %v3775_v1 = vpop.f32.mrf.mxu1 }
0x1c0e   :  { %v4053_v3 = vpop.eup %4052 }
0x1c0f   :  { %2382 = vrot.lane.b32.xlu0 %v4053_v3, %s4151_s3 }
0x1c11   :  { %v4055_v2 = vpop.eup %4054 }
0x1c12   :  { %2455 = vrot.lane.b32.xlu1 %v4055_v2, %s4151_s3  ;;  %v4057_v8 = vpop.eup %4056 }
0x1c13   :  { %v4059_v38 = vpop.eup %4058  ;;  %v2376_v9 = vadd.f32 1.0, %v4057_v8 }
0x1c14   :  { %v2449_v30 = vadd.f32 1.0, %v4059_v38 }
0x1c15   :  { %4060 = vrcp.f32 %v2376_v9 }
0x1c16   :  { %4062 = vrcp.f32 %v2449_v30 }
0x1c22   :  { %v4061_v28 = vpop.eup %4060 }
0x1c23   :  { %v4063_v23 = vpop.eup %4062  ;;  %v2380_v11 = vmul.f32 %v4061_v28, %v4800_v53 }
0x1c24   :  { %v2453_v31 = vmul.f32 %v4063_v23, %v4804_v39 }
0x1c81   :  { %v2383_v16 = vpop.permute.xlu0 %2382 }
0x1c82   :  { %v2385_v21 = vmul.f32 %v4061_v28, %v2383_v16 }
0x1c84   :  { %2387 = vrot.lane.b32.xlu0 %v2385_v21, %s4152_s6  ;;  %v2456_v25 = vpop.permute.xlu1 %2455 }
0x1c85   :  { %v2458_v14 = vmul.f32 %v4063_v23, %v2456_v25 }
0x1c87   :  { %2460 = vrot.lane.b32.xlu1 %v2458_v14, %s4152_s6 }
0x1cf6   :  { %v2388_v27 = vpop.permute.xlu0 %2387 }
0x1cf7   :  { %v4832_v56 = vadd.f32 %v2388_v27, %v2380_v11 }
0x1cf9   :  { %4064 = vtanh.f32 %v4832_v56  ;;  %v2461_v17 = vpop.permute.xlu1 %2460 }
0x1cfa   :  { %v4836_v19 = vadd.f32 %v2461_v17, %v2453_v31 }
0x1cfc   :  { %4066 = vtanh.f32 %v4836_v19 }
0x1d06   :  { %v4065_v6 = vpop.eup %4064 }
0x1d07   :  { %2393 = vrot.lane.b32.xlu0 %v4065_v6, %s4151_s3 }
0x1d09   :  { %v4067_v10 = vpop.eup %4066 }
0x1d0a   :  { %2466 = vrot.lane.b32.xlu1 %v4067_v10, %s4151_s3 }
0x1d79   :  { %v2394_v29 = vpop.permute.xlu0 %2393 }
0x1d7a   :  { %v2396_v63 = vmul.f32 %v4061_v28, %v2394_v29 }
0x1d7c   :  { %v2471_v57 = vpack.c.bf16 %v2396_v63, %v2396_v63  ;;  %v2467_v53 = vpop.permute.xlu1 %2466 }
0x1d7d   :  { %v2469_v33 = vmul.f32 %v4063_v23, %v2467_v53 }
0x1d7e   :  { %2473 = vrot.lane.b32.xlu0 %v2471_v57, %s4152_s6 }
0x1d7f   :  { %v2544_v37 = vpack.c.bf16 %v2469_v33, %v2469_v33 }
0x1d81   :  { %2546 = vrot.lane.b32.xlu1 %v2544_v37, %s4152_s6 }
0x1df0   :  { %v2474_v39 = vpop.permute.xlu0 %2473 }
0x1df1   :  { %3781 = vmatmul.mubr.msk.bf16.vlgmr.msra.gmra.mxu0 %vm294_vm2, %v2474_v39 }
0x1df2   :  { %3793 = vmatpush3.bf16.msra.mxu0 %v4682_v4  ;;  %3796 = vmatprep.mubr.msk.bf16.mxu0 %vm4149_vm1, %v4148_v5 }
0x1df3   :  { %v2547_v40 = vpop.permute.xlu1 %2546  ;;  %3794 = vmatprep.subr.bf16.mxu0 %v4148_v5 }
0x1df4   :  { %3789 = vmatmul.mubr.msk.bf16.vlgmr.msra.gmra.mxu1 %vm294_vm2, %v2547_v40 }
0x1df5   :  { %3801 = vmatpush3.bf16.msra.mxu1 %v4688_v58  ;;  %3804 = vmatprep.mubr.msk.bf16.mxu1 %vm4149_vm1, %v4148_v5 }
0x1df6   :  { %3795 = vmatpush3.bf16.msra.mxu0 %v4695_v59  ;;  %3802 = vmatprep.subr.bf16.mxu1 %v4148_v5 }
0x1df7   :  { %3808 = vmatprep.subr.bf16.mxu0 %v4148_v5 }
0x1df9   :  { %3803 = vmatpush3.bf16.msra.mxu1 %v4704_v61 }
0x1dfa   :  { %3816 = vmatprep.subr.bf16.mxu1 %v4148_v5 }
0x1eb1   :  { %v2512_v24 = vpop.f32.mrf.mxu0 }
0x1eb2   :  { %v2518_v42 = vadd.f32 %v2512_v24, %v4736_v13 }
0x1eb3   :  { %v3782_v15 = vpop.f32.mrf.mxu0 }
0x1eb4   :  { %4068 = vtanh.f32 %v2518_v42  ;;  %v2585_v45 = vpop.f32.mrf.mxu1  ;;  %v3364_v51 = vmul.f32 -1.442695, %v2518_v42 }
0x1eb5   :  { %v2591_v34 = vadd.f32 %v2585_v45, %v4761_v7  ;;  %v2515_v36 = vpop.f32.mrf.mxu0 }
0x1eb6   :  { %v3790_v18 = vpop.f32.mrf.mxu1 }
0x1eb7   :  { %4070 = vtanh.f32 %v2591_v34  ;;  %v3783_v47 = vpop.f32.mrf.mxu0  ;;  %v3366_v54 = vmul.f32 -1.442695, %v2591_v34 }
0x1eb8   :  { %v2588_v49 = vpop.f32.mrf.mxu1  ;;  %4072 = vpow2.f32 %v3364_v51 }
0x1eb9   :  { %4074 = vpow2.f32 %v3366_v54 }
0x1eba   :  { %v3791_v22 = vpop.f32.mrf.mxu1 }
0x1ec1   :  { %v4069_v50 = vpop.eup %4068 }
0x1ec2   :  { %2528 = vrot.lane.b32.xlu0 %v4069_v50, %s4151_s3 }
0x1ec4   :  { %v4071_v44 = vpop.eup %4070 }
0x1ec5   :  { %2601 = vrot.lane.b32.xlu1 %v4071_v44, %s4151_s3  ;;  %v4073_v13 = vpop.eup %4072 }
0x1ec6   :  { %v4075_v32 = vpop.eup %4074  ;;  %v2522_v55 = vadd.f32 1.0, %v4073_v13 }
0x1ec7   :  { %v2595_v7 = vadd.f32 1.0, %v4075_v32 }
0x1ec8   :  { %4076 = vrcp.f32 %v2522_v55 }
0x1ec9   :  { %4078 = vrcp.f32 %v2595_v7 }
0x1ed5   :  { %v4077_v60 = vpop.eup %4076 }
0x1ed6   :  { %v4079_v3 = vpop.eup %4078  ;;  %v2526_v20 = vmul.f32 %v4077_v60, %v4832_v56 }
0x1ed7   :  { %v2599_v9 = vmul.f32 %v4079_v3, %v4836_v19 }
0x1f34   :  { %v2529_v0 = vpop.permute.xlu0 %2528 }
0x1f35   :  { %v2531_v1 = vmul.f32 %v4077_v60, %v2529_v0 }
0x1f37   :  { %2533 = vrot.lane.b32.xlu0 %v2531_v1, %s4152_s6  ;;  %v2602_v2 = vpop.permute.xlu1 %2601 }
0x1f38   :  { %v2604_v12 = vmul.f32 %v4079_v3, %v2602_v2 }
0x1f3a   :  { %2606 = vrot.lane.b32.xlu1 %v2604_v12, %s4152_s6 }
0x1fa9   :  { %v2534_v8 = vpop.permute.xlu0 %2533 }
0x1faa   :  { %v4864_v38 = vadd.f32 %v2534_v8, %v2526_v20 }
0x1fac   :  { %4080 = vtanh.f32 %v4864_v38  ;;  %v2607_v30 = vpop.permute.xlu1 %2606 }
0x1fad   :  { %v4868_v28 = vadd.f32 %v2607_v30, %v2599_v9 }
0x1faf   :  { %4082 = vtanh.f32 %v4868_v28 }
0x1fb9   :  { %v4081_v16 = vpop.eup %4080 }
0x1fba   :  { %2539 = vrot.lane.b32.xlu0 %v4081_v16, %s4151_s3 }
0x1fbc   :  { %v4083_v21 = vpop.eup %4082 }
0x1fbd   :  { %2612 = vrot.lane.b32.xlu1 %v4083_v21, %s4151_s3 }
0x202c   :  { %v2540_v23 = vpop.permute.xlu0 %2539 }
0x202d   :  { %v2542_v25 = vmul.f32 %v4077_v60, %v2540_v23 }
0x202f   :  { %v2617_v14 = vpack.c.bf16 %v2542_v25, %v2542_v25  ;;  %v2613_v11 = vpop.permute.xlu1 %2612 }
0x2030   :  { %v2615_v27 = vmul.f32 %v4079_v3, %v2613_v11 }
0x2031   :  { %2619 = vrot.lane.b32.xlu0 %v2617_v14, %s4152_s6 }
0x2032   :  { %v2690_v56 = vpack.c.bf16 %v2615_v27, %v2615_v27 }
0x2034   :  { %2692 = vrot.lane.b32.xlu1 %v2690_v56, %s4152_s6 }
0x20a3   :  { %v2620_v31 = vpop.permute.xlu0 %2619 }
0x20a4   :  { %3797 = vmatmul.mubr.msk.bf16.vlgmr.msra.gmra.mxu0 %vm294_vm2, %v2620_v31 }
0x20a5   :  { %3809 = vmatpush3.bf16.msra.mxu0 %v4682_v4  ;;  %3812 = vmatprep.mubr.msk.bf16.mxu0 %vm4149_vm1, %v4148_v5 }
0x20a6   :  { %v2693_v17 = vpop.permute.xlu1 %2692  ;;  %3810 = vmatprep.subr.bf16.mxu0 %v4148_v5 }
0x20a7   :  { %3805 = vmatmul.mubr.msk.bf16.vlgmr.msra.gmra.mxu1 %vm294_vm2, %v2693_v17 }
0x20a8   :  { %3817 = vmatpush3.bf16.msra.mxu1 %v4688_v58  ;;  %3820 = vmatprep.mubr.msk.bf16.mxu1 %vm4149_vm1, %v4148_v5 }
0x20a9   :  { %3811 = vmatpush3.bf16.msra.mxu0 %v4695_v59  ;;  %3818 = vmatprep.subr.bf16.mxu1 %v4148_v5 }
0x20aa   :  { %3824 = vmatprep.subr.bf16.mxu0 %v4148_v5 }
0x20ac   :  { %3819 = vmatpush3.bf16.msra.mxu1 %v4704_v61 }
0x20ad   :  { %3832 = vmatprep.subr.bf16.mxu1 %v4148_v5 }
0x2164   :  { %v2658_v19 = vpop.f32.mrf.mxu0 }
0x2165   :  { %v2664_v6 = vadd.f32 %v2658_v19, %v4742_v62 }
0x2166   :  { %v3798_v10 = vpop.f32.mrf.mxu0 }
0x2167   :  { %4084 = vtanh.f32 %v2664_v6  ;;  %v2731_v29 = vpop.f32.mrf.mxu1  ;;  %v3368_v42 = vmul.f32 -1.442695, %v2664_v6 }
0x2168   :  { %v2737_v63 = vadd.f32 %v2731_v29, %v4755_v48  ;;  %v2661_v57 = vpop.f32.mrf.mxu0 }
0x2169   :  { %v3806_v53 = vpop.f32.mrf.mxu1 }
0x216a   :  { %4086 = vtanh.f32 %v2737_v63  ;;  %v3799_v33 = vpop.f32.mrf.mxu0  ;;  %v3370_v15 = vmul.f32 -1.442695, %v2737_v63 }
0x216b   :  { %v2734_v37 = vpop.f32.mrf.mxu1  ;;  %4088 = vpow2.f32 %v3368_v42 }
0x216c   :  { %4090 = vpow2.f32 %v3370_v15 }
0x216d   :  { %v3807_v39 = vpop.f32.mrf.mxu1 }
0x2174   :  { %v4085_v40 = vpop.eup %4084 }
0x2175   :  { %2674 = vrot.lane.b32.xlu0 %v4085_v40, %s4151_s3 }
0x2177   :  { %v4087_v24 = vpop.eup %4086 }
0x2178   :  { %2747 = vrot.lane.b32.xlu1 %v4087_v24, %s4151_s3  ;;  %v4089_v62 = vpop.eup %4088 }
0x2179   :  { %v4091_v45 = vpop.eup %4090  ;;  %v2668_v34 = vadd.f32 1.0, %v4089_v62 }
0x217a   :  { %v2741_v48 = vadd.f32 1.0, %v4091_v45 }
0x217b   :  { %4092 = vrcp.f32 %v2668_v34 }
0x217c   :  { %4094 = vrcp.f32 %v2741_v48 }
0x2188   :  { %v4093_v36 = vpop.eup %4092 }
0x2189   :  { %v4095_v49 = vpop.eup %4094  ;;  %v2672_v44 = vmul.f32 %v4093_v36, %v4864_v38 }
0x218a   :  { %v2745_v13 = vmul.f32 %v4095_v49, %v4868_v28 }
0x21e7   :  { %v2675_v18 = vpop.permute.xlu0 %2674 }
0x21e8   :  { %v2677_v47 = vmul.f32 %v4093_v36, %v2675_v18 }
0x21ea   :  { %2679 = vrot.lane.b32.xlu0 %v2677_v47, %s4152_s6  ;;  %v2748_v22 = vpop.permute.xlu1 %2747 }
0x21eb   :  { %v2750_v50 = vmul.f32 %v4095_v49, %v2748_v22 }
0x21ed   :  { %2752 = vrot.lane.b32.xlu1 %v2750_v50, %s4152_s6 }
0x225c   :  { %v2680_v51 = vpop.permute.xlu0 %2679 }
0x225d   :  { %v4896_v54 = vadd.f32 %v2680_v51, %v2672_v44 }
0x225f   :  { %4096 = vtanh.f32 %v4896_v54  ;;  %v2753_v32 = vpop.permute.xlu1 %2752 }
0x2260   :  { %v4900_v55 = vadd.f32 %v2753_v32, %v2745_v13 }
0x2262   :  { %4098 = vtanh.f32 %v4900_v55 }
0x226c   :  { %v4097_v7 = vpop.eup %4096 }
0x226d   :  { %2685 = vrot.lane.b32.xlu0 %v4097_v7, %s4151_s3 }
0x226f   :  { %v4099_v60 = vpop.eup %4098 }
0x2270   :  { %2758 = vrot.lane.b32.xlu1 %v4099_v60, %s4151_s3 }
0x22df   :  { %v2686_v0 = vpop.permute.xlu0 %2685 }
0x22e0   :  { %v2688_v1 = vmul.f32 %v4093_v36, %v2686_v0 }
0x22e2   :  { %v2763_v3 = vpack.c.bf16 %v2688_v1, %v2688_v1  ;;  %v2759_v2 = vpop.permute.xlu1 %2758 }
0x22e3   :  { %v2761_v12 = vmul.f32 %v4095_v49, %v2759_v2 }
0x22e4   :  { %2765 = vrot.lane.b32.xlu0 %v2763_v3, %s4152_s6 }
0x22e5   :  { %v2836_v20 = vpack.c.bf16 %v2761_v12, %v2761_v12 }
0x22e7   :  { %2838 = vrot.lane.b32.xlu1 %v2836_v20, %s4152_s6 }
0x2356   :  { %v2766_v8 = vpop.permute.xlu0 %2765 }
0x2357   :  { %3813 = vmatmul.mubr.msk.bf16.vlgmr.msra.gmra.mxu0 %vm294_vm2, %v2766_v8 }
0x2358   :  { %3825 = vmatpush3.bf16.msra.mxu0 %v4682_v4  ;;  %3828 = vmatprep.mubr.msk.bf16.mxu0 %vm4149_vm1, %v4148_v5 }
0x2359   :  { %v2839_v38 = vpop.permute.xlu1 %2838  ;;  %3826 = vmatprep.subr.bf16.mxu0 %v4148_v5 }
0x235a   :  { %3821 = vmatmul.mubr.msk.bf16.vlgmr.msra.gmra.mxu1 %vm294_vm2, %v2839_v38 }
0x235b   :  { %3833 = vmatpush3.bf16.msra.mxu1 %v4688_v58  ;;  %3836 = vmatprep.mubr.msk.bf16.mxu1 %vm4149_vm1, %v4148_v5 }
0x235c   :  { %3827 = vmatpush3.bf16.msra.mxu0 %v4695_v59  ;;  %3834 = vmatprep.subr.bf16.mxu1 %v4148_v5 }
0x235d   :  { %3840 = vmatprep.subr.bf16.mxu0 %v4148_v5 }
0x235f   :  { %3835 = vmatpush3.bf16.msra.mxu1 %v4704_v61 }
0x2360   :  { %3848 = vmatprep.subr.bf16.mxu1 %v4148_v5 }
0x2417   :  { %v2804_v9 = vpop.f32.mrf.mxu0 }
0x2418   :  { %v2810_v30 = vadd.f32 %v2804_v9, %v4749_v41 }
0x2419   :  { %v3814_v28 = vpop.f32.mrf.mxu0 }
0x241a   :  { %4100 = vtanh.f32 %v2810_v30  ;;  %v2877_v16 = vpop.f32.mrf.mxu1  ;;  %v3372_v17 = vmul.f32 -1.442695, %v2810_v30 }
0x241b   :  { %v2883_v21 = vadd.f32 %v2877_v16, %v4751_v43  ;;  %v2807_v23 = vpop.f32.mrf.mxu0 }
0x241c   :  { %v3822_v25 = vpop.f32.mrf.mxu1 }
0x241d   :  { %4102 = vtanh.f32 %v2883_v21  ;;  %v3815_v14 = vpop.f32.mrf.mxu0  ;;  %v3374_v19 = vmul.f32 -1.442695, %v2883_v21 }
0x241e   :  { %v2880_v11 = vpop.f32.mrf.mxu1  ;;  %4104 = vpow2.f32 %v3372_v17 }
0x241f   :  { %4106 = vpow2.f32 %v3374_v19 }
0x2420   :  { %v3823_v27 = vpop.f32.mrf.mxu1 }
0x2427   :  { %v4101_v56 = vpop.eup %4100 }
0x2428   :  { %2820 = vrot.lane.b32.xlu0 %v4101_v56, %s4151_s3 }
0x242a   :  { %v4103_v31 = vpop.eup %4102 }
0x242b   :  { %2893 = vrot.lane.b32.xlu1 %v4103_v31, %s4151_s3  ;;  %v4105_v41 = vpop.eup %4104 }
0x242c   :  { %v4107_v6 = vpop.eup %4106  ;;  %v2814_v10 = vadd.f32 1.0, %v4105_v41 }
0x242d   :  { %v2887_v43 = vadd.f32 1.0, %v4107_v6 }
0x242e   :  { %4108 = vrcp.f32 %v2814_v10 }
0x242f   :  { %4110 = vrcp.f32 %v2887_v43 }
0x243b   :  { %v4109_v29 = vpop.eup %4108 }
0x243c   :  { %v4111_v53 = vpop.eup %4110  ;;  %v2818_v39 = vmul.f32 %v4109_v29, %v4896_v54 }
0x243d   :  { %v2891_v42 = vmul.f32 %v4111_v53, %v4900_v55 }
0x249a   :  { %v2821_v63 = vpop.permute.xlu0 %2820 }
0x249b   :  { %v2823_v57 = vmul.f32 %v4109_v29, %v2821_v63 }
0x249d   :  { %v2894_v33 = vpop.permute.xlu1 %2893  ;;  %2825 = vrot.lane.b32.xlu0 %v2823_v57, %s4152_s6 }
0x249e   :  { %v2896_v37 = vmul.f32 %v4111_v53, %v2894_v33 }
0x24a0   :  { %2898 = vrot.lane.b32.xlu1 %v2896_v37, %s4152_s6 }
0x250f   :  { %v2826_v40 = vpop.permute.xlu0 %2825 }
0x2510   :  { %v4928_v24 = vadd.f32 %v2826_v40, %v2818_v39 }
0x2512   :  { %4112 = vtanh.f32 %v4928_v24  ;;  %v2899_v15 = vpop.permute.xlu1 %2898 }
0x2513   :  { %v4932_v62 = vadd.f32 %v2899_v15, %v2891_v42 }
0x2515   :  { %4114 = vtanh.f32 %v4932_v62 }
0x251f   :  { %v4113_v45 = vpop.eup %4112 }
0x2520   :  { %2831 = vrot.lane.b32.xlu0 %v4113_v45, %s4151_s3 }
0x2522   :  { %v4115_v34 = vpop.eup %4114 }
0x2523   :  { %2904 = vrot.lane.b32.xlu1 %v4115_v34, %s4151_s3 }
0x2592   :  { %v2832_v48 = vpop.permute.xlu0 %2831 }
0x2593   :  { %v2834_v36 = vmul.f32 %v4109_v29, %v2832_v48 }
0x2595   :  { %v2909_v18 = vpack.c.bf16 %v2834_v36, %v2834_v36  ;;  %v2905_v47 = vpop.permute.xlu1 %2904 }
0x2596   :  { %v2907_v49 = vmul.f32 %v4111_v53, %v2905_v47 }
0x2597   :  { %2911 = vrot.lane.b32.xlu0 %v2909_v18, %s4152_s6 }
0x2598   :  { %v2982_v22 = vpack.c.bf16 %v2907_v49, %v2907_v49 }
0x259a   :  { %2984 = vrot.lane.b32.xlu1 %v2982_v22, %s4152_s6 }
0x2609   :  { %v2912_v50 = vpop.permute.xlu0 %2911 }
0x260a   :  { %3829 = vmatmul.mubr.msk.bf16.vlgmr.msra.gmra.mxu0 %vm294_vm2, %v2912_v50 }
0x260b   :  { %3841 = vmatpush3.bf16.msra.mxu0 %v4682_v4  ;;  %3844 = vmatprep.mubr.msk.bf16.mxu0 %vm4149_vm1, %v4148_v5 }
0x260c   :  { %v2985_v44 = vpop.permute.xlu1 %2984  ;;  %3842 = vmatprep.subr.bf16.mxu0 %v4148_v5 }
0x260d   :  { %3837 = vmatmul.mubr.msk.bf16.vlgmr.msra.gmra.mxu1 %vm294_vm2, %v2985_v44 }
0x260e   :  { %3849 = vmatpush3.bf16.msra.mxu1 %v4688_v58  ;;  %3852 = vmatprep.mubr.msk.bf16.mxu1 %vm4149_vm1, %v4148_v5 }
0x260f   :  { %3843 = vmatpush3.bf16.msra.mxu0 %v4695_v59  ;;  %3850 = vmatprep.subr.bf16.mxu1 %v4148_v5 }
0x2612   :  { %3851 = vmatpush3.bf16.msra.mxu1 %v4704_v61 }
0x26ca   :  { %v2950_v4 = vpop.f32.mrf.mxu0 }
0x26cb   :  { %v2956_v51 = vadd.f32 %v2950_v4, %v4740_v35 }
0x26cc   :  { %v3830_v54 = vpop.f32.mrf.mxu0 }
0x26cd   :  { %4116 = vtanh.f32 %v2956_v51  ;;  %v3023_v13 = vpop.f32.mrf.mxu1  ;;  %v3376_v59 = vmul.f32 -1.442695, %v2956_v51 }
0x26ce   :  { %v3029_v32 = vadd.f32 %v3023_v13, %v4757_v52  ;;  %v2953_v55 = vpop.f32.mrf.mxu0 }
0x26cf   :  { %v3838_v7 = vpop.f32.mrf.mxu1 }
0x26d0   :  { %4118 = vtanh.f32 %v3029_v32  ;;  %v3831_v58 = vpop.f32.mrf.mxu0  ;;  %v3378_v61 = vmul.f32 -1.442695, %v3029_v32 }
0x26d1   :  { %v3026_v60 = vpop.f32.mrf.mxu1  ;;  %4120 = vpow2.f32 %v3376_v59  ;;  %v3383_v58 = vld [vmem:[%s5002_s13] ss:$0 sm:$0xff] }
0x26d2   :  { %4122 = vpow2.f32 %v3378_v61 }
0x26d3   :  { %v3839_v0 = vpop.f32.mrf.mxu1 }
0x26d4   :  { %v3384_v0 = vld [vmem:[%s5003_s14] ss:$0 sm:$0xff] }
0x26da   :  { %v4117_v1 = vpop.eup %4116 }
0x26db   :  { %2966 = vrot.lane.b32.xlu0 %v4117_v1, %s4151_s3 }
0x26dd   :  { %v4119_v5 = vpop.eup %4118 }
0x26de   :  { %3039 = vrot.lane.b32.xlu1 %v4119_v5, %s4151_s3  ;;  %v4121_v35 = vpop.eup %4120 }
0x26df   :  { %v4123_v3 = vpop.eup %4122  ;;  %v2960_v2 = vadd.f32 1.0, %v4121_v35 }
0x26e0   :  { %v3033_v52 = vadd.f32 1.0, %v4123_v3 }
0x26e1   :  { %4124 = vrcp.f32 %v2960_v2 }
0x26e2   :  { %4126 = vrcp.f32 %v3033_v52 }
0x26ee   :  { %v4125_v12 = vpop.eup %4124 }
0x26ef   :  { %v4127_v38 = vpop.eup %4126  ;;  %v2964_v28 = vmul.f32 %v4125_v12, %v4928_v24 }
0x26f0   :  { %v3037_v23 = vmul.f32 %v4127_v38, %v4932_v62 }
0x274d   :  { %v2967_v20 = vpop.permute.xlu0 %2966 }
0x274e   :  { %v2969_v8 = vmul.f32 %v4125_v12, %v2967_v20 }
0x2750   :  { %v3040_v9 = vpop.permute.xlu1 %3039  ;;  %2971 = vrot.lane.b32.xlu0 %v2969_v8, %s4152_s6 }
0x2751   :  { %v3042_v30 = vmul.f32 %v4127_v38, %v3040_v9  ;;  %v21_v9 = vstv %s5004_s15 }
0x2752   :  { %22 = vst [vmem:[#allocation6] sm:$0x1] %v21_v9 }
0x2753   :  { %3044 = vrot.lane.b32.xlu1 %v3042_v30, %s4152_s6 }
0x27c2   :  { %v2972_v16 = vpop.permute.xlu0 %2971 }
0x27c3   :  { %v2974_v21 = vadd.f32 %v2972_v16, %v2964_v28  ;;  %v3385_v28 = vld [vmem:[#allocation6] ss:$0 sm:$0xff] }
0x27c5   :  { %4128 = vtanh.f32 %v2974_v21  ;;  %v3045_v25 = vpop.permute.xlu1 %3044 }
0x27c6   :  { %v3047_v14 = vadd.f32 %v3045_v25, %v3037_v23 }
0x27c8   :  { %4130 = vtanh.f32 %v3047_v14 }
0x27d2   :  { %v4129_v11 = vpop.eup %4128 }
0x27d3   :  { %2977 = vrot.lane.b32.xlu0 %v4129_v11, %s4151_s3 }
0x27d5   :  { %v4131_v27 = vpop.eup %4130 }
0x27d6   :  { %3050 = vrot.lane.b32.xlu1 %v4131_v27, %s4151_s3 }
0x2845   :  { %v2978_v56 = vpop.permute.xlu0 %2977 }
0x2846   :  { %v2980_v31 = vmul.f32 %v4125_v12, %v2978_v56 }
0x2848   :  { %v3055_v17 = vpack.c.bf16 %v2980_v31, %v2980_v31  ;;  %v3051_v19 = vpop.permute.xlu1 %3050 }
0x2849   :  { %v3053_v41 = vmul.f32 %v4127_v38, %v3051_v19 }
0x284a   :  { %3057 = vrot.lane.b32.xlu0 %v3055_v17, %s4152_s6 }
0x284b   :  { %v3128_v6 = vpack.c.bf16 %v3053_v41, %v3053_v41 }
0x284d   :  { %3130 = vrot.lane.b32.xlu1 %v3128_v6, %s4152_s6 }
0x28bc   :  { %v3058_v10 = vpop.permute.xlu0 %3057 }
0x28bd   :  { %3845 = vmatmul.mubr.msk.bf16.vlgmr.msra.gmra.mxu0 %vm294_vm2, %v3058_v10 }
0x28bf   :  { %v3131_v43 = vpop.permute.xlu1 %3130 }
0x28c0   :  { %3853 = vmatmul.mubr.msk.bf16.vlgmr.msra.gmra.mxu1 %vm294_vm2, %v3131_v43 }
0x297d   :  { %v3096_v29 = vpop.f32.mrf.mxu0 }
0x297e   :  { %v3102_v63 = vadd.f32 %v3096_v29, %v4744_v26 }
0x297f   :  { %v3846_v57 = vpop.f32.mrf.mxu0 }
0x2980   :  { %4132 = vtanh.f32 %v3102_v63  ;;  %v3169_v53 = vpop.f32.mrf.mxu1  ;;  %v3380_v45 = vmul.f32 -1.442695, %v3102_v63 }
0x2981   :  { %v3175_v33 = vadd.f32 %v3169_v53, %v4753_v46  ;;  %v3099_v37 = vpop.f32.mrf.mxu0 }
0x2982   :  { %v3854_v39 = vpop.f32.mrf.mxu1 }
0x2983   :  { %4134 = vtanh.f32 %v3175_v33  ;;  %v3847_v40 = vpop.f32.mrf.mxu0  ;;  %v3382_v34 = vmul.f32 -1.442695, %v3175_v33 }
0x2984   :  { %v3172_v24 = vpop.f32.mrf.mxu1  ;;  %4136 = vpow2.f32 %v3380_v45 }
0x2985   :  { %4138 = vpow2.f32 %v3382_v34 }
0x2986   :  { %v3855_v42 = vpop.f32.mrf.mxu1 }
0x298d   :  { %v4133_v15 = vpop.eup %4132 }
0x298e   :  { %3112 = vrot.lane.b32.xlu0 %v4133_v15, %s4151_s3 }
0x2990   :  { %v4135_v62 = vpop.eup %4134 }
0x2991   :  { %3185 = vrot.lane.b32.xlu1 %v4135_v62, %s4151_s3  ;;  %v4137_v26 = vpop.eup %4136 }
0x2992   :  { %v4139_v48 = vpop.eup %4138  ;;  %v3106_v36 = vadd.f32 1.0, %v4137_v26 }
0x2993   :  { %v3179_v46 = vadd.f32 1.0, %v4139_v48 }
0x2994   :  { %4140 = vrcp.f32 %v3106_v36 }
0x2995   :  { %4142 = vrcp.f32 %v3179_v46 }
0x29a1   :  { %v4141_v18 = vpop.eup %4140 }
0x29a2   :  { %v4143_v22 = vpop.eup %4142  ;;  %v3110_v4 = vmul.f32 %v4141_v18, %v2974_v21 }
0x29a3   :  { %v3183_v13 = vmul.f32 %v4143_v22, %v3047_v14 }
0x2a00   :  { %v3113_v47 = vpop.permute.xlu0 %3112 }
0x2a01   :  { %v3115_v49 = vmul.f32 %v4141_v18, %v3113_v47 }
0x2a03   :  { %v3186_v50 = vpop.permute.xlu1 %3185  ;;  %3117 = vrot.lane.b32.xlu0 %v3115_v49, %s4152_s6 }
0x2a04   :  { %v3188_v44 = vmul.f32 %v4143_v22, %v3186_v50 }
0x2a06   :  { %3190 = vrot.lane.b32.xlu1 %v3188_v44, %s4152_s6 }
0x2a75   :  { %v3118_v51 = vpop.permute.xlu0 %3117 }
0x2a76   :  { %v3120_v54 = vadd.f32 %v3118_v51, %v3110_v4 }
0x2a78   :  { %4144 = vtanh.f32 %v3120_v54  ;;  %v3191_v32 = vpop.permute.xlu1 %3190 }
0x2a79   :  { %v3193_v55 = vadd.f32 %v3191_v32, %v3183_v13 }
0x2a7b   :  { %4146 = vtanh.f32 %v3193_v55 }
0x2a85   :  { %v4145_v7 = vpop.eup %4144 }
0x2a86   :  { %3123 = vrot.lane.b32.xlu0 %v4145_v7, %s4151_s3 }
0x2a88   :  { %v4147_v60 = vpop.eup %4146 }
0x2a89   :  { %3196 = vrot.lane.b32.xlu1 %v4147_v60, %s4151_s3 }
0x2a8a   :  { %3206 = vrot.lane.b32.xlu0 %v3383_v58, %s4153_s4 }
0x2a8d   :  { %3223 = vrot.lane.b32.xlu1 %v3384_v0, %s4153_s4 }
0x2af8   :  { %v3124_v1 = vpop.permute.xlu0 %3123 }
0x2af9   :  { %v3126_v5 = vmul.f32 %v4141_v18, %v3124_v1 }
0x2afb   :  { %v3197_v59 = vpop.permute.xlu1 %3196 }
0x2afc   :  { %v3207_v61 = vpop.permute.xlu0 %3206  ;;  %v3199_v3 = vmul.f32 %v4143_v22, %v3197_v59 }
0x2afd   :  { %v3209_v35 = vmul.f32 %v3207_v61, %v3126_v5 }
0x2aff   :  { %v3224_v2 = vpop.permute.xlu1 %3223  ;;  %3211 = vrot.lane.b32.xlu0 %v3209_v35, %s4152_s6 }
0x2b00   :  { %v3226_v52 = vmul.f32 %v3224_v2, %v3199_v3 }
0x2b02   :  { %3228 = vrot.lane.b32.xlu1 %v3226_v52, %s4152_s6 }
0x2b71   :  { %v3212_v12 = vpop.permute.xlu0 %3211 }
0x2b72   :  { %v3214_v20 = vsel %vm294_vm2, %v3212_v12, 0.0 }
0x2b73   :  { %3215 = vadd.xlane.f32.xlu0 %v3214_v20 }
0x2b74   :  { %v3229_v8 = vpop.permute.xlu1 %3228 }
0x2b75   :  { %v3231_v38 = vsel %vm294_vm2, %v3229_v8, 0.0 }
0x2b76   :  { %3232 = vadd.xlane.f32.xlu1 %v3231_v38 }
0x2bfc   :  { %v3216_v30 = vpop.xlane.xlu0 %3215 }
0x2bff   :  { %v3233_v16 = vpop.xlane.xlu1 %3232 }
0x2c00   :  { %v3234_v21 = vadd.f32 %v3233_v16, %v3216_v30 }
0x2c02   :  { %v3242_v23 = vadd.f32 %v3385_v28, %v3234_v21 }
0x2c04   :  { %3244 = vst.msk [vmem:[%s5005_s16] sm:$0xff] %vm3243_vm4, %v3242_v23 }

</bundles_post_ra>
